<compile_context>
chip_gen: v5e
topology: v5e:2x2
jax: 0.10.0
libtpu: 0.0.40
codegen_flags: <defaults>
</compile_context>

<pallas_src>
import functools

import jax
import jax.numpy as jnp
from jax.experimental import pallas as pl
from jax.experimental.pallas import tpu as pltpu

H, W = 6, 7
HW = H * W          # 42 board positions
C_IN = 128          # input channels
C_V = 3             # value-head conv channels
C_P = 32            # policy-head conv channels
N_HID = 32          # value-head fc1 width
N_ACT = 7           # policy actions


def _out_block_kernel(x_ref, wv_ref, bv_ref, w1s_ref, b1_ref, w2_ref, b2_ref,
                      wp_ref, bp_ref, wfcs_ref, bfc_ref,
                      p_ref, v_ref, zv_ref, zp_ref, *, tb):
    # x_ref: (HW*tb, 128) f32, rows ordered position-major / sample-minor for
    # this batch tile; channels (the conv contraction) on the lane axis.
    x = x_ref[...]

    # Fused 1x1 conv + folded eval-mode batchnorm + relu, both heads.
    zv_ref[...] = jnp.maximum(
        jnp.dot(x, wv_ref[...], preferred_element_type=jnp.float32) + bv_ref[...], 0.0)
    zp_ref[...] = jnp.maximum(
        jnp.dot(x, wp_ref[...], preferred_element_type=jnp.float32) + bp_ref[...], 0.0)

    # Per-sample fully-connected contraction over (channel, position).
    # The FC weights were pre-split per position in the wrapper, so each term is
    # a tile-aligned (tb, C) slice of the conv activations times a (C, out) block.
    acc_v = jnp.zeros((tb, N_HID), jnp.float32)
    acc_p = jnp.zeros((tb, N_ACT), jnp.float32)
    for hw in range(HW):
        zv_hw = zv_ref[pl.ds(hw * tb, tb), :]            # (tb, 3)
        zp_hw = zp_ref[pl.ds(hw * tb, tb), :]            # (tb, 32)
        acc_v = acc_v + jnp.dot(zv_hw, w1s_ref[hw], preferred_element_type=jnp.float32)
        acc_p = acc_p + jnp.dot(zp_hw, wfcs_ref[hw], preferred_element_type=jnp.float32)

    # Value head: relu(fc1) -> tanh(fc2).
    hid = jnp.maximum(acc_v + b1_ref[...], 0.0)                            # (tb, 32)
    v_ref[...] = jnp.tanh(
        jnp.dot(hid, w2_ref[...], preferred_element_type=jnp.float32) + b2_ref[...])

    # Policy head: log_softmax(fc).exp() == softmax (max-stabilized).
    logits = acc_p + bfc_ref[...]                                          # (tb, 7)
    m = jnp.max(logits, axis=1, keepdims=True)
    e = jnp.exp(logits - m)
    p_ref[...] = e / jnp.sum(e, axis=1, keepdims=True)


def _fold_bn(conv_w, conv_b, gamma, beta, mean, var, eps=1e-5):
    """Fold eval-mode BatchNorm into the preceding 1x1 conv (Cout, Cin) weights."""
    inv = gamma / jnp.sqrt(var + eps)
    w = conv_w * inv[:, None]
    b = (conv_b - mean) * inv + beta
    return w, b


def out_block_forward(s, params, *, tb=8):
    """s: (N, 128, 6, 7) float32 -> (p: (N, 7), v: (N, 1))."""
    n = s.shape[0]
    assert s.shape[1:] == (C_IN, H, W)
    if n % tb != 0:
        tb = n                         # tiny batches: single tile
    g = n // tb
    blk = HW * tb

    # ---- parameter preprocessing (one-time layout plumbing / BN folding) ----
    wv, bv = _fold_bn(params["conv_v_w"], params["conv_v_b"], params["bn_v_gamma"],
                      params["bn_v_beta"], params["bn_v_mean"], params["bn_v_var"])
    wp, bp = _fold_bn(params["conv_p_w"], params["conv_p_b"], params["bn_p_gamma"],
                      params["bn_p_beta"], params["bn_p_mean"], params["bn_p_var"])
    wv_t = wv.T.astype(jnp.float32)                      # (128, 3)
    wp_t = wp.T.astype(jnp.float32)                      # (128, 32)
    bv_r = bv.reshape(1, C_V).astype(jnp.float32)
    bp_r = bp.reshape(1, C_P).astype(jnp.float32)
    # fc1.weight: (32, 3*42), column index = c*42 + hw  ->  (42, 3, 32)
    w1s = params["fc1_w"].reshape(N_HID, C_V, HW).transpose(2, 1, 0).astype(jnp.float32)
    b1 = params["fc1_b"].reshape(1, N_HID).astype(jnp.float32)
    w2 = params["fc2_w"].T.astype(jnp.float32)           # (32, 1)
    b2 = params["fc2_b"].reshape(1, 1).astype(jnp.float32)
    # fc.weight: (7, 32*42), column index = c*42 + hw  ->  (42, 32, 7)
    wfcs = params["fc_w"].reshape(N_ACT, C_P, HW).transpose(2, 1, 0).astype(jnp.float32)
    bfc = params["fc_b"].reshape(1, N_ACT).astype(jnp.float32)

    # ---- input layout plumbing: (N,128,6,7) -> rows (tile, position, sample) ----
    x = s.reshape(n, C_IN, HW).transpose(0, 2, 1)          # (N, 42, 128)
    x = x.reshape(g, tb, HW, C_IN).transpose(0, 2, 1, 3)   # (g, 42, tb, 128)
    x = x.reshape(g * blk, C_IN).astype(jnp.float32)

    kernel = functools.partial(_out_block_kernel, tb=tb)

    p, v = pl.pallas_call(
        kernel,
        grid=(g,),
        in_specs=[
            pl.BlockSpec((blk, C_IN), lambda i: (i, 0)),          # x tile
            pl.BlockSpec((C_IN, C_V), lambda i: (0, 0)),          # folded value conv
            pl.BlockSpec((1, C_V), lambda i: (0, 0)),
            pl.BlockSpec((HW, C_V, N_HID), lambda i: (0, 0, 0)),  # fc1 per position
            pl.BlockSpec((1, N_HID), lambda i: (0, 0)),
            pl.BlockSpec((N_HID, 1), lambda i: (0, 0)),           # fc2
            pl.BlockSpec((1, 1), lambda i: (0, 0)),
            pl.BlockSpec((C_IN, C_P), lambda i: (0, 0)),          # folded policy conv
            pl.BlockSpec((1, C_P), lambda i: (0, 0)),
            pl.BlockSpec((HW, C_P, N_ACT), lambda i: (0, 0, 0)),  # fc per position
            pl.BlockSpec((1, N_ACT), lambda i: (0, 0)),
        ],
        out_specs=[
            pl.BlockSpec((tb, N_ACT), lambda i: (i, 0)),
            pl.BlockSpec((tb, 1), lambda i: (i, 0)),
        ],
        out_shape=(
            jax.ShapeDtypeStruct((n, N_ACT), jnp.float32),
            jax.ShapeDtypeStruct((n, 1), jnp.float32),
        ),
        scratch_shapes=[
            pltpu.VMEM((blk, C_V), jnp.float32),
            pltpu.VMEM((blk, C_P), jnp.float32),
        ],
        compiler_params=pltpu.CompilerParams(dimension_semantics=("parallel",)),
    )(x, wv_t, bv_r, w1s, b1, w2, b2, wp_t, bp_r, wfcs, bfc)
    return p, v


def _reference(s, params, eps=1e-5):
    """Pure-JAX mirror of the PyTorch OutBlock.forward (eval-mode BN)."""
    n = s.shape[0]

    def conv1x1(x, w, b):
        return jnp.einsum("nchw,oc->nohw", x, w, precision="highest") + b[None, :, None, None]

    def bn(x, g, bt, m, v):
        inv = (g / jnp.sqrt(v + eps))[None, :, None, None]
        return (x - m[None, :, None, None]) * inv + bt[None, :, None, None]

    vv = jax.nn.relu(bn(conv1x1(s, params["conv_v_w"], params["conv_v_b"]),
                        params["bn_v_gamma"], params["bn_v_beta"],
                        params["bn_v_mean"], params["bn_v_var"]))
    vv = vv.reshape(n, C_V * HW)
    vv = jax.nn.relu(jnp.dot(vv, params["fc1_w"].T, precision="highest") + params["fc1_b"])
    vv = jnp.tanh(jnp.dot(vv, params["fc2_w"].T, precision="highest") + params["fc2_b"])

    pp = jax.nn.relu(bn(conv1x1(s, params["conv_p_w"], params["conv_p_b"]),
                        params["bn_p_gamma"], params["bn_p_beta"],
                        params["bn_p_mean"], params["bn_p_var"]))
    pp = pp.reshape(n, C_P * HW)
    pp = jnp.dot(pp, params["fc_w"].T, precision="highest") + params["fc_b"]
    pp = jnp.exp(jax.nn.log_softmax(pp, axis=1))
    return pp, vv


if __name__ == "__main__":
    key = jax.random.PRNGKey(0)
    ks = jax.random.split(key, 20)
    N = 16
    s = jax.random.normal(ks[0], (N, C_IN, H, W), jnp.float32)

    params = {
        "conv_v_w": jax.random.normal(ks[1], (C_V, C_IN), jnp.float32) * 0.1,
        "conv_v_b": jax.random.normal(ks[2], (C_V,), jnp.float32) * 0.1,
        "bn_v_gamma": jax.random.uniform(ks[3], (C_V,), jnp.float32, 0.5, 1.5),
        "bn_v_beta": jax.random.normal(ks[4], (C_V,), jnp.float32) * 0.1,
        "bn_v_mean": jax.random.normal(ks[5], (C_V,), jnp.float32) * 0.1,
        "bn_v_var": jax.random.uniform(ks[6], (C_V,), jnp.float32, 0.5, 1.5),
        "fc1_w": jax.random.normal(ks[7], (N_HID, C_V * HW), jnp.float32) * 0.1,
        "fc1_b": jax.random.normal(ks[8], (N_HID,), jnp.float32) * 0.1,
        "fc2_w": jax.random.normal(ks[9], (1, N_HID), jnp.float32) * 0.1,
        "fc2_b": jax.random.normal(ks[10], (1,), jnp.float32) * 0.1,
        "conv_p_w": jax.random.normal(ks[11], (C_P, C_IN), jnp.float32) * 0.1,
        "conv_p_b": jax.random.normal(ks[12], (C_P,), jnp.float32) * 0.1,
        "bn_p_gamma": jax.random.uniform(ks[13], (C_P,), jnp.float32, 0.5, 1.5),
        "bn_p_beta": jax.random.normal(ks[14], (C_P,), jnp.float32) * 0.1,
        "bn_p_mean": jax.random.normal(ks[15], (C_P,), jnp.float32) * 0.1,
        "bn_p_var": jax.random.uniform(ks[16], (C_P,), jnp.float32, 0.5, 1.5),
        "fc_w": jax.random.normal(ks[17], (N_ACT, C_P * HW), jnp.float32) * 0.1,
        "fc_b": jax.random.normal(ks[18], (N_ACT,), jnp.float32) * 0.1,
    }

    p, v = out_block_forward(s, params)
    jax.block_until_ready((p, v))

    p_exp, v_exp = _reference(s, params)
    assert p.shape == (N, N_ACT) and v.shape == (N, 1)
    assert jnp.allclose(p, p_exp, atol=1e-4, rtol=1e-4), float(jnp.max(jnp.abs(p - p_exp)))
    assert jnp.allclose(v, v_exp, atol=1e-4, rtol=1e-4), float(jnp.max(jnp.abs(v - v_exp)))

    print("KERNEL_OK")
</pallas_src>

<mosaic_0001>
module attributes {stable_mosaic.version = 11 : i64} {
  func.func @_out_block_kernel(%arg0: i32, %arg1: memref<336x128xf32, #tpu.memory_space<vmem>>, %arg2: memref<128x3xf32, #tpu.memory_space<vmem>>, %arg3: memref<1x3xf32, #tpu.memory_space<vmem>>, %arg4: memref<42x3x32xf32, #tpu.memory_space<vmem>>, %arg5: memref<1x32xf32, #tpu.memory_space<vmem>>, %arg6: memref<32x1xf32, #tpu.memory_space<vmem>>, %arg7: memref<1x1xf32, #tpu.memory_space<vmem>>, %arg8: memref<128x32xf32, #tpu.memory_space<vmem>>, %arg9: memref<1x32xf32, #tpu.memory_space<vmem>>, %arg10: memref<42x32x7xf32, #tpu.memory_space<vmem>>, %arg11: memref<1x7xf32, #tpu.memory_space<vmem>>, %arg12: memref<8x7xf32, #tpu.memory_space<vmem>>, %arg13: memref<8x1xf32, #tpu.memory_space<vmem>>, %arg14: memref<336x3xf32, #tpu.memory_space<vmem>>, %arg15: memref<336x32xf32, #tpu.memory_space<vmem>>) attributes {dimension_semantics = [#tpu.dimension_semantics<parallel>], iteration_bounds = array<i64: 2>, scalar_prefetch = 0 : i64, scratch_operands = 2 : i64, tpu.core_type = #tpu.core_type<tc>, window_params = [{transform_indices = @transform_0, window_bounds = array<i64: 336, 128>}, {pipeline_mode = #tpu.pipeline_mode<synchronous>, transform_indices = @transform_1, window_bounds = array<i64: 128, 3>}, {pipeline_mode = #tpu.pipeline_mode<synchronous>, transform_indices = @transform_2, window_bounds = array<i64: 1, 3>}, {pipeline_mode = #tpu.pipeline_mode<synchronous>, transform_indices = @transform_3, window_bounds = array<i64: 42, 3, 32>}, {pipeline_mode = #tpu.pipeline_mode<synchronous>, transform_indices = @transform_4, window_bounds = array<i64: 1, 32>}, {pipeline_mode = #tpu.pipeline_mode<synchronous>, transform_indices = @transform_5, window_bounds = array<i64: 32, 1>}, {pipeline_mode = #tpu.pipeline_mode<synchronous>, transform_indices = @transform_6, window_bounds = array<i64: 1, 1>}, {pipeline_mode = #tpu.pipeline_mode<synchronous>, transform_indices = @transform_7, window_bounds = array<i64: 128, 32>}, {pipeline_mode = #tpu.pipeline_mode<synchronous>, transform_indices = @transform_8, window_bounds = array<i64: 1, 32>}, {pipeline_mode = #tpu.pipeline_mode<synchronous>, transform_indices = @transform_9, window_bounds = array<i64: 42, 32, 7>}, {pipeline_mode = #tpu.pipeline_mode<synchronous>, transform_indices = @transform_10, window_bounds = array<i64: 1, 7>}, {transform_indices = @transform_11, window_bounds = array<i64: 8, 7>}, {transform_indices = @transform_12, window_bounds = array<i64: 8, 1>}]} {
    %c0 = arith.constant 0 : index
    %c0_0 = arith.constant 0 : index
    %0 = vector.load %arg1[%c0, %c0_0] : memref<336x128xf32, #tpu.memory_space<vmem>>, vector<336x128xf32>
    %c0_1 = arith.constant 0 : index
    %c0_2 = arith.constant 0 : index
    %1 = vector.load %arg2[%c0_1, %c0_2] : memref<128x3xf32, #tpu.memory_space<vmem>>, vector<128x3xf32>
    %cst = arith.constant dense<0.000000e+00> : vector<336x3xf32>
    %2 = tpu.matmul %0, %1, %cst {dimension_numbers = #tpu.dot_dimension_numbers<[1], [0], [0], [1], [0, 0, 1, 1], [], []>} : vector<336x128xf32>, vector<128x3xf32>, vector<336x3xf32> -> vector<336x3xf32>
    %c0_3 = arith.constant 0 : index
    %c0_4 = arith.constant 0 : index
    %3 = vector.load %arg3[%c0_3, %c0_4] : memref<1x3xf32, #tpu.memory_space<vmem>>, vector<1x3xf32>
    %4 = vector.broadcast %3 : vector<1x3xf32> to vector<336x3xf32>
    %5 = arith.addf %2, %4 : vector<336x3xf32>
    %cst_5 = arith.constant 0.000000e+00 : f32
    %6 = vector.broadcast %cst_5 : f32 to vector<336x3xf32>
    %7 = arith.maximumf %5, %6 : vector<336x3xf32>
    %c0_6 = arith.constant 0 : index
    %c0_7 = arith.constant 0 : index
    %8 = vector.load %arg14[%c0_6, %c0_7] : memref<336x3xf32, #tpu.memory_space<vmem>>, vector<336x3xf32>
    tpu.vector_store %arg14[%c0_6, %c0_7], %7 {strides = array<i32>} : memref<336x3xf32, #tpu.memory_space<vmem>>, vector<336x3xf32>,
    %c0_8 = arith.constant 0 : index
    %c0_9 = arith.constant 0 : index
    %9 = vector.load %arg8[%c0_8, %c0_9] : memref<128x32xf32, #tpu.memory_space<vmem>>, vector<128x32xf32>
    %cst_10 = arith.constant dense<0.000000e+00> : vector<336x32xf32>
    %10 = tpu.matmul %0, %9, %cst_10 {dimension_numbers = #tpu.dot_dimension_numbers<[1], [0], [0], [1], [0, 0, 1, 1], [], []>} : vector<336x128xf32>, vector<128x32xf32>, vector<336x32xf32> -> vector<336x32xf32>
    %c0_11 = arith.constant 0 : index
    %c0_12 = arith.constant 0 : index
    %11 = vector.load %arg9[%c0_11, %c0_12] : memref<1x32xf32, #tpu.memory_space<vmem>>, vector<1x32xf32>
    %12 = vector.broadcast %11 : vector<1x32xf32> to vector<336x32xf32>
    %13 = arith.addf %10, %12 : vector<336x32xf32>
    %cst_13 = arith.constant 0.000000e+00 : f32
    %14 = vector.broadcast %cst_13 : f32 to vector<336x32xf32>
    %15 = arith.maximumf %13, %14 : vector<336x32xf32>
    %c0_14 = arith.constant 0 : index
    %c0_15 = arith.constant 0 : index
    %16 = vector.load %arg15[%c0_14, %c0_15] : memref<336x32xf32, #tpu.memory_space<vmem>>, vector<336x32xf32>
    tpu.vector_store %arg15[%c0_14, %c0_15], %15 {strides = array<i32>} : memref<336x32xf32, #tpu.memory_space<vmem>>, vector<336x32xf32>,
    %cst_16 = arith.constant 0.000000e+00 : f32
    %17 = vector.broadcast %cst_16 : f32 to vector<8x32xf32>
    %cst_17 = arith.constant 0.000000e+00 : f32
    %18 = vector.broadcast %cst_17 : f32 to vector<8x7xf32>
    %c0_18 = arith.constant 0 : index
    %c0_19 = arith.constant 0 : index
    %19 = vector.load %arg14[%c0_18, %c0_19] : memref<336x3xf32, #tpu.memory_space<vmem>>, vector<8x3xf32>
    %c0_20 = arith.constant 0 : index
    %c0_21 = arith.constant 0 : index
    %20 = vector.load %arg15[%c0_20, %c0_21] : memref<336x32xf32, #tpu.memory_space<vmem>>, vector<8x32xf32>
    %c0_22 = arith.constant 0 : index
    %c0_23 = arith.constant 0 : index
    %c0_24 = arith.constant 0 : index
    %21 = vector.load %arg4[%c0_22, %c0_23, %c0_24] : memref<42x3x32xf32, #tpu.memory_space<vmem>>, vector<1x3x32xf32>
    %22 = vector.shape_cast %21 : vector<1x3x32xf32> to vector<3x32xf32>
    %cst_25 = arith.constant dense<0.000000e+00> : vector<8x32xf32>
    %23 = tpu.matmul %19, %22, %cst_25 {dimension_numbers = #tpu.dot_dimension_numbers<[1], [0], [0], [1], [0, 0, 1, 1], [], []>} : vector<8x3xf32>, vector<3x32xf32>, vector<8x32xf32> -> vector<8x32xf32>
    %24 = arith.addf %17, %23 : vector<8x32xf32>
    %c0_26 = arith.constant 0 : index
    %c0_27 = arith.constant 0 : index
    %c0_28 = arith.constant 0 : index
    %25 = vector.load %arg10[%c0_26, %c0_27, %c0_28] : memref<42x32x7xf32, #tpu.memory_space<vmem>>, vector<1x32x7xf32>
    %26 = vector.shape_cast %25 : vector<1x32x7xf32> to vector<32x7xf32>
    %cst_29 = arith.constant dense<0.000000e+00> : vector<8x7xf32>
    %27 = tpu.matmul %20, %26, %cst_29 {dimension_numbers = #tpu.dot_dimension_numbers<[1], [0], [0], [1], [0, 0, 1, 1], [], []>} : vector<8x32xf32>, vector<32x7xf32>, vector<8x7xf32> -> vector<8x7xf32>
    %28 = arith.addf %18, %27 : vector<8x7xf32>
    %c8 = arith.constant 8 : index
    %c0_30 = arith.constant 0 : index
    %29 = vector.load %arg14[%c8, %c0_30] : memref<336x3xf32, #tpu.memory_space<vmem>>, vector<8x3xf32>
    %c8_31 = arith.constant 8 : index
    %c0_32 = arith.constant 0 : index
    %30 = vector.load %arg15[%c8_31, %c0_32] : memref<336x32xf32, #tpu.memory_space<vmem>>, vector<8x32xf32>
    %c1 = arith.constant 1 : index
    %c0_33 = arith.constant 0 : index
    %c0_34 = arith.constant 0 : index
    %31 = vector.load %arg4[%c1, %c0_33, %c0_34] : memref<42x3x32xf32, #tpu.memory_space<vmem>>, vector<1x3x32xf32>
    %32 = vector.shape_cast %31 : vector<1x3x32xf32> to vector<3x32xf32>
    %cst_35 = arith.constant dense<0.000000e+00> : vector<8x32xf32>
    %33 = tpu.matmul %29, %32, %cst_35 {dimension_numbers = #tpu.dot_dimension_numbers<[1], [0], [0], [1], [0, 0, 1, 1], [], []>} : vector<8x3xf32>, vector<3x32xf32>, vector<8x32xf32> -> vector<8x32xf32>
    %34 = arith.addf %24, %33 : vector<8x32xf32>
    %c1_36 = arith.constant 1 : index
    %c0_37 = arith.constant 0 : index
    %c0_38 = arith.constant 0 : index
    %35 = vector.load %arg10[%c1_36, %c0_37, %c0_38] : memref<42x32x7xf32, #tpu.memory_space<vmem>>, vector<1x32x7xf32>
    %36 = vector.shape_cast %35 : vector<1x32x7xf32> to vector<32x7xf32>
    %cst_39 = arith.constant dense<0.000000e+00> : vector<8x7xf32>
    %37 = tpu.matmul %30, %36, %cst_39 {dimension_numbers = #tpu.dot_dimension_numbers<[1], [0], [0], [1], [0, 0, 1, 1], [], []>} : vector<8x32xf32>, vector<32x7xf32>, vector<8x7xf32> -> vector<8x7xf32>
    %38 = arith.addf %28, %37 : vector<8x7xf32>
    %c16 = arith.constant 16 : index
    %c0_40 = arith.constant 0 : index
    %39 = vector.load %arg14[%c16, %c0_40] : memref<336x3xf32, #tpu.memory_space<vmem>>, vector<8x3xf32>
    %c16_41 = arith.constant 16 : index
    %c0_42 = arith.constant 0 : index
    %40 = vector.load %arg15[%c16_41, %c0_42] : memref<336x32xf32, #tpu.memory_space<vmem>>, vector<8x32xf32>
    %c2 = arith.constant 2 : index
    %c0_43 = arith.constant 0 : index
    %c0_44 = arith.constant 0 : index
    %41 = vector.load %arg4[%c2, %c0_43, %c0_44] : memref<42x3x32xf32, #tpu.memory_space<vmem>>, vector<1x3x32xf32>
    %42 = vector.shape_cast %41 : vector<1x3x32xf32> to vector<3x32xf32>
    %cst_45 = arith.constant dense<0.000000e+00> : vector<8x32xf32>
    %43 = tpu.matmul %39, %42, %cst_45 {dimension_numbers = #tpu.dot_dimension_numbers<[1], [0], [0], [1], [0, 0, 1, 1], [], []>} : vector<8x3xf32>, vector<3x32xf32>, vector<8x32xf32> -> vector<8x32xf32>
    %44 = arith.addf %34, %43 : vector<8x32xf32>
    %c2_46 = arith.constant 2 : index
    %c0_47 = arith.constant 0 : index
    %c0_48 = arith.constant 0 : index
    %45 = vector.load %arg10[%c2_46, %c0_47, %c0_48] : memref<42x32x7xf32, #tpu.memory_space<vmem>>, vector<1x32x7xf32>
    %46 = vector.shape_cast %45 : vector<1x32x7xf32> to vector<32x7xf32>
    %cst_49 = arith.constant dense<0.000000e+00> : vector<8x7xf32>
    %47 = tpu.matmul %40, %46, %cst_49 {dimension_numbers = #tpu.dot_dimension_numbers<[1], [0], [0], [1], [0, 0, 1, 1], [], []>} : vector<8x32xf32>, vector<32x7xf32>, vector<8x7xf32> -> vector<8x7xf32>
    %48 = arith.addf %38, %47 : vector<8x7xf32>
    %c24 = arith.constant 24 : index
    %c0_50 = arith.constant 0 : index
    %49 = vector.load %arg14[%c24, %c0_50] : memref<336x3xf32, #tpu.memory_space<vmem>>, vector<8x3xf32>
    %c24_51 = arith.constant 24 : index
    %c0_52 = arith.constant 0 : index
    %50 = vector.load %arg15[%c24_51, %c0_52] : memref<336x32xf32, #tpu.memory_space<vmem>>, vector<8x32xf32>
    %c3 = arith.constant 3 : index
    %c0_53 = arith.constant 0 : index
    %c0_54 = arith.constant 0 : index
    %51 = vector.load %arg4[%c3, %c0_53, %c0_54] : memref<42x3x32xf32, #tpu.memory_space<vmem>>, vector<1x3x32xf32>
    %52 = vector.shape_cast %51 : vector<1x3x32xf32> to vector<3x32xf32>
    %cst_55 = arith.constant dense<0.000000e+00> : vector<8x32xf32>
    %53 = tpu.matmul %49, %52, %cst_55 {dimension_numbers = #tpu.dot_dimension_numbers<[1], [0], [0], [1], [0, 0, 1, 1], [], []>} : vector<8x3xf32>, vector<3x32xf32>, vector<8x32xf32> -> vector<8x32xf32>
    %54 = arith.addf %44, %53 : vector<8x32xf32>
    %c3_56 = arith.constant 3 : index
    %c0_57 = arith.constant 0 : index
    %c0_58 = arith.constant 0 : index
    %55 = vector.load %arg10[%c3_56, %c0_57, %c0_58] : memref<42x32x7xf32, #tpu.memory_space<vmem>>, vector<1x32x7xf32>
    %56 = vector.shape_cast %55 : vector<1x32x7xf32> to vector<32x7xf32>
    %cst_59 = arith.constant dense<0.000000e+00> : vector<8x7xf32>
    %57 = tpu.matmul %50, %56, %cst_59 {dimension_numbers = #tpu.dot_dimension_numbers<[1], [0], [0], [1], [0, 0, 1, 1], [], []>} : vector<8x32xf32>, vector<32x7xf32>, vector<8x7xf32> -> vector<8x7xf32>
    %58 = arith.addf %48, %57 : vector<8x7xf32>
    %c32 = arith.constant 32 : index
    %c0_60 = arith.constant 0 : index
    %59 = vector.load %arg14[%c32, %c0_60] : memref<336x3xf32, #tpu.memory_space<vmem>>, vector<8x3xf32>
    %c32_61 = arith.constant 32 : index
    %c0_62 = arith.constant 0 : index
    %60 = vector.load %arg15[%c32_61, %c0_62] : memref<336x32xf32, #tpu.memory_space<vmem>>, vector<8x32xf32>
    %c4 = arith.constant 4 : index
    %c0_63 = arith.constant 0 : index
    %c0_64 = arith.constant 0 : index
    %61 = vector.load %arg4[%c4, %c0_63, %c0_64] : memref<42x3x32xf32, #tpu.memory_space<vmem>>, vector<1x3x32xf32>
    %62 = vector.shape_cast %61 : vector<1x3x32xf32> to vector<3x32xf32>
    %cst_65 = arith.constant dense<0.000000e+00> : vector<8x32xf32>
    %63 = tpu.matmul %59, %62, %cst_65 {dimension_numbers = #tpu.dot_dimension_numbers<[1], [0], [0], [1], [0, 0, 1, 1], [], []>} : vector<8x3xf32>, vector<3x32xf32>, vector<8x32xf32> -> vector<8x32xf32>
    %64 = arith.addf %54, %63 : vector<8x32xf32>
    %c4_66 = arith.constant 4 : index
    %c0_67 = arith.constant 0 : index
    %c0_68 = arith.constant 0 : index
    %65 = vector.load %arg10[%c4_66, %c0_67, %c0_68] : memref<42x32x7xf32, #tpu.memory_space<vmem>>, vector<1x32x7xf32>
    %66 = vector.shape_cast %65 : vector<1x32x7xf32> to vector<32x7xf32>
    %cst_69 = arith.constant dense<0.000000e+00> : vector<8x7xf32>
    %67 = tpu.matmul %60, %66, %cst_69 {dimension_numbers = #tpu.dot_dimension_numbers<[1], [0], [0], [1], [0, 0, 1, 1], [], []>} : vector<8x32xf32>, vector<32x7xf32>, vector<8x7xf32> -> vector<8x7xf32>
    %68 = arith.addf %58, %67 : vector<8x7xf32>
    %c40 = arith.constant 40 : index
    %c0_70 = arith.constant 0 : index
    %69 = vector.load %arg14[%c40, %c0_70] : memref<336x3xf32, #tpu.memory_space<vmem>>, vector<8x3xf32>
    %c40_71 = arith.constant 40 : index
    %c0_72 = arith.constant 0 : index
    %70 = vector.load %arg15[%c40_71, %c0_72] : memref<336x32xf32, #tpu.memory_space<vmem>>, vector<8x32xf32>
    %c5 = arith.constant 5 : index
    %c0_73 = arith.constant 0 : index
    %c0_74 = arith.constant 0 : index
    %71 = vector.load %arg4[%c5, %c0_73, %c0_74] : memref<42x3x32xf32, #tpu.memory_space<vmem>>, vector<1x3x32xf32>
    %72 = vector.shape_cast %71 : vector<1x3x32xf32> to vector<3x32xf32>
    %cst_75 = arith.constant dense<0.000000e+00> : vector<8x32xf32>
    %73 = tpu.matmul %69, %72, %cst_75 {dimension_numbers = #tpu.dot_dimension_numbers<[1], [0], [0], [1], [0, 0, 1, 1], [], []>} : vector<8x3xf32>, vector<3x32xf32>, vector<8x32xf32> -> vector<8x32xf32>
    %74 = arith.addf %64, %73 : vector<8x32xf32>
    %c5_76 = arith.constant 5 : index
    %c0_77 = arith.constant 0 : index
    %c0_78 = arith.constant 0 : index
    %75 = vector.load %arg10[%c5_76, %c0_77, %c0_78] : memref<42x32x7xf32, #tpu.memory_space<vmem>>, vector<1x32x7xf32>
    %76 = vector.shape_cast %75 : vector<1x32x7xf32> to vector<32x7xf32>
    %cst_79 = arith.constant dense<0.000000e+00> : vector<8x7xf32>
    %77 = tpu.matmul %70, %76, %cst_79 {dimension_numbers = #tpu.dot_dimension_numbers<[1], [0], [0], [1], [0, 0, 1, 1], [], []>} : vector<8x32xf32>, vector<32x7xf32>, vector<8x7xf32> -> vector<8x7xf32>
    %78 = arith.addf %68, %77 : vector<8x7xf32>
    %c48 = arith.constant 48 : index
    %c0_80 = arith.constant 0 : index
    %79 = vector.load %arg14[%c48, %c0_80] : memref<336x3xf32, #tpu.memory_space<vmem>>, vector<8x3xf32>
    %c48_81 = arith.constant 48 : index
    %c0_82 = arith.constant 0 : index
    %80 = vector.load %arg15[%c48_81, %c0_82] : memref<336x32xf32, #tpu.memory_space<vmem>>, vector<8x32xf32>
    %c6 = arith.constant 6 : index
    %c0_83 = arith.constant 0 : index
    %c0_84 = arith.constant 0 : index
    %81 = vector.load %arg4[%c6, %c0_83, %c0_84] : memref<42x3x32xf32, #tpu.memory_space<vmem>>, vector<1x3x32xf32>
    %82 = vector.shape_cast %81 : vector<1x3x32xf32> to vector<3x32xf32>
    %cst_85 = arith.constant dense<0.000000e+00> : vector<8x32xf32>
    %83 = tpu.matmul %79, %82, %cst_85 {dimension_numbers = #tpu.dot_dimension_numbers<[1], [0], [0], [1], [0, 0, 1, 1], [], []>} : vector<8x3xf32>, vector<3x32xf32>, vector<8x32xf32> -> vector<8x32xf32>
    %84 = arith.addf %74, %83 : vector<8x32xf32>
    %c6_86 = arith.constant 6 : index
    %c0_87 = arith.constant 0 : index
    %c0_88 = arith.constant 0 : index
    %85 = vector.load %arg10[%c6_86, %c0_87, %c0_88] : memref<42x32x7xf32, #tpu.memory_space<vmem>>, vector<1x32x7xf32>
    %86 = vector.shape_cast %85 : vector<1x32x7xf32> to vector<32x7xf32>
    %cst_89 = arith.constant dense<0.000000e+00> : vector<8x7xf32>
    %87 = tpu.matmul %80, %86, %cst_89 {dimension_numbers = #tpu.dot_dimension_numbers<[1], [0], [0], [1], [0, 0, 1, 1], [], []>} : vector<8x32xf32>, vector<32x7xf32>, vector<8x7xf32> -> vector<8x7xf32>
    %88 = arith.addf %78, %87 : vector<8x7xf32>
    %c56 = arith.constant 56 : index
    %c0_90 = arith.constant 0 : index
    %89 = vector.load %arg14[%c56, %c0_90] : memref<336x3xf32, #tpu.memory_space<vmem>>, vector<8x3xf32>
    %c56_91 = arith.constant 56 : index
    %c0_92 = arith.constant 0 : index
    %90 = vector.load %arg15[%c56_91, %c0_92] : memref<336x32xf32, #tpu.memory_space<vmem>>, vector<8x32xf32>
    %c7 = arith.constant 7 : index
    %c0_93 = arith.constant 0 : index
    %c0_94 = arith.constant 0 : index
    %91 = vector.load %arg4[%c7, %c0_93, %c0_94] : memref<42x3x32xf32, #tpu.memory_space<vmem>>, vector<1x3x32xf32>
    %92 = vector.shape_cast %91 : vector<1x3x32xf32> to vector<3x32xf32>
    %cst_95 = arith.constant dense<0.000000e+00> : vector<8x32xf32>
    %93 = tpu.matmul %89, %92, %cst_95 {dimension_numbers = #tpu.dot_dimension_numbers<[1], [0], [0], [1], [0, 0, 1, 1], [], []>} : vector<8x3xf32>, vector<3x32xf32>, vector<8x32xf32> -> vector<8x32xf32>
    %94 = arith.addf %84, %93 : vector<8x32xf32>
    %c7_96 = arith.constant 7 : index
    %c0_97 = arith.constant 0 : index
    %c0_98 = arith.constant 0 : index
    %95 = vector.load %arg10[%c7_96, %c0_97, %c0_98] : memref<42x32x7xf32, #tpu.memory_space<vmem>>, vector<1x32x7xf32>
    %96 = vector.shape_cast %95 : vector<1x32x7xf32> to vector<32x7xf32>
    %cst_99 = arith.constant dense<0.000000e+00> : vector<8x7xf32>
    %97 = tpu.matmul %90, %96, %cst_99 {dimension_numbers = #tpu.dot_dimension_numbers<[1], [0], [0], [1], [0, 0, 1, 1], [], []>} : vector<8x32xf32>, vector<32x7xf32>, vector<8x7xf32> -> vector<8x7xf32>
    %98 = arith.addf %88, %97 : vector<8x7xf32>
    %c64 = arith.constant 64 : index
    %c0_100 = arith.constant 0 : index
    %99 = vector.load %arg14[%c64, %c0_100] : memref<336x3xf32, #tpu.memory_space<vmem>>, vector<8x3xf32>
    %c64_101 = arith.constant 64 : index
    %c0_102 = arith.constant 0 : index
    %100 = vector.load %arg15[%c64_101, %c0_102] : memref<336x32xf32, #tpu.memory_space<vmem>>, vector<8x32xf32>
    %c8_103 = arith.constant 8 : index
    %c0_104 = arith.constant 0 : index
    %c0_105 = arith.constant 0 : index
    %101 = vector.load %arg4[%c8_103, %c0_104, %c0_105] : memref<42x3x32xf32, #tpu.memory_space<vmem>>, vector<1x3x32xf32>
    %102 = vector.shape_cast %101 : vector<1x3x32xf32> to vector<3x32xf32>
    %cst_106 = arith.constant dense<0.000000e+00> : vector<8x32xf32>
    %103 = tpu.matmul %99, %102, %cst_106 {dimension_numbers = #tpu.dot_dimension_numbers<[1], [0], [0], [1], [0, 0, 1, 1], [], []>} : vector<8x3xf32>, vector<3x32xf32>, vector<8x32xf32> -> vector<8x32xf32>
    %104 = arith.addf %94, %103 : vector<8x32xf32>
    %c8_107 = arith.constant 8 : index
    %c0_108 = arith.constant 0 : index
    %c0_109 = arith.constant 0 : index
    %105 = vector.load %arg10[%c8_107, %c0_108, %c0_109] : memref<42x32x7xf32, #tpu.memory_space<vmem>>, vector<1x32x7xf32>
    %106 = vector.shape_cast %105 : vector<1x32x7xf32> to vector<32x7xf32>
    %cst_110 = arith.constant dense<0.000000e+00> : vector<8x7xf32>
    %107 = tpu.matmul %100, %106, %cst_110 {dimension_numbers = #tpu.dot_dimension_numbers<[1], [0], [0], [1], [0, 0, 1, 1], [], []>} : vector<8x32xf32>, vector<32x7xf32>, vector<8x7xf32> -> vector<8x7xf32>
    %108 = arith.addf %98, %107 : vector<8x7xf32>
    %c72 = arith.constant 72 : index
    %c0_111 = arith.constant 0 : index
    %109 = vector.load %arg14[%c72, %c0_111] : memref<336x3xf32, #tpu.memory_space<vmem>>, vector<8x3xf32>
    %c72_112 = arith.constant 72 : index
    %c0_113 = arith.constant 0 : index
    %110 = vector.load %arg15[%c72_112, %c0_113] : memref<336x32xf32, #tpu.memory_space<vmem>>, vector<8x32xf32>
    %c9 = arith.constant 9 : index
    %c0_114 = arith.constant 0 : index
    %c0_115 = arith.constant 0 : index
    %111 = vector.load %arg4[%c9, %c0_114, %c0_115] : memref<42x3x32xf32, #tpu.memory_space<vmem>>, vector<1x3x32xf32>
    %112 = vector.shape_cast %111 : vector<1x3x32xf32> to vector<3x32xf32>
    %cst_116 = arith.constant dense<0.000000e+00> : vector<8x32xf32>
    %113 = tpu.matmul %109, %112, %cst_116 {dimension_numbers = #tpu.dot_dimension_numbers<[1], [0], [0], [1], [0, 0, 1, 1], [], []>} : vector<8x3xf32>, vector<3x32xf32>, vector<8x32xf32> -> vector<8x32xf32>
    %114 = arith.addf %104, %113 : vector<8x32xf32>
    %c9_117 = arith.constant 9 : index
    %c0_118 = arith.constant 0 : index
    %c0_119 = arith.constant 0 : index
    %115 = vector.load %arg10[%c9_117, %c0_118, %c0_119] : memref<42x32x7xf32, #tpu.memory_space<vmem>>, vector<1x32x7xf32>
    %116 = vector.shape_cast %115 : vector<1x32x7xf32> to vector<32x7xf32>
    %cst_120 = arith.constant dense<0.000000e+00> : vector<8x7xf32>
    %117 = tpu.matmul %110, %116, %cst_120 {dimension_numbers = #tpu.dot_dimension_numbers<[1], [0], [0], [1], [0, 0, 1, 1], [], []>} : vector<8x32xf32>, vector<32x7xf32>, vector<8x7xf32> -> vector<8x7xf32>
    %118 = arith.addf %108, %117 : vector<8x7xf32>
    %c80 = arith.constant 80 : index
    %c0_121 = arith.constant 0 : index
    %119 = vector.load %arg14[%c80, %c0_121] : memref<336x3xf32, #tpu.memory_space<vmem>>, vector<8x3xf32>
    %c80_122 = arith.constant 80 : index
    %c0_123 = arith.constant 0 : index
    %120 = vector.load %arg15[%c80_122, %c0_123] : memref<336x32xf32, #tpu.memory_space<vmem>>, vector<8x32xf32>
    %c10 = arith.constant 10 : index
    %c0_124 = arith.constant 0 : index
    %c0_125 = arith.constant 0 : index
    %121 = vector.load %arg4[%c10, %c0_124, %c0_125] : memref<42x3x32xf32, #tpu.memory_space<vmem>>, vector<1x3x32xf32>
    %122 = vector.shape_cast %121 : vector<1x3x32xf32> to vector<3x32xf32>
    %cst_126 = arith.constant dense<0.000000e+00> : vector<8x32xf32>
    %123 = tpu.matmul %119, %122, %cst_126 {dimension_numbers = #tpu.dot_dimension_numbers<[1], [0], [0], [1], [0, 0, 1, 1], [], []>} : vector<8x3xf32>, vector<3x32xf32>, vector<8x32xf32> -> vector<8x32xf32>
    %124 = arith.addf %114, %123 : vector<8x32xf32>
    %c10_127 = arith.constant 10 : index
    %c0_128 = arith.constant 0 : index
    %c0_129 = arith.constant 0 : index
    %125 = vector.load %arg10[%c10_127, %c0_128, %c0_129] : memref<42x32x7xf32, #tpu.memory_space<vmem>>, vector<1x32x7xf32>
    %126 = vector.shape_cast %125 : vector<1x32x7xf32> to vector<32x7xf32>
    %cst_130 = arith.constant dense<0.000000e+00> : vector<8x7xf32>
    %127 = tpu.matmul %120, %126, %cst_130 {dimension_numbers = #tpu.dot_dimension_numbers<[1], [0], [0], [1], [0, 0, 1, 1], [], []>} : vector<8x32xf32>, vector<32x7xf32>, vector<8x7xf32> -> vector<8x7xf32>
    %128 = arith.addf %118, %127 : vector<8x7xf32>
    %c88 = arith.constant 88 : index
    %c0_131 = arith.constant 0 : index
    %129 = vector.load %arg14[%c88, %c0_131] : memref<336x3xf32, #tpu.memory_space<vmem>>, vector<8x3xf32>
    %c88_132 = arith.constant 88 : index
    %c0_133 = arith.constant 0 : index
    %130 = vector.load %arg15[%c88_132, %c0_133] : memref<336x32xf32, #tpu.memory_space<vmem>>, vector<8x32xf32>
    %c11 = arith.constant 11 : index
    %c0_134 = arith.constant 0 : index
    %c0_135 = arith.constant 0 : index
    %131 = vector.load %arg4[%c11, %c0_134, %c0_135] : memref<42x3x32xf32, #tpu.memory_space<vmem>>, vector<1x3x32xf32>
    %132 = vector.shape_cast %131 : vector<1x3x32xf32> to vector<3x32xf32>
    %cst_136 = arith.constant dense<0.000000e+00> : vector<8x32xf32>
    %133 = tpu.matmul %129, %132, %cst_136 {dimension_numbers = #tpu.dot_dimension_numbers<[1], [0], [0], [1], [0, 0, 1, 1], [], []>} : vector<8x3xf32>, vector<3x32xf32>, vector<8x32xf32> -> vector<8x32xf32>
    %134 = arith.addf %124, %133 : vector<8x32xf32>
    %c11_137 = arith.constant 11 : index
    %c0_138 = arith.constant 0 : index
    %c0_139 = arith.constant 0 : index
    %135 = vector.load %arg10[%c11_137, %c0_138, %c0_139] : memref<42x32x7xf32, #tpu.memory_space<vmem>>, vector<1x32x7xf32>
    %136 = vector.shape_cast %135 : vector<1x32x7xf32> to vector<32x7xf32>
    %cst_140 = arith.constant dense<0.000000e+00> : vector<8x7xf32>
    %137 = tpu.matmul %130, %136, %cst_140 {dimension_numbers = #tpu.dot_dimension_numbers<[1], [0], [0], [1], [0, 0, 1, 1], [], []>} : vector<8x32xf32>, vector<32x7xf32>, vector<8x7xf32> -> vector<8x7xf32>
    %138 = arith.addf %128, %137 : vector<8x7xf32>
    %c96 = arith.constant 96 : index
    %c0_141 = arith.constant 0 : index
    %139 = vector.load %arg14[%c96, %c0_141] : memref<336x3xf32, #tpu.memory_space<vmem>>, vector<8x3xf32>
    %c96_142 = arith.constant 96 : index
    %c0_143 = arith.constant 0 : index
    %140 = vector.load %arg15[%c96_142, %c0_143] : memref<336x32xf32, #tpu.memory_space<vmem>>, vector<8x32xf32>
    %c12 = arith.constant 12 : index
    %c0_144 = arith.constant 0 : index
    %c0_145 = arith.constant 0 : index
    %141 = vector.load %arg4[%c12, %c0_144, %c0_145] : memref<42x3x32xf32, #tpu.memory_space<vmem>>, vector<1x3x32xf32>
    %142 = vector.shape_cast %141 : vector<1x3x32xf32> to vector<3x32xf32>
    %cst_146 = arith.constant dense<0.000000e+00> : vector<8x32xf32>
    %143 = tpu.matmul %139, %142, %cst_146 {dimension_numbers = #tpu.dot_dimension_numbers<[1], [0], [0], [1], [0, 0, 1, 1], [], []>} : vector<8x3xf32>, vector<3x32xf32>, vector<8x32xf32> -> vector<8x32xf32>
    %144 = arith.addf %134, %143 : vector<8x32xf32>
    %c12_147 = arith.constant 12 : index
    %c0_148 = arith.constant 0 : index
    %c0_149 = arith.constant 0 : index
    %145 = vector.load %arg10[%c12_147, %c0_148, %c0_149] : memref<42x32x7xf32, #tpu.memory_space<vmem>>, vector<1x32x7xf32>
    %146 = vector.shape_cast %145 : vector<1x32x7xf32> to vector<32x7xf32>
    %cst_150 = arith.constant dense<0.000000e+00> : vector<8x7xf32>
    %147 = tpu.matmul %140, %146, %cst_150 {dimension_numbers = #tpu.dot_dimension_numbers<[1], [0], [0], [1], [0, 0, 1, 1], [], []>} : vector<8x32xf32>, vector<32x7xf32>, vector<8x7xf32> -> vector<8x7xf32>
    %148 = arith.addf %138, %147 : vector<8x7xf32>
    %c104 = arith.constant 104 : index
    %c0_151 = arith.constant 0 : index
    %149 = vector.load %arg14[%c104, %c0_151] : memref<336x3xf32, #tpu.memory_space<vmem>>, vector<8x3xf32>
    %c104_152 = arith.constant 104 : index
    %c0_153 = arith.constant 0 : index
    %150 = vector.load %arg15[%c104_152, %c0_153] : memref<336x32xf32, #tpu.memory_space<vmem>>, vector<8x32xf32>
    %c13 = arith.constant 13 : index
    %c0_154 = arith.constant 0 : index
    %c0_155 = arith.constant 0 : index
    %151 = vector.load %arg4[%c13, %c0_154, %c0_155] : memref<42x3x32xf32, #tpu.memory_space<vmem>>, vector<1x3x32xf32>
    %152 = vector.shape_cast %151 : vector<1x3x32xf32> to vector<3x32xf32>
    %cst_156 = arith.constant dense<0.000000e+00> : vector<8x32xf32>
    %153 = tpu.matmul %149, %152, %cst_156 {dimension_numbers = #tpu.dot_dimension_numbers<[1], [0], [0], [1], [0, 0, 1, 1], [], []>} : vector<8x3xf32>, vector<3x32xf32>, vector<8x32xf32> -> vector<8x32xf32>
    %154 = arith.addf %144, %153 : vector<8x32xf32>
    %c13_157 = arith.constant 13 : index
    %c0_158 = arith.constant 0 : index
    %c0_159 = arith.constant 0 : index
    %155 = vector.load %arg10[%c13_157, %c0_158, %c0_159] : memref<42x32x7xf32, #tpu.memory_space<vmem>>, vector<1x32x7xf32>
    %156 = vector.shape_cast %155 : vector<1x32x7xf32> to vector<32x7xf32>
    %cst_160 = arith.constant dense<0.000000e+00> : vector<8x7xf32>
    %157 = tpu.matmul %150, %156, %cst_160 {dimension_numbers = #tpu.dot_dimension_numbers<[1], [0], [0], [1], [0, 0, 1, 1], [], []>} : vector<8x32xf32>, vector<32x7xf32>, vector<8x7xf32> -> vector<8x7xf32>
    %158 = arith.addf %148, %157 : vector<8x7xf32>
    %c112 = arith.constant 112 : index
    %c0_161 = arith.constant 0 : index
    %159 = vector.load %arg14[%c112, %c0_161] : memref<336x3xf32, #tpu.memory_space<vmem>>, vector<8x3xf32>
    %c112_162 = arith.constant 112 : index
    %c0_163 = arith.constant 0 : index
    %160 = vector.load %arg15[%c112_162, %c0_163] : memref<336x32xf32, #tpu.memory_space<vmem>>, vector<8x32xf32>
    %c14 = arith.constant 14 : index
    %c0_164 = arith.constant 0 : index
    %c0_165 = arith.constant 0 : index
    %161 = vector.load %arg4[%c14, %c0_164, %c0_165] : memref<42x3x32xf32, #tpu.memory_space<vmem>>, vector<1x3x32xf32>
    %162 = vector.shape_cast %161 : vector<1x3x32xf32> to vector<3x32xf32>
    %cst_166 = arith.constant dense<0.000000e+00> : vector<8x32xf32>
    %163 = tpu.matmul %159, %162, %cst_166 {dimension_numbers = #tpu.dot_dimension_numbers<[1], [0], [0], [1], [0, 0, 1, 1], [], []>} : vector<8x3xf32>, vector<3x32xf32>, vector<8x32xf32> -> vector<8x32xf32>
    %164 = arith.addf %154, %163 : vector<8x32xf32>
    %c14_167 = arith.constant 14 : index
    %c0_168 = arith.constant 0 : index
    %c0_169 = arith.constant 0 : index
    %165 = vector.load %arg10[%c14_167, %c0_168, %c0_169] : memref<42x32x7xf32, #tpu.memory_space<vmem>>, vector<1x32x7xf32>
    %166 = vector.shape_cast %165 : vector<1x32x7xf32> to vector<32x7xf32>
    %cst_170 = arith.constant dense<0.000000e+00> : vector<8x7xf32>
    %167 = tpu.matmul %160, %166, %cst_170 {dimension_numbers = #tpu.dot_dimension_numbers<[1], [0], [0], [1], [0, 0, 1, 1], [], []>} : vector<8x32xf32>, vector<32x7xf32>, vector<8x7xf32> -> vector<8x7xf32>
    %168 = arith.addf %158, %167 : vector<8x7xf32>
    %c120 = arith.constant 120 : index
    %c0_171 = arith.constant 0 : index
    %169 = vector.load %arg14[%c120, %c0_171] : memref<336x3xf32, #tpu.memory_space<vmem>>, vector<8x3xf32>
    %c120_172 = arith.constant 120 : index
    %c0_173 = arith.constant 0 : index
    %170 = vector.load %arg15[%c120_172, %c0_173] : memref<336x32xf32, #tpu.memory_space<vmem>>, vector<8x32xf32>
    %c15 = arith.constant 15 : index
    %c0_174 = arith.constant 0 : index
    %c0_175 = arith.constant 0 : index
    %171 = vector.load %arg4[%c15, %c0_174, %c0_175] : memref<42x3x32xf32, #tpu.memory_space<vmem>>, vector<1x3x32xf32>
    %172 = vector.shape_cast %171 : vector<1x3x32xf32> to vector<3x32xf32>
    %cst_176 = arith.constant dense<0.000000e+00> : vector<8x32xf32>
    %173 = tpu.matmul %169, %172, %cst_176 {dimension_numbers = #tpu.dot_dimension_numbers<[1], [0], [0], [1], [0, 0, 1, 1], [], []>} : vector<8x3xf32>, vector<3x32xf32>, vector<8x32xf32> -> vector<8x32xf32>
    %174 = arith.addf %164, %173 : vector<8x32xf32>
    %c15_177 = arith.constant 15 : index
    %c0_178 = arith.constant 0 : index
    %c0_179 = arith.constant 0 : index
    %175 = vector.load %arg10[%c15_177, %c0_178, %c0_179] : memref<42x32x7xf32, #tpu.memory_space<vmem>>, vector<1x32x7xf32>
    %176 = vector.shape_cast %175 : vector<1x32x7xf32> to vector<32x7xf32>
    %cst_180 = arith.constant dense<0.000000e+00> : vector<8x7xf32>
    %177 = tpu.matmul %170, %176, %cst_180 {dimension_numbers = #tpu.dot_dimension_numbers<[1], [0], [0], [1], [0, 0, 1, 1], [], []>} : vector<8x32xf32>, vector<32x7xf32>, vector<8x7xf32> -> vector<8x7xf32>
    %178 = arith.addf %168, %177 : vector<8x7xf32>
    %c128 = arith.constant 128 : index
    %c0_181 = arith.constant 0 : index
    %179 = vector.load %arg14[%c128, %c0_181] : memref<336x3xf32, #tpu.memory_space<vmem>>, vector<8x3xf32>
    %c128_182 = arith.constant 128 : index
    %c0_183 = arith.constant 0 : index
    %180 = vector.load %arg15[%c128_182, %c0_183] : memref<336x32xf32, #tpu.memory_space<vmem>>, vector<8x32xf32>
    %c16_184 = arith.constant 16 : index
    %c0_185 = arith.constant 0 : index
    %c0_186 = arith.constant 0 : index
    %181 = vector.load %arg4[%c16_184, %c0_185, %c0_186] : memref<42x3x32xf32, #tpu.memory_space<vmem>>, vector<1x3x32xf32>
    %182 = vector.shape_cast %181 : vector<1x3x32xf32> to vector<3x32xf32>
    %cst_187 = arith.constant dense<0.000000e+00> : vector<8x32xf32>
    %183 = tpu.matmul %179, %182, %cst_187 {dimension_numbers = #tpu.dot_dimension_numbers<[1], [0], [0], [1], [0, 0, 1, 1], [], []>} : vector<8x3xf32>, vector<3x32xf32>, vector<8x32xf32> -> vector<8x32xf32>
    %184 = arith.addf %174, %183 : vector<8x32xf32>
    %c16_188 = arith.constant 16 : index
    %c0_189 = arith.constant 0 : index
    %c0_190 = arith.constant 0 : index
    %185 = vector.load %arg10[%c16_188, %c0_189, %c0_190] : memref<42x32x7xf32, #tpu.memory_space<vmem>>, vector<1x32x7xf32>
    %186 = vector.shape_cast %185 : vector<1x32x7xf32> to vector<32x7xf32>
    %cst_191 = arith.constant dense<0.000000e+00> : vector<8x7xf32>
    %187 = tpu.matmul %180, %186, %cst_191 {dimension_numbers = #tpu.dot_dimension_numbers<[1], [0], [0], [1], [0, 0, 1, 1], [], []>} : vector<8x32xf32>, vector<32x7xf32>, vector<8x7xf32> -> vector<8x7xf32>
    %188 = arith.addf %178, %187 : vector<8x7xf32>
    %c136 = arith.constant 136 : index
    %c0_192 = arith.constant 0 : index
    %189 = vector.load %arg14[%c136, %c0_192] : memref<336x3xf32, #tpu.memory_space<vmem>>, vector<8x3xf32>
    %c136_193 = arith.constant 136 : index
    %c0_194 = arith.constant 0 : index
    %190 = vector.load %arg15[%c136_193, %c0_194] : memref<336x32xf32, #tpu.memory_space<vmem>>, vector<8x32xf32>
    %c17 = arith.constant 17 : index
    %c0_195 = arith.constant 0 : index
    %c0_196 = arith.constant 0 : index
    %191 = vector.load %arg4[%c17, %c0_195, %c0_196] : memref<42x3x32xf32, #tpu.memory_space<vmem>>, vector<1x3x32xf32>
    %192 = vector.shape_cast %191 : vector<1x3x32xf32> to vector<3x32xf32>
    %cst_197 = arith.constant dense<0.000000e+00> : vector<8x32xf32>
    %193 = tpu.matmul %189, %192, %cst_197 {dimension_numbers = #tpu.dot_dimension_numbers<[1], [0], [0], [1], [0, 0, 1, 1], [], []>} : vector<8x3xf32>, vector<3x32xf32>, vector<8x32xf32> -> vector<8x32xf32>
    %194 = arith.addf %184, %193 : vector<8x32xf32>
    %c17_198 = arith.constant 17 : index
    %c0_199 = arith.constant 0 : index
    %c0_200 = arith.constant 0 : index
    %195 = vector.load %arg10[%c17_198, %c0_199, %c0_200] : memref<42x32x7xf32, #tpu.memory_space<vmem>>, vector<1x32x7xf32>
    %196 = vector.shape_cast %195 : vector<1x32x7xf32> to vector<32x7xf32>
    %cst_201 = arith.constant dense<0.000000e+00> : vector<8x7xf32>
    %197 = tpu.matmul %190, %196, %cst_201 {dimension_numbers = #tpu.dot_dimension_numbers<[1], [0], [0], [1], [0, 0, 1, 1], [], []>} : vector<8x32xf32>, vector<32x7xf32>, vector<8x7xf32> -> vector<8x7xf32>
    %198 = arith.addf %188, %197 : vector<8x7xf32>
    %c144 = arith.constant 144 : index
    %c0_202 = arith.constant 0 : index
    %199 = vector.load %arg14[%c144, %c0_202] : memref<336x3xf32, #tpu.memory_space<vmem>>, vector<8x3xf32>
    %c144_203 = arith.constant 144 : index
    %c0_204 = arith.constant 0 : index
    %200 = vector.load %arg15[%c144_203, %c0_204] : memref<336x32xf32, #tpu.memory_space<vmem>>, vector<8x32xf32>
    %c18 = arith.constant 18 : index
    %c0_205 = arith.constant 0 : index
    %c0_206 = arith.constant 0 : index
    %201 = vector.load %arg4[%c18, %c0_205, %c0_206] : memref<42x3x32xf32, #tpu.memory_space<vmem>>, vector<1x3x32xf32>
    %202 = vector.shape_cast %201 : vector<1x3x32xf32> to vector<3x32xf32>
    %cst_207 = arith.constant dense<0.000000e+00> : vector<8x32xf32>
    %203 = tpu.matmul %199, %202, %cst_207 {dimension_numbers = #tpu.dot_dimension_numbers<[1], [0], [0], [1], [0, 0, 1, 1], [], []>} : vector<8x3xf32>, vector<3x32xf32>, vector<8x32xf32> -> vector<8x32xf32>
    %204 = arith.addf %194, %203 : vector<8x32xf32>
    %c18_208 = arith.constant 18 : index
    %c0_209 = arith.constant 0 : index
    %c0_210 = arith.constant 0 : index
    %205 = vector.load %arg10[%c18_208, %c0_209, %c0_210] : memref<42x32x7xf32, #tpu.memory_space<vmem>>, vector<1x32x7xf32>
    %206 = vector.shape_cast %205 : vector<1x32x7xf32> to vector<32x7xf32>
    %cst_211 = arith.constant dense<0.000000e+00> : vector<8x7xf32>
    %207 = tpu.matmul %200, %206, %cst_211 {dimension_numbers = #tpu.dot_dimension_numbers<[1], [0], [0], [1], [0, 0, 1, 1], [], []>} : vector<8x32xf32>, vector<32x7xf32>, vector<8x7xf32> -> vector<8x7xf32>
    %208 = arith.addf %198, %207 : vector<8x7xf32>
    %c152 = arith.constant 152 : index
    %c0_212 = arith.constant 0 : index
    %209 = vector.load %arg14[%c152, %c0_212] : memref<336x3xf32, #tpu.memory_space<vmem>>, vector<8x3xf32>
    %c152_213 = arith.constant 152 : index
    %c0_214 = arith.constant 0 : index
    %210 = vector.load %arg15[%c152_213, %c0_214] : memref<336x32xf32, #tpu.memory_space<vmem>>, vector<8x32xf32>
    %c19 = arith.constant 19 : index
    %c0_215 = arith.constant 0 : index
    %c0_216 = arith.constant 0 : index
    %211 = vector.load %arg4[%c19, %c0_215, %c0_216] : memref<42x3x32xf32, #tpu.memory_space<vmem>>, vector<1x3x32xf32>
    %212 = vector.shape_cast %211 : vector<1x3x32xf32> to vector<3x32xf32>
    %cst_217 = arith.constant dense<0.000000e+00> : vector<8x32xf32>
    %213 = tpu.matmul %209, %212, %cst_217 {dimension_numbers = #tpu.dot_dimension_numbers<[1], [0], [0], [1], [0, 0, 1, 1], [], []>} : vector<8x3xf32>, vector<3x32xf32>, vector<8x32xf32> -> vector<8x32xf32>
    %214 = arith.addf %204, %213 : vector<8x32xf32>
    %c19_218 = arith.constant 19 : index
    %c0_219 = arith.constant 0 : index
    %c0_220 = arith.constant 0 : index
    %215 = vector.load %arg10[%c19_218, %c0_219, %c0_220] : memref<42x32x7xf32, #tpu.memory_space<vmem>>, vector<1x32x7xf32>
    %216 = vector.shape_cast %215 : vector<1x32x7xf32> to vector<32x7xf32>
    %cst_221 = arith.constant dense<0.000000e+00> : vector<8x7xf32>
    %217 = tpu.matmul %210, %216, %cst_221 {dimension_numbers = #tpu.dot_dimension_numbers<[1], [0], [0], [1], [0, 0, 1, 1], [], []>} : vector<8x32xf32>, vector<32x7xf32>, vector<8x7xf32> -> vector<8x7xf32>
    %218 = arith.addf %208, %217 : vector<8x7xf32>
    %c160 = arith.constant 160 : index
    %c0_222 = arith.constant 0 : index
    %219 = vector.load %arg14[%c160, %c0_222] : memref<336x3xf32, #tpu.memory_space<vmem>>, vector<8x3xf32>
    %c160_223 = arith.constant 160 : index
    %c0_224 = arith.constant 0 : index
    %220 = vector.load %arg15[%c160_223, %c0_224] : memref<336x32xf32, #tpu.memory_space<vmem>>, vector<8x32xf32>
    %c20 = arith.constant 20 : index
    %c0_225 = arith.constant 0 : index
    %c0_226 = arith.constant 0 : index
    %221 = vector.load %arg4[%c20, %c0_225, %c0_226] : memref<42x3x32xf32, #tpu.memory_space<vmem>>, vector<1x3x32xf32>
    %222 = vector.shape_cast %221 : vector<1x3x32xf32> to vector<3x32xf32>
    %cst_227 = arith.constant dense<0.000000e+00> : vector<8x32xf32>
    %223 = tpu.matmul %219, %222, %cst_227 {dimension_numbers = #tpu.dot_dimension_numbers<[1], [0], [0], [1], [0, 0, 1, 1], [], []>} : vector<8x3xf32>, vector<3x32xf32>, vector<8x32xf32> -> vector<8x32xf32>
    %224 = arith.addf %214, %223 : vector<8x32xf32>
    %c20_228 = arith.constant 20 : index
    %c0_229 = arith.constant 0 : index
    %c0_230 = arith.constant 0 : index
    %225 = vector.load %arg10[%c20_228, %c0_229, %c0_230] : memref<42x32x7xf32, #tpu.memory_space<vmem>>, vector<1x32x7xf32>
    %226 = vector.shape_cast %225 : vector<1x32x7xf32> to vector<32x7xf32>
    %cst_231 = arith.constant dense<0.000000e+00> : vector<8x7xf32>
    %227 = tpu.matmul %220, %226, %cst_231 {dimension_numbers = #tpu.dot_dimension_numbers<[1], [0], [0], [1], [0, 0, 1, 1], [], []>} : vector<8x32xf32>, vector<32x7xf32>, vector<8x7xf32> -> vector<8x7xf32>
    %228 = arith.addf %218, %227 : vector<8x7xf32>
    %c168 = arith.constant 168 : index
    %c0_232 = arith.constant 0 : index
    %229 = vector.load %arg14[%c168, %c0_232] : memref<336x3xf32, #tpu.memory_space<vmem>>, vector<8x3xf32>
    %c168_233 = arith.constant 168 : index
    %c0_234 = arith.constant 0 : index
    %230 = vector.load %arg15[%c168_233, %c0_234] : memref<336x32xf32, #tpu.memory_space<vmem>>, vector<8x32xf32>
    %c21 = arith.constant 21 : index
    %c0_235 = arith.constant 0 : index
    %c0_236 = arith.constant 0 : index
    %231 = vector.load %arg4[%c21, %c0_235, %c0_236] : memref<42x3x32xf32, #tpu.memory_space<vmem>>, vector<1x3x32xf32>
    %232 = vector.shape_cast %231 : vector<1x3x32xf32> to vector<3x32xf32>
    %cst_237 = arith.constant dense<0.000000e+00> : vector<8x32xf32>
    %233 = tpu.matmul %229, %232, %cst_237 {dimension_numbers = #tpu.dot_dimension_numbers<[1], [0], [0], [1], [0, 0, 1, 1], [], []>} : vector<8x3xf32>, vector<3x32xf32>, vector<8x32xf32> -> vector<8x32xf32>
    %234 = arith.addf %224, %233 : vector<8x32xf32>
    %c21_238 = arith.constant 21 : index
    %c0_239 = arith.constant 0 : index
    %c0_240 = arith.constant 0 : index
    %235 = vector.load %arg10[%c21_238, %c0_239, %c0_240] : memref<42x32x7xf32, #tpu.memory_space<vmem>>, vector<1x32x7xf32>
    %236 = vector.shape_cast %235 : vector<1x32x7xf32> to vector<32x7xf32>
    %cst_241 = arith.constant dense<0.000000e+00> : vector<8x7xf32>
    %237 = tpu.matmul %230, %236, %cst_241 {dimension_numbers = #tpu.dot_dimension_numbers<[1], [0], [0], [1], [0, 0, 1, 1], [], []>} : vector<8x32xf32>, vector<32x7xf32>, vector<8x7xf32> -> vector<8x7xf32>
    %238 = arith.addf %228, %237 : vector<8x7xf32>
    %c176 = arith.constant 176 : index
    %c0_242 = arith.constant 0 : index
    %239 = vector.load %arg14[%c176, %c0_242] : memref<336x3xf32, #tpu.memory_space<vmem>>, vector<8x3xf32>
    %c176_243 = arith.constant 176 : index
    %c0_244 = arith.constant 0 : index
    %240 = vector.load %arg15[%c176_243, %c0_244] : memref<336x32xf32, #tpu.memory_space<vmem>>, vector<8x32xf32>
    %c22 = arith.constant 22 : index
    %c0_245 = arith.constant 0 : index
    %c0_246 = arith.constant 0 : index
    %241 = vector.load %arg4[%c22, %c0_245, %c0_246] : memref<42x3x32xf32, #tpu.memory_space<vmem>>, vector<1x3x32xf32>
    %242 = vector.shape_cast %241 : vector<1x3x32xf32> to vector<3x32xf32>
    %cst_247 = arith.constant dense<0.000000e+00> : vector<8x32xf32>
    %243 = tpu.matmul %239, %242, %cst_247 {dimension_numbers = #tpu.dot_dimension_numbers<[1], [0], [0], [1], [0, 0, 1, 1], [], []>} : vector<8x3xf32>, vector<3x32xf32>, vector<8x32xf32> -> vector<8x32xf32>
    %244 = arith.addf %234, %243 : vector<8x32xf32>
    %c22_248 = arith.constant 22 : index
    %c0_249 = arith.constant 0 : index
    %c0_250 = arith.constant 0 : index
    %245 = vector.load %arg10[%c22_248, %c0_249, %c0_250] : memref<42x32x7xf32, #tpu.memory_space<vmem>>, vector<1x32x7xf32>
    %246 = vector.shape_cast %245 : vector<1x32x7xf32> to vector<32x7xf32>
    %cst_251 = arith.constant dense<0.000000e+00> : vector<8x7xf32>
    %247 = tpu.matmul %240, %246, %cst_251 {dimension_numbers = #tpu.dot_dimension_numbers<[1], [0], [0], [1], [0, 0, 1, 1], [], []>} : vector<8x32xf32>, vector<32x7xf32>, vector<8x7xf32> -> vector<8x7xf32>
    %248 = arith.addf %238, %247 : vector<8x7xf32>
    %c184 = arith.constant 184 : index
    %c0_252 = arith.constant 0 : index
    %249 = vector.load %arg14[%c184, %c0_252] : memref<336x3xf32, #tpu.memory_space<vmem>>, vector<8x3xf32>
    %c184_253 = arith.constant 184 : index
    %c0_254 = arith.constant 0 : index
    %250 = vector.load %arg15[%c184_253, %c0_254] : memref<336x32xf32, #tpu.memory_space<vmem>>, vector<8x32xf32>
    %c23 = arith.constant 23 : index
    %c0_255 = arith.constant 0 : index
    %c0_256 = arith.constant 0 : index
    %251 = vector.load %arg4[%c23, %c0_255, %c0_256] : memref<42x3x32xf32, #tpu.memory_space<vmem>>, vector<1x3x32xf32>
    %252 = vector.shape_cast %251 : vector<1x3x32xf32> to vector<3x32xf32>
    %cst_257 = arith.constant dense<0.000000e+00> : vector<8x32xf32>
    %253 = tpu.matmul %249, %252, %cst_257 {dimension_numbers = #tpu.dot_dimension_numbers<[1], [0], [0], [1], [0, 0, 1, 1], [], []>} : vector<8x3xf32>, vector<3x32xf32>, vector<8x32xf32> -> vector<8x32xf32>
    %254 = arith.addf %244, %253 : vector<8x32xf32>
    %c23_258 = arith.constant 23 : index
    %c0_259 = arith.constant 0 : index
    %c0_260 = arith.constant 0 : index
    %255 = vector.load %arg10[%c23_258, %c0_259, %c0_260] : memref<42x32x7xf32, #tpu.memory_space<vmem>>, vector<1x32x7xf32>
    %256 = vector.shape_cast %255 : vector<1x32x7xf32> to vector<32x7xf32>
    %cst_261 = arith.constant dense<0.000000e+00> : vector<8x7xf32>
    %257 = tpu.matmul %250, %256, %cst_261 {dimension_numbers = #tpu.dot_dimension_numbers<[1], [0], [0], [1], [0, 0, 1, 1], [], []>} : vector<8x32xf32>, vector<32x7xf32>, vector<8x7xf32> -> vector<8x7xf32>
    %258 = arith.addf %248, %257 : vector<8x7xf32>
    %c192 = arith.constant 192 : index
    %c0_262 = arith.constant 0 : index
    %259 = vector.load %arg14[%c192, %c0_262] : memref<336x3xf32, #tpu.memory_space<vmem>>, vector<8x3xf32>
    %c192_263 = arith.constant 192 : index
    %c0_264 = arith.constant 0 : index
    %260 = vector.load %arg15[%c192_263, %c0_264] : memref<336x32xf32, #tpu.memory_space<vmem>>, vector<8x32xf32>
    %c24_265 = arith.constant 24 : index
    %c0_266 = arith.constant 0 : index
    %c0_267 = arith.constant 0 : index
    %261 = vector.load %arg4[%c24_265, %c0_266, %c0_267] : memref<42x3x32xf32, #tpu.memory_space<vmem>>, vector<1x3x32xf32>
    %262 = vector.shape_cast %261 : vector<1x3x32xf32> to vector<3x32xf32>
    %cst_268 = arith.constant dense<0.000000e+00> : vector<8x32xf32>
    %263 = tpu.matmul %259, %262, %cst_268 {dimension_numbers = #tpu.dot_dimension_numbers<[1], [0], [0], [1], [0, 0, 1, 1], [], []>} : vector<8x3xf32>, vector<3x32xf32>, vector<8x32xf32> -> vector<8x32xf32>
    %264 = arith.addf %254, %263 : vector<8x32xf32>
    %c24_269 = arith.constant 24 : index
    %c0_270 = arith.constant 0 : index
    %c0_271 = arith.constant 0 : index
    %265 = vector.load %arg10[%c24_269, %c0_270, %c0_271] : memref<42x32x7xf32, #tpu.memory_space<vmem>>, vector<1x32x7xf32>
    %266 = vector.shape_cast %265 : vector<1x32x7xf32> to vector<32x7xf32>
    %cst_272 = arith.constant dense<0.000000e+00> : vector<8x7xf32>
    %267 = tpu.matmul %260, %266, %cst_272 {dimension_numbers = #tpu.dot_dimension_numbers<[1], [0], [0], [1], [0, 0, 1, 1], [], []>} : vector<8x32xf32>, vector<32x7xf32>, vector<8x7xf32> -> vector<8x7xf32>
    %268 = arith.addf %258, %267 : vector<8x7xf32>
    %c200 = arith.constant 200 : index
    %c0_273 = arith.constant 0 : index
    %269 = vector.load %arg14[%c200, %c0_273] : memref<336x3xf32, #tpu.memory_space<vmem>>, vector<8x3xf32>
    %c200_274 = arith.constant 200 : index
    %c0_275 = arith.constant 0 : index
    %270 = vector.load %arg15[%c200_274, %c0_275] : memref<336x32xf32, #tpu.memory_space<vmem>>, vector<8x32xf32>
    %c25 = arith.constant 25 : index
    %c0_276 = arith.constant 0 : index
    %c0_277 = arith.constant 0 : index
    %271 = vector.load %arg4[%c25, %c0_276, %c0_277] : memref<42x3x32xf32, #tpu.memory_space<vmem>>, vector<1x3x32xf32>
    %272 = vector.shape_cast %271 : vector<1x3x32xf32> to vector<3x32xf32>
    %cst_278 = arith.constant dense<0.000000e+00> : vector<8x32xf32>
    %273 = tpu.matmul %269, %272, %cst_278 {dimension_numbers = #tpu.dot_dimension_numbers<[1], [0], [0], [1], [0, 0, 1, 1], [], []>} : vector<8x3xf32>, vector<3x32xf32>, vector<8x32xf32> -> vector<8x32xf32>
    %274 = arith.addf %264, %273 : vector<8x32xf32>
    %c25_279 = arith.constant 25 : index
    %c0_280 = arith.constant 0 : index
    %c0_281 = arith.constant 0 : index
    %275 = vector.load %arg10[%c25_279, %c0_280, %c0_281] : memref<42x32x7xf32, #tpu.memory_space<vmem>>, vector<1x32x7xf32>
    %276 = vector.shape_cast %275 : vector<1x32x7xf32> to vector<32x7xf32>
    %cst_282 = arith.constant dense<0.000000e+00> : vector<8x7xf32>
    %277 = tpu.matmul %270, %276, %cst_282 {dimension_numbers = #tpu.dot_dimension_numbers<[1], [0], [0], [1], [0, 0, 1, 1], [], []>} : vector<8x32xf32>, vector<32x7xf32>, vector<8x7xf32> -> vector<8x7xf32>
    %278 = arith.addf %268, %277 : vector<8x7xf32>
    %c208 = arith.constant 208 : index
    %c0_283 = arith.constant 0 : index
    %279 = vector.load %arg14[%c208, %c0_283] : memref<336x3xf32, #tpu.memory_space<vmem>>, vector<8x3xf32>
    %c208_284 = arith.constant 208 : index
    %c0_285 = arith.constant 0 : index
    %280 = vector.load %arg15[%c208_284, %c0_285] : memref<336x32xf32, #tpu.memory_space<vmem>>, vector<8x32xf32>
    %c26 = arith.constant 26 : index
    %c0_286 = arith.constant 0 : index
    %c0_287 = arith.constant 0 : index
    %281 = vector.load %arg4[%c26, %c0_286, %c0_287] : memref<42x3x32xf32, #tpu.memory_space<vmem>>, vector<1x3x32xf32>
    %282 = vector.shape_cast %281 : vector<1x3x32xf32> to vector<3x32xf32>
    %cst_288 = arith.constant dense<0.000000e+00> : vector<8x32xf32>
    %283 = tpu.matmul %279, %282, %cst_288 {dimension_numbers = #tpu.dot_dimension_numbers<[1], [0], [0], [1], [0, 0, 1, 1], [], []>} : vector<8x3xf32>, vector<3x32xf32>, vector<8x32xf32> -> vector<8x32xf32>
    %284 = arith.addf %274, %283 : vector<8x32xf32>
    %c26_289 = arith.constant 26 : index
    %c0_290 = arith.constant 0 : index
    %c0_291 = arith.constant 0 : index
    %285 = vector.load %arg10[%c26_289, %c0_290, %c0_291] : memref<42x32x7xf32, #tpu.memory_space<vmem>>, vector<1x32x7xf32>
    %286 = vector.shape_cast %285 : vector<1x32x7xf32> to vector<32x7xf32>
    %cst_292 = arith.constant dense<0.000000e+00> : vector<8x7xf32>
    %287 = tpu.matmul %280, %286, %cst_292 {dimension_numbers = #tpu.dot_dimension_numbers<[1], [0], [0], [1], [0, 0, 1, 1], [], []>} : vector<8x32xf32>, vector<32x7xf32>, vector<8x7xf32> -> vector<8x7xf32>
    %288 = arith.addf %278, %287 : vector<8x7xf32>
    %c216 = arith.constant 216 : index
    %c0_293 = arith.constant 0 : index
    %289 = vector.load %arg14[%c216, %c0_293] : memref<336x3xf32, #tpu.memory_space<vmem>>, vector<8x3xf32>
    %c216_294 = arith.constant 216 : index
    %c0_295 = arith.constant 0 : index
    %290 = vector.load %arg15[%c216_294, %c0_295] : memref<336x32xf32, #tpu.memory_space<vmem>>, vector<8x32xf32>
    %c27 = arith.constant 27 : index
    %c0_296 = arith.constant 0 : index
    %c0_297 = arith.constant 0 : index
    %291 = vector.load %arg4[%c27, %c0_296, %c0_297] : memref<42x3x32xf32, #tpu.memory_space<vmem>>, vector<1x3x32xf32>
    %292 = vector.shape_cast %291 : vector<1x3x32xf32> to vector<3x32xf32>
    %cst_298 = arith.constant dense<0.000000e+00> : vector<8x32xf32>
    %293 = tpu.matmul %289, %292, %cst_298 {dimension_numbers = #tpu.dot_dimension_numbers<[1], [0], [0], [1], [0, 0, 1, 1], [], []>} : vector<8x3xf32>, vector<3x32xf32>, vector<8x32xf32> -> vector<8x32xf32>
    %294 = arith.addf %284, %293 : vector<8x32xf32>
    %c27_299 = arith.constant 27 : index
    %c0_300 = arith.constant 0 : index
    %c0_301 = arith.constant 0 : index
    %295 = vector.load %arg10[%c27_299, %c0_300, %c0_301] : memref<42x32x7xf32, #tpu.memory_space<vmem>>, vector<1x32x7xf32>
    %296 = vector.shape_cast %295 : vector<1x32x7xf32> to vector<32x7xf32>
    %cst_302 = arith.constant dense<0.000000e+00> : vector<8x7xf32>
    %297 = tpu.matmul %290, %296, %cst_302 {dimension_numbers = #tpu.dot_dimension_numbers<[1], [0], [0], [1], [0, 0, 1, 1], [], []>} : vector<8x32xf32>, vector<32x7xf32>, vector<8x7xf32> -> vector<8x7xf32>
    %298 = arith.addf %288, %297 : vector<8x7xf32>
    %c224 = arith.constant 224 : index
    %c0_303 = arith.constant 0 : index
    %299 = vector.load %arg14[%c224, %c0_303] : memref<336x3xf32, #tpu.memory_space<vmem>>, vector<8x3xf32>
    %c224_304 = arith.constant 224 : index
    %c0_305 = arith.constant 0 : index
    %300 = vector.load %arg15[%c224_304, %c0_305] : memref<336x32xf32, #tpu.memory_space<vmem>>, vector<8x32xf32>
    %c28 = arith.constant 28 : index
    %c0_306 = arith.constant 0 : index
    %c0_307 = arith.constant 0 : index
    %301 = vector.load %arg4[%c28, %c0_306, %c0_307] : memref<42x3x32xf32, #tpu.memory_space<vmem>>, vector<1x3x32xf32>
    %302 = vector.shape_cast %301 : vector<1x3x32xf32> to vector<3x32xf32>
    %cst_308 = arith.constant dense<0.000000e+00> : vector<8x32xf32>
    %303 = tpu.matmul %299, %302, %cst_308 {dimension_numbers = #tpu.dot_dimension_numbers<[1], [0], [0], [1], [0, 0, 1, 1], [], []>} : vector<8x3xf32>, vector<3x32xf32>, vector<8x32xf32> -> vector<8x32xf32>
    %304 = arith.addf %294, %303 : vector<8x32xf32>
    %c28_309 = arith.constant 28 : index
    %c0_310 = arith.constant 0 : index
    %c0_311 = arith.constant 0 : index
    %305 = vector.load %arg10[%c28_309, %c0_310, %c0_311] : memref<42x32x7xf32, #tpu.memory_space<vmem>>, vector<1x32x7xf32>
    %306 = vector.shape_cast %305 : vector<1x32x7xf32> to vector<32x7xf32>
    %cst_312 = arith.constant dense<0.000000e+00> : vector<8x7xf32>
    %307 = tpu.matmul %300, %306, %cst_312 {dimension_numbers = #tpu.dot_dimension_numbers<[1], [0], [0], [1], [0, 0, 1, 1], [], []>} : vector<8x32xf32>, vector<32x7xf32>, vector<8x7xf32> -> vector<8x7xf32>
    %308 = arith.addf %298, %307 : vector<8x7xf32>
    %c232 = arith.constant 232 : index
    %c0_313 = arith.constant 0 : index
    %309 = vector.load %arg14[%c232, %c0_313] : memref<336x3xf32, #tpu.memory_space<vmem>>, vector<8x3xf32>
    %c232_314 = arith.constant 232 : index
    %c0_315 = arith.constant 0 : index
    %310 = vector.load %arg15[%c232_314, %c0_315] : memref<336x32xf32, #tpu.memory_space<vmem>>, vector<8x32xf32>
    %c29 = arith.constant 29 : index
    %c0_316 = arith.constant 0 : index
    %c0_317 = arith.constant 0 : index
    %311 = vector.load %arg4[%c29, %c0_316, %c0_317] : memref<42x3x32xf32, #tpu.memory_space<vmem>>, vector<1x3x32xf32>
    %312 = vector.shape_cast %311 : vector<1x3x32xf32> to vector<3x32xf32>
    %cst_318 = arith.constant dense<0.000000e+00> : vector<8x32xf32>
    %313 = tpu.matmul %309, %312, %cst_318 {dimension_numbers = #tpu.dot_dimension_numbers<[1], [0], [0], [1], [0, 0, 1, 1], [], []>} : vector<8x3xf32>, vector<3x32xf32>, vector<8x32xf32> -> vector<8x32xf32>
    %314 = arith.addf %304, %313 : vector<8x32xf32>
    %c29_319 = arith.constant 29 : index
    %c0_320 = arith.constant 0 : index
    %c0_321 = arith.constant 0 : index
    %315 = vector.load %arg10[%c29_319, %c0_320, %c0_321] : memref<42x32x7xf32, #tpu.memory_space<vmem>>, vector<1x32x7xf32>
    %316 = vector.shape_cast %315 : vector<1x32x7xf32> to vector<32x7xf32>
    %cst_322 = arith.constant dense<0.000000e+00> : vector<8x7xf32>
    %317 = tpu.matmul %310, %316, %cst_322 {dimension_numbers = #tpu.dot_dimension_numbers<[1], [0], [0], [1], [0, 0, 1, 1], [], []>} : vector<8x32xf32>, vector<32x7xf32>, vector<8x7xf32> -> vector<8x7xf32>
    %318 = arith.addf %308, %317 : vector<8x7xf32>
    %c240 = arith.constant 240 : index
    %c0_323 = arith.constant 0 : index
    %319 = vector.load %arg14[%c240, %c0_323] : memref<336x3xf32, #tpu.memory_space<vmem>>, vector<8x3xf32>
    %c240_324 = arith.constant 240 : index
    %c0_325 = arith.constant 0 : index
    %320 = vector.load %arg15[%c240_324, %c0_325] : memref<336x32xf32, #tpu.memory_space<vmem>>, vector<8x32xf32>
    %c30 = arith.constant 30 : index
    %c0_326 = arith.constant 0 : index
    %c0_327 = arith.constant 0 : index
    %321 = vector.load %arg4[%c30, %c0_326, %c0_327] : memref<42x3x32xf32, #tpu.memory_space<vmem>>, vector<1x3x32xf32>
    %322 = vector.shape_cast %321 : vector<1x3x32xf32> to vector<3x32xf32>
    %cst_328 = arith.constant dense<0.000000e+00> : vector<8x32xf32>
    %323 = tpu.matmul %319, %322, %cst_328 {dimension_numbers = #tpu.dot_dimension_numbers<[1], [0], [0], [1], [0, 0, 1, 1], [], []>} : vector<8x3xf32>, vector<3x32xf32>, vector<8x32xf32> -> vector<8x32xf32>
    %324 = arith.addf %314, %323 : vector<8x32xf32>
    %c30_329 = arith.constant 30 : index
    %c0_330 = arith.constant 0 : index
    %c0_331 = arith.constant 0 : index
    %325 = vector.load %arg10[%c30_329, %c0_330, %c0_331] : memref<42x32x7xf32, #tpu.memory_space<vmem>>, vector<1x32x7xf32>
    %326 = vector.shape_cast %325 : vector<1x32x7xf32> to vector<32x7xf32>
    %cst_332 = arith.constant dense<0.000000e+00> : vector<8x7xf32>
    %327 = tpu.matmul %320, %326, %cst_332 {dimension_numbers = #tpu.dot_dimension_numbers<[1], [0], [0], [1], [0, 0, 1, 1], [], []>} : vector<8x32xf32>, vector<32x7xf32>, vector<8x7xf32> -> vector<8x7xf32>
    %328 = arith.addf %318, %327 : vector<8x7xf32>
    %c248 = arith.constant 248 : index
    %c0_333 = arith.constant 0 : index
    %329 = vector.load %arg14[%c248, %c0_333] : memref<336x3xf32, #tpu.memory_space<vmem>>, vector<8x3xf32>
    %c248_334 = arith.constant 248 : index
    %c0_335 = arith.constant 0 : index
    %330 = vector.load %arg15[%c248_334, %c0_335] : memref<336x32xf32, #tpu.memory_space<vmem>>, vector<8x32xf32>
    %c31 = arith.constant 31 : index
    %c0_336 = arith.constant 0 : index
    %c0_337 = arith.constant 0 : index
    %331 = vector.load %arg4[%c31, %c0_336, %c0_337] : memref<42x3x32xf32, #tpu.memory_space<vmem>>, vector<1x3x32xf32>
    %332 = vector.shape_cast %331 : vector<1x3x32xf32> to vector<3x32xf32>
    %cst_338 = arith.constant dense<0.000000e+00> : vector<8x32xf32>
    %333 = tpu.matmul %329, %332, %cst_338 {dimension_numbers = #tpu.dot_dimension_numbers<[1], [0], [0], [1], [0, 0, 1, 1], [], []>} : vector<8x3xf32>, vector<3x32xf32>, vector<8x32xf32> -> vector<8x32xf32>
    %334 = arith.addf %324, %333 : vector<8x32xf32>
    %c31_339 = arith.constant 31 : index
    %c0_340 = arith.constant 0 : index
    %c0_341 = arith.constant 0 : index
    %335 = vector.load %arg10[%c31_339, %c0_340, %c0_341] : memref<42x32x7xf32, #tpu.memory_space<vmem>>, vector<1x32x7xf32>
    %336 = vector.shape_cast %335 : vector<1x32x7xf32> to vector<32x7xf32>
    %cst_342 = arith.constant dense<0.000000e+00> : vector<8x7xf32>
    %337 = tpu.matmul %330, %336, %cst_342 {dimension_numbers = #tpu.dot_dimension_numbers<[1], [0], [0], [1], [0, 0, 1, 1], [], []>} : vector<8x32xf32>, vector<32x7xf32>, vector<8x7xf32> -> vector<8x7xf32>
    %338 = arith.addf %328, %337 : vector<8x7xf32>
    %c256 = arith.constant 256 : index
    %c0_343 = arith.constant 0 : index
    %339 = vector.load %arg14[%c256, %c0_343] : memref<336x3xf32, #tpu.memory_space<vmem>>, vector<8x3xf32>
    %c256_344 = arith.constant 256 : index
    %c0_345 = arith.constant 0 : index
    %340 = vector.load %arg15[%c256_344, %c0_345] : memref<336x32xf32, #tpu.memory_space<vmem>>, vector<8x32xf32>
    %c32_346 = arith.constant 32 : index
    %c0_347 = arith.constant 0 : index
    %c0_348 = arith.constant 0 : index
    %341 = vector.load %arg4[%c32_346, %c0_347, %c0_348] : memref<42x3x32xf32, #tpu.memory_space<vmem>>, vector<1x3x32xf32>
    %342 = vector.shape_cast %341 : vector<1x3x32xf32> to vector<3x32xf32>
    %cst_349 = arith.constant dense<0.000000e+00> : vector<8x32xf32>
    %343 = tpu.matmul %339, %342, %cst_349 {dimension_numbers = #tpu.dot_dimension_numbers<[1], [0], [0], [1], [0, 0, 1, 1], [], []>} : vector<8x3xf32>, vector<3x32xf32>, vector<8x32xf32> -> vector<8x32xf32>
    %344 = arith.addf %334, %343 : vector<8x32xf32>
    %c32_350 = arith.constant 32 : index
    %c0_351 = arith.constant 0 : index
    %c0_352 = arith.constant 0 : index
    %345 = vector.load %arg10[%c32_350, %c0_351, %c0_352] : memref<42x32x7xf32, #tpu.memory_space<vmem>>, vector<1x32x7xf32>
    %346 = vector.shape_cast %345 : vector<1x32x7xf32> to vector<32x7xf32>
    %cst_353 = arith.constant dense<0.000000e+00> : vector<8x7xf32>
    %347 = tpu.matmul %340, %346, %cst_353 {dimension_numbers = #tpu.dot_dimension_numbers<[1], [0], [0], [1], [0, 0, 1, 1], [], []>} : vector<8x32xf32>, vector<32x7xf32>, vector<8x7xf32> -> vector<8x7xf32>
    %348 = arith.addf %338, %347 : vector<8x7xf32>
    %c264 = arith.constant 264 : index
    %c0_354 = arith.constant 0 : index
    %349 = vector.load %arg14[%c264, %c0_354] : memref<336x3xf32, #tpu.memory_space<vmem>>, vector<8x3xf32>
    %c264_355 = arith.constant 264 : index
    %c0_356 = arith.constant 0 : index
    %350 = vector.load %arg15[%c264_355, %c0_356] : memref<336x32xf32, #tpu.memory_space<vmem>>, vector<8x32xf32>
    %c33 = arith.constant 33 : index
    %c0_357 = arith.constant 0 : index
    %c0_358 = arith.constant 0 : index
    %351 = vector.load %arg4[%c33, %c0_357, %c0_358] : memref<42x3x32xf32, #tpu.memory_space<vmem>>, vector<1x3x32xf32>
    %352 = vector.shape_cast %351 : vector<1x3x32xf32> to vector<3x32xf32>
    %cst_359 = arith.constant dense<0.000000e+00> : vector<8x32xf32>
    %353 = tpu.matmul %349, %352, %cst_359 {dimension_numbers = #tpu.dot_dimension_numbers<[1], [0], [0], [1], [0, 0, 1, 1], [], []>} : vector<8x3xf32>, vector<3x32xf32>, vector<8x32xf32> -> vector<8x32xf32>
    %354 = arith.addf %344, %353 : vector<8x32xf32>
    %c33_360 = arith.constant 33 : index
    %c0_361 = arith.constant 0 : index
    %c0_362 = arith.constant 0 : index
    %355 = vector.load %arg10[%c33_360, %c0_361, %c0_362] : memref<42x32x7xf32, #tpu.memory_space<vmem>>, vector<1x32x7xf32>
    %356 = vector.shape_cast %355 : vector<1x32x7xf32> to vector<32x7xf32>
    %cst_363 = arith.constant dense<0.000000e+00> : vector<8x7xf32>
    %357 = tpu.matmul %350, %356, %cst_363 {dimension_numbers = #tpu.dot_dimension_numbers<[1], [0], [0], [1], [0, 0, 1, 1], [], []>} : vector<8x32xf32>, vector<32x7xf32>, vector<8x7xf32> -> vector<8x7xf32>
    %358 = arith.addf %348, %357 : vector<8x7xf32>
    %c272 = arith.constant 272 : index
    %c0_364 = arith.constant 0 : index
    %359 = vector.load %arg14[%c272, %c0_364] : memref<336x3xf32, #tpu.memory_space<vmem>>, vector<8x3xf32>
    %c272_365 = arith.constant 272 : index
    %c0_366 = arith.constant 0 : index
    %360 = vector.load %arg15[%c272_365, %c0_366] : memref<336x32xf32, #tpu.memory_space<vmem>>, vector<8x32xf32>
    %c34 = arith.constant 34 : index
    %c0_367 = arith.constant 0 : index
    %c0_368 = arith.constant 0 : index
    %361 = vector.load %arg4[%c34, %c0_367, %c0_368] : memref<42x3x32xf32, #tpu.memory_space<vmem>>, vector<1x3x32xf32>
    %362 = vector.shape_cast %361 : vector<1x3x32xf32> to vector<3x32xf32>
    %cst_369 = arith.constant dense<0.000000e+00> : vector<8x32xf32>
    %363 = tpu.matmul %359, %362, %cst_369 {dimension_numbers = #tpu.dot_dimension_numbers<[1], [0], [0], [1], [0, 0, 1, 1], [], []>} : vector<8x3xf32>, vector<3x32xf32>, vector<8x32xf32> -> vector<8x32xf32>
    %364 = arith.addf %354, %363 : vector<8x32xf32>
    %c34_370 = arith.constant 34 : index
    %c0_371 = arith.constant 0 : index
    %c0_372 = arith.constant 0 : index
    %365 = vector.load %arg10[%c34_370, %c0_371, %c0_372] : memref<42x32x7xf32, #tpu.memory_space<vmem>>, vector<1x32x7xf32>
    %366 = vector.shape_cast %365 : vector<1x32x7xf32> to vector<32x7xf32>
    %cst_373 = arith.constant dense<0.000000e+00> : vector<8x7xf32>
    %367 = tpu.matmul %360, %366, %cst_373 {dimension_numbers = #tpu.dot_dimension_numbers<[1], [0], [0], [1], [0, 0, 1, 1], [], []>} : vector<8x32xf32>, vector<32x7xf32>, vector<8x7xf32> -> vector<8x7xf32>
    %368 = arith.addf %358, %367 : vector<8x7xf32>
    %c280 = arith.constant 280 : index
    %c0_374 = arith.constant 0 : index
    %369 = vector.load %arg14[%c280, %c0_374] : memref<336x3xf32, #tpu.memory_space<vmem>>, vector<8x3xf32>
    %c280_375 = arith.constant 280 : index
    %c0_376 = arith.constant 0 : index
    %370 = vector.load %arg15[%c280_375, %c0_376] : memref<336x32xf32, #tpu.memory_space<vmem>>, vector<8x32xf32>
    %c35 = arith.constant 35 : index
    %c0_377 = arith.constant 0 : index
    %c0_378 = arith.constant 0 : index
    %371 = vector.load %arg4[%c35, %c0_377, %c0_378] : memref<42x3x32xf32, #tpu.memory_space<vmem>>, vector<1x3x32xf32>
    %372 = vector.shape_cast %371 : vector<1x3x32xf32> to vector<3x32xf32>
    %cst_379 = arith.constant dense<0.000000e+00> : vector<8x32xf32>
    %373 = tpu.matmul %369, %372, %cst_379 {dimension_numbers = #tpu.dot_dimension_numbers<[1], [0], [0], [1], [0, 0, 1, 1], [], []>} : vector<8x3xf32>, vector<3x32xf32>, vector<8x32xf32> -> vector<8x32xf32>
    %374 = arith.addf %364, %373 : vector<8x32xf32>
    %c35_380 = arith.constant 35 : index
    %c0_381 = arith.constant 0 : index
    %c0_382 = arith.constant 0 : index
    %375 = vector.load %arg10[%c35_380, %c0_381, %c0_382] : memref<42x32x7xf32, #tpu.memory_space<vmem>>, vector<1x32x7xf32>
    %376 = vector.shape_cast %375 : vector<1x32x7xf32> to vector<32x7xf32>
    %cst_383 = arith.constant dense<0.000000e+00> : vector<8x7xf32>
    %377 = tpu.matmul %370, %376, %cst_383 {dimension_numbers = #tpu.dot_dimension_numbers<[1], [0], [0], [1], [0, 0, 1, 1], [], []>} : vector<8x32xf32>, vector<32x7xf32>, vector<8x7xf32> -> vector<8x7xf32>
    %378 = arith.addf %368, %377 : vector<8x7xf32>
    %c288 = arith.constant 288 : index
    %c0_384 = arith.constant 0 : index
    %379 = vector.load %arg14[%c288, %c0_384] : memref<336x3xf32, #tpu.memory_space<vmem>>, vector<8x3xf32>
    %c288_385 = arith.constant 288 : index
    %c0_386 = arith.constant 0 : index
    %380 = vector.load %arg15[%c288_385, %c0_386] : memref<336x32xf32, #tpu.memory_space<vmem>>, vector<8x32xf32>
    %c36 = arith.constant 36 : index
    %c0_387 = arith.constant 0 : index
    %c0_388 = arith.constant 0 : index
    %381 = vector.load %arg4[%c36, %c0_387, %c0_388] : memref<42x3x32xf32, #tpu.memory_space<vmem>>, vector<1x3x32xf32>
    %382 = vector.shape_cast %381 : vector<1x3x32xf32> to vector<3x32xf32>
    %cst_389 = arith.constant dense<0.000000e+00> : vector<8x32xf32>
    %383 = tpu.matmul %379, %382, %cst_389 {dimension_numbers = #tpu.dot_dimension_numbers<[1], [0], [0], [1], [0, 0, 1, 1], [], []>} : vector<8x3xf32>, vector<3x32xf32>, vector<8x32xf32> -> vector<8x32xf32>
    %384 = arith.addf %374, %383 : vector<8x32xf32>
    %c36_390 = arith.constant 36 : index
    %c0_391 = arith.constant 0 : index
    %c0_392 = arith.constant 0 : index
    %385 = vector.load %arg10[%c36_390, %c0_391, %c0_392] : memref<42x32x7xf32, #tpu.memory_space<vmem>>, vector<1x32x7xf32>
    %386 = vector.shape_cast %385 : vector<1x32x7xf32> to vector<32x7xf32>
    %cst_393 = arith.constant dense<0.000000e+00> : vector<8x7xf32>
    %387 = tpu.matmul %380, %386, %cst_393 {dimension_numbers = #tpu.dot_dimension_numbers<[1], [0], [0], [1], [0, 0, 1, 1], [], []>} : vector<8x32xf32>, vector<32x7xf32>, vector<8x7xf32> -> vector<8x7xf32>
    %388 = arith.addf %378, %387 : vector<8x7xf32>
    %c296 = arith.constant 296 : index
    %c0_394 = arith.constant 0 : index
    %389 = vector.load %arg14[%c296, %c0_394] : memref<336x3xf32, #tpu.memory_space<vmem>>, vector<8x3xf32>
    %c296_395 = arith.constant 296 : index
    %c0_396 = arith.constant 0 : index
    %390 = vector.load %arg15[%c296_395, %c0_396] : memref<336x32xf32, #tpu.memory_space<vmem>>, vector<8x32xf32>
    %c37 = arith.constant 37 : index
    %c0_397 = arith.constant 0 : index
    %c0_398 = arith.constant 0 : index
    %391 = vector.load %arg4[%c37, %c0_397, %c0_398] : memref<42x3x32xf32, #tpu.memory_space<vmem>>, vector<1x3x32xf32>
    %392 = vector.shape_cast %391 : vector<1x3x32xf32> to vector<3x32xf32>
    %cst_399 = arith.constant dense<0.000000e+00> : vector<8x32xf32>
    %393 = tpu.matmul %389, %392, %cst_399 {dimension_numbers = #tpu.dot_dimension_numbers<[1], [0], [0], [1], [0, 0, 1, 1], [], []>} : vector<8x3xf32>, vector<3x32xf32>, vector<8x32xf32> -> vector<8x32xf32>
    %394 = arith.addf %384, %393 : vector<8x32xf32>
    %c37_400 = arith.constant 37 : index
    %c0_401 = arith.constant 0 : index
    %c0_402 = arith.constant 0 : index
    %395 = vector.load %arg10[%c37_400, %c0_401, %c0_402] : memref<42x32x7xf32, #tpu.memory_space<vmem>>, vector<1x32x7xf32>
    %396 = vector.shape_cast %395 : vector<1x32x7xf32> to vector<32x7xf32>
    %cst_403 = arith.constant dense<0.000000e+00> : vector<8x7xf32>
    %397 = tpu.matmul %390, %396, %cst_403 {dimension_numbers = #tpu.dot_dimension_numbers<[1], [0], [0], [1], [0, 0, 1, 1], [], []>} : vector<8x32xf32>, vector<32x7xf32>, vector<8x7xf32> -> vector<8x7xf32>
    %398 = arith.addf %388, %397 : vector<8x7xf32>
    %c304 = arith.constant 304 : index
    %c0_404 = arith.constant 0 : index
    %399 = vector.load %arg14[%c304, %c0_404] : memref<336x3xf32, #tpu.memory_space<vmem>>, vector<8x3xf32>
    %c304_405 = arith.constant 304 : index
    %c0_406 = arith.constant 0 : index
    %400 = vector.load %arg15[%c304_405, %c0_406] : memref<336x32xf32, #tpu.memory_space<vmem>>, vector<8x32xf32>
    %c38 = arith.constant 38 : index
    %c0_407 = arith.constant 0 : index
    %c0_408 = arith.constant 0 : index
    %401 = vector.load %arg4[%c38, %c0_407, %c0_408] : memref<42x3x32xf32, #tpu.memory_space<vmem>>, vector<1x3x32xf32>
    %402 = vector.shape_cast %401 : vector<1x3x32xf32> to vector<3x32xf32>
    %cst_409 = arith.constant dense<0.000000e+00> : vector<8x32xf32>
    %403 = tpu.matmul %399, %402, %cst_409 {dimension_numbers = #tpu.dot_dimension_numbers<[1], [0], [0], [1], [0, 0, 1, 1], [], []>} : vector<8x3xf32>, vector<3x32xf32>, vector<8x32xf32> -> vector<8x32xf32>
    %404 = arith.addf %394, %403 : vector<8x32xf32>
    %c38_410 = arith.constant 38 : index
    %c0_411 = arith.constant 0 : index
    %c0_412 = arith.constant 0 : index
    %405 = vector.load %arg10[%c38_410, %c0_411, %c0_412] : memref<42x32x7xf32, #tpu.memory_space<vmem>>, vector<1x32x7xf32>
    %406 = vector.shape_cast %405 : vector<1x32x7xf32> to vector<32x7xf32>
    %cst_413 = arith.constant dense<0.000000e+00> : vector<8x7xf32>
    %407 = tpu.matmul %400, %406, %cst_413 {dimension_numbers = #tpu.dot_dimension_numbers<[1], [0], [0], [1], [0, 0, 1, 1], [], []>} : vector<8x32xf32>, vector<32x7xf32>, vector<8x7xf32> -> vector<8x7xf32>
    %408 = arith.addf %398, %407 : vector<8x7xf32>
    %c312 = arith.constant 312 : index
    %c0_414 = arith.constant 0 : index
    %409 = vector.load %arg14[%c312, %c0_414] : memref<336x3xf32, #tpu.memory_space<vmem>>, vector<8x3xf32>
    %c312_415 = arith.constant 312 : index
    %c0_416 = arith.constant 0 : index
    %410 = vector.load %arg15[%c312_415, %c0_416] : memref<336x32xf32, #tpu.memory_space<vmem>>, vector<8x32xf32>
    %c39 = arith.constant 39 : index
    %c0_417 = arith.constant 0 : index
    %c0_418 = arith.constant 0 : index
    %411 = vector.load %arg4[%c39, %c0_417, %c0_418] : memref<42x3x32xf32, #tpu.memory_space<vmem>>, vector<1x3x32xf32>
    %412 = vector.shape_cast %411 : vector<1x3x32xf32> to vector<3x32xf32>
    %cst_419 = arith.constant dense<0.000000e+00> : vector<8x32xf32>
    %413 = tpu.matmul %409, %412, %cst_419 {dimension_numbers = #tpu.dot_dimension_numbers<[1], [0], [0], [1], [0, 0, 1, 1], [], []>} : vector<8x3xf32>, vector<3x32xf32>, vector<8x32xf32> -> vector<8x32xf32>
    %414 = arith.addf %404, %413 : vector<8x32xf32>
    %c39_420 = arith.constant 39 : index
    %c0_421 = arith.constant 0 : index
    %c0_422 = arith.constant 0 : index
    %415 = vector.load %arg10[%c39_420, %c0_421, %c0_422] : memref<42x32x7xf32, #tpu.memory_space<vmem>>, vector<1x32x7xf32>
    %416 = vector.shape_cast %415 : vector<1x32x7xf32> to vector<32x7xf32>
    %cst_423 = arith.constant dense<0.000000e+00> : vector<8x7xf32>
    %417 = tpu.matmul %410, %416, %cst_423 {dimension_numbers = #tpu.dot_dimension_numbers<[1], [0], [0], [1], [0, 0, 1, 1], [], []>} : vector<8x32xf32>, vector<32x7xf32>, vector<8x7xf32> -> vector<8x7xf32>
    %418 = arith.addf %408, %417 : vector<8x7xf32>
    %c320 = arith.constant 320 : index
    %c0_424 = arith.constant 0 : index
    %419 = vector.load %arg14[%c320, %c0_424] : memref<336x3xf32, #tpu.memory_space<vmem>>, vector<8x3xf32>
    %c320_425 = arith.constant 320 : index
    %c0_426 = arith.constant 0 : index
    %420 = vector.load %arg15[%c320_425, %c0_426] : memref<336x32xf32, #tpu.memory_space<vmem>>, vector<8x32xf32>
    %c40_427 = arith.constant 40 : index
    %c0_428 = arith.constant 0 : index
    %c0_429 = arith.constant 0 : index
    %421 = vector.load %arg4[%c40_427, %c0_428, %c0_429] : memref<42x3x32xf32, #tpu.memory_space<vmem>>, vector<1x3x32xf32>
    %422 = vector.shape_cast %421 : vector<1x3x32xf32> to vector<3x32xf32>
    %cst_430 = arith.constant dense<0.000000e+00> : vector<8x32xf32>
    %423 = tpu.matmul %419, %422, %cst_430 {dimension_numbers = #tpu.dot_dimension_numbers<[1], [0], [0], [1], [0, 0, 1, 1], [], []>} : vector<8x3xf32>, vector<3x32xf32>, vector<8x32xf32> -> vector<8x32xf32>
    %424 = arith.addf %414, %423 : vector<8x32xf32>
    %c40_431 = arith.constant 40 : index
    %c0_432 = arith.constant 0 : index
    %c0_433 = arith.constant 0 : index
    %425 = vector.load %arg10[%c40_431, %c0_432, %c0_433] : memref<42x32x7xf32, #tpu.memory_space<vmem>>, vector<1x32x7xf32>
    %426 = vector.shape_cast %425 : vector<1x32x7xf32> to vector<32x7xf32>
    %cst_434 = arith.constant dense<0.000000e+00> : vector<8x7xf32>
    %427 = tpu.matmul %420, %426, %cst_434 {dimension_numbers = #tpu.dot_dimension_numbers<[1], [0], [0], [1], [0, 0, 1, 1], [], []>} : vector<8x32xf32>, vector<32x7xf32>, vector<8x7xf32> -> vector<8x7xf32>
    %428 = arith.addf %418, %427 : vector<8x7xf32>
    %c328 = arith.constant 328 : index
    %c0_435 = arith.constant 0 : index
    %429 = vector.load %arg14[%c328, %c0_435] : memref<336x3xf32, #tpu.memory_space<vmem>>, vector<8x3xf32>
    %c328_436 = arith.constant 328 : index
    %c0_437 = arith.constant 0 : index
    %430 = vector.load %arg15[%c328_436, %c0_437] : memref<336x32xf32, #tpu.memory_space<vmem>>, vector<8x32xf32>
    %c41 = arith.constant 41 : index
    %c0_438 = arith.constant 0 : index
    %c0_439 = arith.constant 0 : index
    %431 = vector.load %arg4[%c41, %c0_438, %c0_439] : memref<42x3x32xf32, #tpu.memory_space<vmem>>, vector<1x3x32xf32>
    %432 = vector.shape_cast %431 : vector<1x3x32xf32> to vector<3x32xf32>
    %cst_440 = arith.constant dense<0.000000e+00> : vector<8x32xf32>
    %433 = tpu.matmul %429, %432, %cst_440 {dimension_numbers = #tpu.dot_dimension_numbers<[1], [0], [0], [1], [0, 0, 1, 1], [], []>} : vector<8x3xf32>, vector<3x32xf32>, vector<8x32xf32> -> vector<8x32xf32>
    %434 = arith.addf %424, %433 : vector<8x32xf32>
    %c41_441 = arith.constant 41 : index
    %c0_442 = arith.constant 0 : index
    %c0_443 = arith.constant 0 : index
    %435 = vector.load %arg10[%c41_441, %c0_442, %c0_443] : memref<42x32x7xf32, #tpu.memory_space<vmem>>, vector<1x32x7xf32>
    %436 = vector.shape_cast %435 : vector<1x32x7xf32> to vector<32x7xf32>
    %cst_444 = arith.constant dense<0.000000e+00> : vector<8x7xf32>
    %437 = tpu.matmul %430, %436, %cst_444 {dimension_numbers = #tpu.dot_dimension_numbers<[1], [0], [0], [1], [0, 0, 1, 1], [], []>} : vector<8x32xf32>, vector<32x7xf32>, vector<8x7xf32> -> vector<8x7xf32>
    %438 = arith.addf %428, %437 : vector<8x7xf32>
    %c0_445 = arith.constant 0 : index
    %c0_446 = arith.constant 0 : index
    %439 = vector.load %arg5[%c0_445, %c0_446] : memref<1x32xf32, #tpu.memory_space<vmem>>, vector<1x32xf32>
    %440 = vector.broadcast %439 : vector<1x32xf32> to vector<8x32xf32>
    %441 = arith.addf %434, %440 : vector<8x32xf32>
    %cst_447 = arith.constant 0.000000e+00 : f32
    %442 = vector.broadcast %cst_447 : f32 to vector<8x32xf32>
    %443 = arith.maximumf %441, %442 : vector<8x32xf32>
    %c0_448 = arith.constant 0 : index
    %c0_449 = arith.constant 0 : index
    %444 = vector.load %arg6[%c0_448, %c0_449] : memref<32x1xf32, #tpu.memory_space<vmem>>, vector<32x1xf32>
    %cst_450 = arith.constant dense<0.000000e+00> : vector<8x1xf32>
    %445 = tpu.matmul %443, %444, %cst_450 {dimension_numbers = #tpu.dot_dimension_numbers<[1], [0], [0], [1], [0, 0, 1, 1], [], []>} : vector<8x32xf32>, vector<32x1xf32>, vector<8x1xf32> -> vector<8x1xf32>
    %c0_451 = arith.constant 0 : index
    %c0_452 = arith.constant 0 : index
    %446 = vector.load %arg7[%c0_451, %c0_452] : memref<1x1xf32, #tpu.memory_space<vmem>>, vector<1x1xf32>
    %447 = vector.broadcast %446 : vector<1x1xf32> to vector<8x1xf32>
    %448 = arith.addf %445, %447 : vector<8x1xf32>
    %449 = math.tanh %448 : vector<8x1xf32>
    %c0_453 = arith.constant 0 : index
    %c0_454 = arith.constant 0 : index
    %450 = vector.load %arg13[%c0_453, %c0_454] : memref<8x1xf32, #tpu.memory_space<vmem>>, vector<8x1xf32>
    tpu.vector_store %arg13[%c0_453, %c0_454], %449 {strides = array<i32>} : memref<8x1xf32, #tpu.memory_space<vmem>>, vector<8x1xf32>,
    %c0_455 = arith.constant 0 : index
    %c0_456 = arith.constant 0 : index
    %451 = vector.load %arg11[%c0_455, %c0_456] : memref<1x7xf32, #tpu.memory_space<vmem>>, vector<1x7xf32>
    %452 = vector.broadcast %451 : vector<1x7xf32> to vector<8x7xf32>
    %453 = arith.addf %438, %452 : vector<8x7xf32>
    %cst_457 = arith.constant dense<0xFF800000> : vector<8xf32>
    %454 = vector.multi_reduction <maximumf>, %453, %cst_457 [1] : vector<8x7xf32> to vector<8xf32>
    %455 = vector.shape_cast %454 : vector<8xf32> to vector<8x1xf32>
    %456 = vector.broadcast %455 : vector<8x1xf32> to vector<8x7xf32>
    %457 = arith.subf %453, %456 : vector<8x7xf32>
    %458 = math.exp %457 : vector<8x7xf32>
    %cst_458 = arith.constant dense<0.000000e+00> : vector<8xf32>
    %459 = vector.multi_reduction <add>, %458, %cst_458 [1] : vector<8x7xf32> to vector<8xf32>
    %460 = vector.shape_cast %459 : vector<8xf32> to vector<8x1xf32>
    %461 = vector.broadcast %460 : vector<8x1xf32> to vector<8x7xf32>
    %462 = arith.divf %458, %461 : vector<8x7xf32>
    %c0_459 = arith.constant 0 : index
    %c0_460 = arith.constant 0 : index
    %463 = vector.load %arg12[%c0_459, %c0_460] : memref<8x7xf32, #tpu.memory_space<vmem>>, vector<8x7xf32>
    tpu.vector_store %arg12[%c0_459, %c0_460], %462 {strides = array<i32>} : memref<8x7xf32, #tpu.memory_space<vmem>>, vector<8x7xf32>,
    return
  }
  func.func @transform_0(%arg0: i32) -> (i32, i32) {
    %c0_i32 = arith.constant 0 : i32
    %c0_i32_0 = arith.constant 0 : i32
    return %arg0, %c0_i32 : i32, i32
  }
  func.func @transform_1(%arg0: i32) -> (i32, i32) {
    %c0_i32 = arith.constant 0 : i32
    %c0_i32_0 = arith.constant 0 : i32
    %c0_i32_1 = arith.constant 0 : i32
    return %c0_i32, %c0_i32_0 : i32, i32
  }
  func.func @transform_2(%arg0: i32) -> (i32, i32) {
    %c0_i32 = arith.constant 0 : i32
    %c0_i32_0 = arith.constant 0 : i32
    %c0_i32_1 = arith.constant 0 : i32
    return %c0_i32, %c0_i32_0 : i32, i32
  }
  func.func @transform_3(%arg0: i32) -> (i32, i32, i32) {
    %c0_i32 = arith.constant 0 : i32
    %c0_i32_0 = arith.constant 0 : i32
    %c0_i32_1 = arith.constant 0 : i32
    %c0_i32_2 = arith.constant 0 : i32
    return %c0_i32, %c0_i32_0, %c0_i32_1 : i32, i32, i32
  }
  func.func @transform_4(%arg0: i32) -> (i32, i32) {
    %c0_i32 = arith.constant 0 : i32
    %c0_i32_0 = arith.constant 0 : i32
    %c0_i32_1 = arith.constant 0 : i32
    return %c0_i32, %c0_i32_0 : i32, i32
  }
  func.func @transform_5(%arg0: i32) -> (i32, i32) {
    %c0_i32 = arith.constant 0 : i32
    %c0_i32_0 = arith.constant 0 : i32
    %c0_i32_1 = arith.constant 0 : i32
    return %c0_i32, %c0_i32_0 : i32, i32
  }
  func.func @transform_6(%arg0: i32) -> (i32, i32) {
    %c0_i32 = arith.constant 0 : i32
    %c0_i32_0 = arith.constant 0 : i32
    %c0_i32_1 = arith.constant 0 : i32
    return %c0_i32, %c0_i32_0 : i32, i32
  }
  func.func @transform_7(%arg0: i32) -> (i32, i32) {
    %c0_i32 = arith.constant 0 : i32
    %c0_i32_0 = arith.constant 0 : i32
    %c0_i32_1 = arith.constant 0 : i32
    return %c0_i32, %c0_i32_0 : i32, i32
  }
  func.func @transform_8(%arg0: i32) -> (i32, i32) {
    %c0_i32 = arith.constant 0 : i32
    %c0_i32_0 = arith.constant 0 : i32
    %c0_i32_1 = arith.constant 0 : i32
    return %c0_i32, %c0_i32_0 : i32, i32
  }
  func.func @transform_9(%arg0: i32) -> (i32, i32, i32) {
    %c0_i32 = arith.constant 0 : i32
    %c0_i32_0 = arith.constant 0 : i32
    %c0_i32_1 = arith.constant 0 : i32
    %c0_i32_2 = arith.constant 0 : i32
    return %c0_i32, %c0_i32_0, %c0_i32_1 : i32, i32, i32
  }
  func.func @transform_10(%arg0: i32) -> (i32, i32) {
    %c0_i32 = arith.constant 0 : i32
    %c0_i32_0 = arith.constant 0 : i32
    %c0_i32_1 = arith.constant 0 : i32
    return %c0_i32, %c0_i32_0 : i32, i32
  }
  func.func @transform_11(%arg0: i32) -> (i32, i32) {
    %c0_i32 = arith.constant 0 : i32
    %c0_i32_0 = arith.constant 0 : i32
    return %arg0, %c0_i32 : i32, i32
  }
  func.func @transform_12(%arg0: i32) -> (i32, i32) {
    %c0_i32 = arith.constant 0 : i32
    %c0_i32_0 = arith.constant 0 : i32
    return %arg0, %c0_i32 : i32, i32
  }
}

</mosaic_0001>

<bundles_post_ra>
// kernel: tpu_custom_call.1
= control target key start
LH: loop header
LB: loop body
LE: loop exit
PB: predicated region body
PF: predicated region fallthrough
CT: control target
= control target key end

     0   :  { %s4076_s23 = smov 0   ;;  %s5211_s0 = inlined_call_operand.vmem [shape: f32[672,128], index: 0, kind: input, shape index: {}]   ;;  %s5212_s1 = inlined_call_operand.vmem [shape: f32[128,3], index: 1, kind: input, shape index: {}]   ;;  %s5213_s2 = inlined_call_operand.vmem [shape: f32[1,3], index: 2, kind: input, shape index: {}]   ;;  %s5214_s3 = inlined_call_operand.vmem [shape: f32[42,3,32], index: 3, kind: input, shape index: {}]   ;;  %s5215_s4 = inlined_call_operand.vmem [shape: f32[1,32], index: 4, kind: input, shape index: {}]   ;;  %s5216_s5 = inlined_call_operand.vmem [shape: f32[32,1], index: 5, kind: input, shape index: {}]   ;;  %s5217_s6 = inlined_call_operand.<no memory space> [shape: f32[1,1], index: 6, kind: input, shape index: {}]   ;;  %s5218_s7 = inlined_call_operand.vmem [shape: f32[128,32], index: 7, kind: input, shape index: {}]   ;;  %s5219_s8 = inlined_call_operand.vmem [shape: f32[1,32], index: 8, kind: input, shape index: {}]   ;;  %s5220_s9 = inlined_call_operand.vmem [shape: f32[42,32,7], index: 9, kind: input, shape index: {}]   ;;  %s5221_s10 = inlined_call_operand.vmem [shape: f32[1,7], index: 10, kind: input, shape index: {}]   ;;  %s5222_s11 = inlined_call_operand.vmem [shape: f32[16,7], index: 11, kind: output, shape index: {0}]   ;;  %s5223_s12 = inlined_call_operand.vmem [shape: f32[16,1], index: 12, kind: output, shape index: {1}]  }
   0x1   :  { %v18_v0 = vstv %s5217_s6 }
   0x2   :  { %19 = vst [vmem:[#allocation4] sm:$0x1] %v18_v0 }
   0x3 LB: > { %s4082_s24 = sadd.s32 4294967295, %s4006_s23   ;;  %p3639_p0 = scmp.ge.s32.totalorder %s4006_s23, 1  ;;  %s4006_s23 = sphi %s4076_s23, %s25_s23  }
   0x4   : > { %p368_p1 = scmp.lt.s32.totalorder %s4006_s23, 3 }
   0x6   : > { %p369_p2 = pnand %p3639_p0, %p368_p1 }
   0x7   : > { %s413_s21 = smul.u32 (!%p369_p2), 42, %s4082_s24  ;;  %p419_p4 = scmp.lt.s32.totalorder (!%p369_p2), %s4082_s24, 1 }
   0x8   : > { %372 = sbr.rel (%p369_p2) target bundleno = 913 (0x391), region = 64 }
   0x9   : > { %p414_p3 = scmp.lt.s32.totalorder (!%p369_p2), %s413_s21, 83 }
   0xd   : > { %v484_v1 = vld [vmem:[%s5212_s1 + $0x78] sm:$0xff]  ;;  %v483_v3 = vld [vmem:[%s5212_s1 + $0x70] sm:$0xff]  ;;  %v482_v5 = vld [vmem:[%s5212_s1 + $0x68] sm:$0xff]  ;;  %s5225_s21 = smov (!%p414_p3, %s413_s21), 83  ;;  %vm979_vm0 = vcmask 1042432   ;;  %vm674_vm1 = vcmask 23552  }
   0xe   : > { %v732_v2 = vld [vmem:[%s5218_s7 + $0x78] sm:$0xff]  ;;  %489 = vmatpush.msra.mxu0 %v484_v1  ;;  %v731_v4 = vld [vmem:[%s5218_s7 + $0x70] sm:$0xff]  ;;  %v730_v6 = vld [vmem:[%s5218_s7 + $0x68] sm:$0xff]  ;;  %s3640_s27 = sshll.u32 %s5225_s21, 3  ;;  %vm922_vm2 = vcmask 261120   ;;  %vm3525_vm3 = vcmask 56320  }
   0xf   : > { %737 = vmatpush.msra.mxu1 %v732_v2  ;;  %v481_v7 = vld [vmem:[%s5212_s1 + $0x60] sm:$0xff]  ;;  %v480_v9 = vld [vmem:[%s5212_s1 + $0x58] sm:$0xff]  ;;  %v479_v11 = vld [vmem:[%s5212_s1 + $0x50] sm:$0xff]  ;;  %s4180_s19 = scalar_lea.vmem %s5211_s0, %s3640_s27  ;;  %s5227_s24 = smov (!%p419_p4, %s4082_s24), 1  ;;  %vm3518_vm4 = vcmask 7168  }
  0x10   : > { %490 = vmatpush.msra.mxu0 %v483_v3  ;;  %v729_v8 = vld [vmem:[%s5218_s7 + $0x60] sm:$0xff]  ;;  %v728_v10 = vld [vmem:[%s5218_s7 + $0x58] sm:$0xff]  ;;  %v727_v12 = vld [vmem:[%s5218_s7 + $0x50] sm:$0xff]  ;;  %s3641_s27 = sshll.u32 %s5227_s24, 3 }
  0x11   : > { %738 = vmatpush.msra.mxu1 %v731_v4  ;;  %v478_v13 = vld [vmem:[%s5212_s1 + $0x48] sm:$0xff]  ;;  %v477_v15 = vld [vmem:[%s5212_s1 + $0x40] sm:$0xff]  ;;  %v476_v17 = vld [vmem:[%s5212_s1 + $0x38] sm:$0xff]  ;;  %s426_s30 = scalar_lea.vmem %s5223_s12, %s3641_s27  ;;  %s422_s14 = scalar_lea.vmem %s5222_s11, %s3641_s27 }
  0x12   : > { %491 = vmatpush.msra.mxu0 %v482_v5  ;;  %v726_v14 = vld [vmem:[%s5218_s7 + $0x48] sm:$0xff]  ;;  %v725_v16 = vld [vmem:[%s5218_s7 + $0x40] sm:$0xff]  ;;  %v724_v18 = vld [vmem:[%s5218_s7 + $0x38] sm:$0xff] }
  0x13   : > { %739 = vmatpush.msra.mxu1 %v730_v6  ;;  %v475_v19 = vld [vmem:[%s5212_s1 + $0x30] sm:$0xff]  ;;  %v474_v21 = vld [vmem:[%s5212_s1 + $0x28] sm:$0xff]  ;;  %v473_v23 = vld [vmem:[%s5212_s1 + $0x20] sm:$0xff] }
  0x14   : > { %492 = vmatpush.msra.mxu0 %v481_v7  ;;  %v723_v20 = vld [vmem:[%s5218_s7 + $0x30] sm:$0xff]  ;;  %v722_v22 = vld [vmem:[%s5218_s7 + $0x28] sm:$0xff]  ;;  %v721_v24 = vld [vmem:[%s5218_s7 + $0x20] sm:$0xff] }
  0x15   : > { %740 = vmatpush.msra.mxu1 %v729_v8  ;;  %v472_v25 = vld [vmem:[%s5212_s1 + $0x18] sm:$0xff]  ;;  %v471_v27 = vld [vmem:[%s5212_s1 + $0x10] sm:$0xff]  ;;  %v470_v29 = vld [vmem:[%s5212_s1 + $0x8] sm:$0xff] }
  0x16   : > { %493 = vmatpush.msra.mxu0 %v480_v9  ;;  %v720_v26 = vld [vmem:[%s5218_s7 + $0x18] sm:$0xff]  ;;  %v719_v28 = vld [vmem:[%s5218_s7 + $0x10] sm:$0xff]  ;;  %v718_v30 = vld [vmem:[%s5218_s7 + $0x8] sm:$0xff] }
  0x17   : > { %741 = vmatpush.msra.mxu1 %v728_v10  ;;  %v469_v31 = vld [vmem:[%s5212_s1] sm:$0xff]  ;;  %v428_v34 = vld [vmem:[%s4180_s19 + $0x8] sm:$0xff]  ;;  %v429_v35 = vld [vmem:[%s4180_s19 + $0x10] sm:$0xff] }
  0x18   : > { %494 = vmatpush.msra.mxu0 %v479_v11  ;;  %v717_v32 = vld [vmem:[%s5218_s7] sm:$0xff]  ;;  %v430_v36 = vld [vmem:[%s4180_s19 + $0x18] sm:$0xff]  ;;  %v432_v38 = vld [vmem:[%s4180_s19 + $0x28] sm:$0xff] }
  0x19   : > { %742 = vmatpush.msra.mxu1 %v727_v12  ;;  %v427_v33 = vld [vmem:[%s4180_s19] sm:$0xff]  ;;  %v433_v39 = vld [vmem:[%s4180_s19 + $0x30] sm:$0xff]  ;;  %v434_v40 = vld [vmem:[%s4180_s19 + $0x38] sm:$0xff] }
  0x1a   : > { %495 = vmatpush.msra.mxu0 %v478_v13  ;;  %v431_v37 = vld [vmem:[%s4180_s19 + $0x20] sm:$0xff]  ;;  %v436_v42 = vld [vmem:[%s4180_s19 + $0x48] sm:$0xff]  ;;  %v437_v43 = vld [vmem:[%s4180_s19 + $0x50] sm:$0xff] }
  0x1b   : > { %743 = vmatpush.msra.mxu1 %v726_v14  ;;  %v435_v41 = vld [vmem:[%s4180_s19 + $0x40] sm:$0xff]  ;;  %v438_v44 = vld [vmem:[%s4180_s19 + $0x58] sm:$0xff]  ;;  %v440_v46 = vld [vmem:[%s4180_s19 + $0x68] sm:$0xff] }
  0x1c   : > { %496 = vmatpush.msra.mxu0 %v477_v15  ;;  %v439_v45 = vld [vmem:[%s4180_s19 + $0x60] sm:$0xff]  ;;  %v971_v48 = vld [vmem:[%s5220_s9 + $0x18] sm:$0xff]  ;;  %v970_v49 = vld [vmem:[%s5220_s9 + $0x10] sm:$0xff] }
  0x1d   : > { %744 = vmatpush.msra.mxu1 %v725_v16  ;;  %v967_v47 = vld [vmem:[%s5214_s3] sm:$0x7]  ;;  %v441_v50 = vld [vmem:[%s4180_s19 + $0x70] sm:$0xff]  ;;  %v969_v51 = vld [vmem:[%s5220_s9 + $0x8] sm:$0xff] }
  0x1e   : > { %497 = vmatpush.msra.mxu0 %v476_v17  ;;  %3646 = vmatpush.msk.msra.mxu3 %vm979_vm0, %v967_v47  ;;  %v968_v52 = vld [vmem:[%s5220_s9] sm:$0xff]  ;;  %v3651_v54 = vld [vmem:[%s5220_s9 + $0x38] sm:$0xff]  ;;  %v3650_v56 = vld [vmem:[%s5220_s9 + $0x30] sm:$0xff] }
  0x1f   : > { %745 = vmatpush.msra.mxu1 %v724_v18  ;;  %v3643_v53 = vld [vmem:[%s5214_s3 + $0x4] sm:$0x7]  ;;  %v442_v55 = vld [vmem:[%s4180_s19 + $0x78] sm:$0xff]  ;;  %v3649_v57 = vld [vmem:[%s5220_s9 + $0x28] sm:$0xff] }
  0x20   : > { %498 = vmatpush.msra.mxu0 %v475_v19  ;;  %1072 = vmatpush.msrb.mxu3 %v971_v48  ;;  %v3648_v58 = vld [vmem:[%s5220_s9 + $0x20] sm:$0xff]  ;;  %v444_v6 = vld [vmem:[%s4180_s19 + $0x88] sm:$0xff]  ;;  %v3660_v11 = vld [vmem:[%s5220_s9 + $0x58] sm:$0xff] }
  0x21   : > { %746 = vmatpush.msra.mxu1 %v723_v20  ;;  %3644 = vmatpush.msk.msra.mxu2 %vm979_vm0, %v3643_v53  ;;  %v4239_v59 = vld [vmem:[%s5213_s2] ss:$0 sm:$0xff]  ;;  %v3659_v13 = vld [vmem:[%s5220_s9 + $0x50] sm:$0xff]  ;;  %v3658_v14 = vld [vmem:[%s5220_s9 + $0x48] sm:$0xff] }
  0x22   : > { %499 = vmatpush.msra.mxu0 %v474_v21  ;;  %1073 = vmatpush.msrb.mxu3 %v970_v49  ;;  %v4244_v60 = vld [vmem:[%s5219_s8] ss:$0 sm:$0xff]  ;;  %v445_v16 = vld [vmem:[%s4180_s19 + $0x90] sm:$0xff] }
  0x23   : > { %747 = vmatpush.msra.mxu1 %v722_v22  ;;  %1049 = vmatpush.msrb.mxu2 %v3651_v54  ;;  %v443_v63 = vld [vmem:[%s4180_s19 + $0x80] sm:$0xff]  ;;  %v3670_v53 = vld [vmem:[%s5214_s3 + $0x10] sm:$0x7] }
  0x24   : > { %500 = vmatpush.msra.mxu0 %v473_v23  ;;  %1074 = vmatpush.msrb.mxu3 %v969_v51  ;;  %v3657_v20 = vld [vmem:[%s5220_s9 + $0x40] sm:$0xff]  ;;  %v3668_v23 = vld [vmem:[%s5220_s9 + $0x78] sm:$0xff] }
  0x25   : > { %748 = vmatpush.msra.mxu1 %v721_v24  ;;  %1050 = vmatpush.msrb.mxu2 %v3650_v56  ;;  %v3654_v24 = vld [vmem:[%s5214_s3 + $0x8] sm:$0x7]  ;;  %v3673_v48 = vld [vmem:[%s5220_s9 + $0x80] sm:$0xff] }
  0x26   : > { %501 = vmatpush.msra.mxu0 %v472_v25  ;;  %1075 = vmatpush.msrb.mxu3 %v968_v52  ;;  %v3684_v52 = vld [vmem:[%s5220_s9 + $0xb8] sm:$0xff]  ;;  %v3682_v56 = vld [vmem:[%s5220_s9 + $0xa8] sm:$0xff] }
  0x27   : > { %749 = vmatpush.msra.mxu1 %v720_v26  ;;  %1051 = vmatpush.msrb.mxu2 %v3649_v57 }
  0x28   : > { %502 = vmatpush.msra.mxu0 %v471_v27  ;;  %v3667_v27 = vld [vmem:[%s5220_s9 + $0x70] sm:$0xff] }
  0x29   : > { %750 = vmatpush.msra.mxu1 %v719_v28  ;;  %1052 = vmatpush.msrb.mxu2 %v3648_v58  ;;  %v3666_v28 = vld [vmem:[%s5220_s9 + $0x68] sm:$0xff] }
  0x2a   : > { %503 = vmatpush.msra.mxu0 %v470_v29  ;;  %v448_v58 = vld [vmem:[%s4180_s19 + $0xa8] sm:$0xff] }
  0x2b   : > { %751 = vmatpush.msra.mxu1 %v718_v30  ;;  %v446_v30 = vld [vmem:[%s4180_s19 + $0x98] sm:$0xff] }
  0x2c   : > { %504 = vmatpush.msra.mxu0 %v469_v31 }
  0x2d   : > { %752 = vmatpush.msra.mxu1 %v717_v32  ;;  %505 = vmatmul.f32.vlgmr.msra.gmra.mxu0 %v427_v33 }
  0x2e   : > { %753 = vmatmul.f32.vlgmr.msra.gmra.mxu1 %v427_v33 }
  0x35   : > { %508 = vmatmul.f32.gmra.mxu0 %v428_v34 }
  0x36   : > { %756 = vmatmul.f32.gmra.mxu1 %v428_v34  ;;  %v3665_v34 = vld [vmem:[%s5220_s9 + $0x60] sm:$0xff] }
  0x3d   : > { %511 = vmatmul.f32.gmra.mxu0 %v429_v35 }
  0x3e   : > { %759 = vmatmul.f32.gmra.mxu1 %v429_v35 }
  0x45   : > { %514 = vmatmul.f32.gmra.mxu0 %v430_v36 }
  0x46   : > { %762 = vmatmul.f32.gmra.mxu1 %v430_v36 }
  0x4d   : > { %517 = vmatmul.f32.gmra.mxu0 %v431_v37 }
  0x4e   : > { %765 = vmatmul.f32.gmra.mxu1 %v431_v37  ;;  %v3676_v37 = vld [vmem:[%s5220_s9 + $0x98] sm:$0xff] }
  0x55   : > { %520 = vmatmul.f32.gmra.mxu0 %v432_v38 }
  0x56   : > { %768 = vmatmul.f32.gmra.mxu1 %v432_v38  ;;  %v3662_v38 = vld [vmem:[%s5214_s3 + $0xc] sm:$0x7] }
  0x5d   : > { %523 = vmatmul.f32.gmra.mxu0 %v433_v39 }
  0x5e   : > { %771 = vmatmul.f32.gmra.mxu1 %v433_v39 }
  0x65   : > { %526 = vmatmul.f32.gmra.mxu0 %v434_v40 }
  0x66   : > { %774 = vmatmul.f32.gmra.mxu1 %v434_v40 }
  0x6d   : > { %529 = vmatmul.f32.gmra.mxu0 %v435_v41 }
  0x6e   : > { %777 = vmatmul.f32.gmra.mxu1 %v435_v41  ;;  %v3675_v41 = vld [vmem:[%s5220_s9 + $0x90] sm:$0xff] }
  0x75   : > { %532 = vmatmul.f32.gmra.mxu0 %v436_v42 }
  0x76   : > { %780 = vmatmul.f32.gmra.mxu1 %v436_v42  ;;  %v3674_v42 = vld [vmem:[%s5220_s9 + $0x88] sm:$0xff] }
  0x7d   : > { %535 = vmatmul.f32.gmra.mxu0 %v437_v43 }
  0x7e   : > { %783 = vmatmul.f32.gmra.mxu1 %v437_v43 }
  0x85   : > { %538 = vmatmul.f32.gmra.mxu0 %v438_v44 }
  0x86   : > { %786 = vmatmul.f32.gmra.mxu1 %v438_v44  ;;  %v447_v44 = vld [vmem:[%s4180_s19 + $0xa0] sm:$0xff] }
  0x8d   : > { %541 = vmatmul.f32.gmra.mxu0 %v439_v45 }
  0x8e   : > { %789 = vmatmul.f32.gmra.mxu1 %v439_v45 }
  0x95   : > { %544 = vmatmul.f32.gmra.mxu0 %v440_v46 }
  0x96   : > { %792 = vmatmul.f32.gmra.mxu1 %v440_v46 }
  0x9d   : > { %547 = vmatmul.f32.gmra.mxu0 %v441_v50 }
  0x9e   : > { %795 = vmatmul.f32.gmra.mxu1 %v441_v50 }
  0xa5   : > { %550 = vmatmul.f32.gmra.mxu0 %v442_v55 }
  0xa6   : > { %798 = vmatmul.f32.gmra.mxu1 %v442_v55  ;;  %v3683_v55 = vld [vmem:[%s5220_s9 + $0xb0] sm:$0xff] }
  0xaa   : > { %v506_v61 = vpop.f32.mrf.mxu0 }
  0xab   : > { %v754_v62 = vpop.f32.mrf.mxu1  ;;  %v507_v0 = vadd.f32 %v4239_v59, %v506_v61 }
  0xac   : > { %v755_v1 = vadd.f32 %v4244_v60, %v754_v62 }
  0xad   : > { %v632_v2 = vmax.f32 %v507_v0, 0.0  ;;  %553 = vmatmul.f32.gmra.mxu0 %v443_v63  ;;  %v3681_v0 = vld [vmem:[%s5220_s9 + $0xa0] sm:$0xff] }
  0xae   : > { %v880_v3 = vmax.f32 %v755_v1, 0.0  ;;  %801 = vmatmul.f32.gmra.mxu1 %v443_v63 }
  0xaf   : > { %675 = vst.msk [vmem:[#allocation2] sm:$0xff] %vm674_vm1, %v632_v2 }
  0xb0   : > { %923 = vst.msk [vmem:[#allocation3] sm:$0xff] %vm922_vm2, %v880_v3 }
  0xb2   : > { %v509_v4 = vpop.f32.mrf.mxu0 }
  0xb3   : > { %v757_v5 = vpop.f32.mrf.mxu1  ;;  %v510_v7 = vadd.f32 %v4239_v59, %v509_v4  ;;  %v3692_v4 = vld [vmem:[%s5220_s9 + $0xd8] sm:$0xff] }
  0xb4   : > { %v758_v8 = vadd.f32 %v4244_v60, %v757_v5  ;;  %v3678_v5 = vld [vmem:[%s5214_s3 + $0x14] sm:$0x7] }
  0xb5   : > { %v633_v9 = vmax.f32 %v510_v7, 0.0  ;;  %556 = vmatmul.f32.gmra.mxu0 %v444_v6  ;;  %v3691_v7 = vld [vmem:[%s5220_s9 + $0xd0] sm:$0xff] }
  0xb6   : > { %v881_v10 = vmax.f32 %v758_v8, 0.0  ;;  %804 = vmatmul.f32.gmra.mxu1 %v444_v6  ;;  %v965_v12 = vld [vmem:[#allocation2] sm:$0xff]  ;;  %v3690_v8 = vld [vmem:[%s5220_s9 + $0xc8] sm:$0xff] }
  0xb7   : > { %676 = vst.msk [vmem:[#allocation2 + $0x8] sm:$0xff] %vm674_vm1, %v633_v9  ;;  %3647 = vmatmul.msk.f32.vlgmr.msra.gmra.mxu3 %vm674_vm1, %v965_v12  ;;  %v966_v26 = vld [vmem:[#allocation3] sm:$0xff] }
  0xb8   : > { %924 = vst.msk [vmem:[#allocation3 + $0x8] sm:$0xff] %vm922_vm2, %v881_v10  ;;  %1131 = vmatpush.msra.mxu3 %v3660_v11  ;;  %v449_v10 = vld [vmem:[%s4180_s19 + $0xb0] sm:$0xff] }
  0xba   : > { %1132 = vmatpush.msra.mxu3 %v3659_v13  ;;  %v512_v17 = vpop.f32.mrf.mxu0 }
  0xbb   : > { %v760_v15 = vpop.f32.mrf.mxu1  ;;  %v513_v19 = vadd.f32 %v4239_v59, %v512_v17 }
  0xbc   : > { %v761_v18 = vadd.f32 %v4244_v60, %v760_v15  ;;  %1133 = vmatpush.msra.mxu3 %v3658_v14  ;;  %v3689_v14 = vld [vmem:[%s5220_s9 + $0xc0] sm:$0xff] }
  0xbd   : > { %v634_v22 = vmax.f32 %v513_v19, 0.0  ;;  %559 = vmatmul.f32.gmra.mxu0 %v445_v16  ;;  %v3686_v19 = vld [vmem:[%s5214_s3 + $0x18] sm:$0x7] }
  0xbe   : > { %v882_v21 = vmax.f32 %v761_v18, 0.0  ;;  %807 = vmatmul.f32.gmra.mxu1 %v445_v16  ;;  %v972_v25 = vld [vmem:[#allocation2 + $0x8] sm:$0xff]  ;;  %1134 = vmatpush.msra.mxu3 %v3657_v20  ;;  %v3700_v18 = vld [vmem:[%s5220_s9 + $0xf8] sm:$0xff] }
  0xbf   : > { %3645 = vmatmul.msk.f32.vlgmr.msra.gmra.mxu2 %vm674_vm1, %v972_v25  ;;  %3653 = vmatmul.msk.f32.vlgmr.msrb.gmra.mxu3 %vm922_vm2, %v966_v26  ;;  %677 = vst.msk [vmem:[#allocation2 + $0x10] sm:$0xff] %vm674_vm1, %v634_v22  ;;  %v973_v39 = vld [vmem:[#allocation3 + $0x8] sm:$0xff]  ;;  %v3698_v22 = vld [vmem:[%s5220_s9 + $0xe8] sm:$0xff] }
  0xc0   : > { %925 = vst.msk [vmem:[#allocation3 + $0x10] sm:$0xff] %vm922_vm2, %v882_v21  ;;  %1191 = vmatpush.msrb.mxu3 %v3668_v23  ;;  %3655 = vmatpush.msk.msra.mxu2 %vm979_vm0, %v3654_v24  ;;  %v3699_v21 = vld [vmem:[%s5220_s9 + $0xf0] sm:$0xff]  ;;  %v450_v24 = vld [vmem:[%s4180_s19 + $0xb8] sm:$0xff] }
  0xc2   : > { %1192 = vmatpush.msrb.mxu3 %v3667_v27  ;;  %v515_v31 = vpop.f32.mrf.mxu0 }
  0xc3   : > { %v763_v29 = vpop.f32.mrf.mxu1  ;;  %v516_v33 = vadd.f32 %v4239_v59, %v515_v31 }
  0xc4   : > { %v764_v32 = vadd.f32 %v4244_v60, %v763_v29  ;;  %1193 = vmatpush.msrb.mxu3 %v3666_v28  ;;  %v3697_v28 = vld [vmem:[%s5220_s9 + $0xe0] sm:$0xff] }
  0xc5   : > { %v635_v36 = vmax.f32 %v516_v33, 0.0  ;;  %562 = vmatmul.f32.gmra.mxu0 %v446_v30  ;;  %v3694_v33 = vld [vmem:[%s5214_s3 + $0x1c] sm:$0x7] }
  0xc6   : > { %v883_v35 = vmax.f32 %v764_v32, 0.0  ;;  %810 = vmatmul.f32.gmra.mxu1 %v446_v30  ;;  %1194 = vmatpush.msrb.mxu3 %v3665_v34  ;;  %v1080_v49 = vld [vmem:[#allocation2 + $0x10] sm:$0xff]  ;;  %v3708_v32 = vld [vmem:[%s5220_s9 + $0x118] sm:$0xff] }
  0xc7   : > { %v1081_v40 = vld [vmem:[#allocation3 + $0x10] sm:$0xff]  ;;  %3652 = vmatmul.msk.f32.vlgmr.msrb.gmra.mxu2 %vm922_vm2, %v973_v39  ;;  %678 = vst.msk [vmem:[#allocation2 + $0x18] sm:$0xff] %vm674_vm1, %v635_v36  ;;  %v3706_v36 = vld [vmem:[%s5220_s9 + $0x108] sm:$0xff] }
  0xc8   : > { %926 = vst.msk [vmem:[#allocation3 + $0x18] sm:$0xff] %vm922_vm2, %v883_v35  ;;  %3661 = vmatmul.msk.f32.vlgmr.msra.gmra.mxu3 %vm922_vm2, %v1081_v40  ;;  %3663 = vmatpush.msk.msrb.mxu2 %vm979_vm0, %v3662_v38  ;;  %v3707_v35 = vld [vmem:[%s5220_s9 + $0x110] sm:$0xff]  ;;  %v451_v38 = vld [vmem:[%s4180_s19 + $0xc0] sm:$0xff] }
  0xc9   : > { %1251 = vmatpush.msra.mxu3 %v3676_v37 }
  0xca   : > { %v518_v45 = vpop.f32.mrf.mxu0 }
  0xcb   : > { %v766_v43 = vpop.f32.mrf.mxu1  ;;  %1252 = vmatpush.msra.mxu3 %v3675_v41  ;;  %v519_v47 = vadd.f32 %v4239_v59, %v518_v45 }
  0xcc   : > { %v767_v46 = vadd.f32 %v4244_v60, %v766_v43 }
  0xcd   : > { %1253 = vmatpush.msra.mxu3 %v3674_v42  ;;  %v636_v51 = vmax.f32 %v519_v47, 0.0  ;;  %565 = vmatmul.f32.gmra.mxu0 %v447_v44  ;;  %v3705_v42 = vld [vmem:[%s5220_s9 + $0x100] sm:$0xff] }
  0xce   : > { %v884_v50 = vmax.f32 %v767_v46, 0.0  ;;  %813 = vmatmul.f32.gmra.mxu1 %v447_v44  ;;  %v1140_v1 = vld [vmem:[#allocation2 + $0x18] sm:$0xff]  ;;  %v3702_v47 = vld [vmem:[%s5214_s3 + $0x20] sm:$0x7] }
  0xcf   : > { %v1141_v54 = vld [vmem:[#allocation3 + $0x18] sm:$0xff]  ;;  %1254 = vmatpush.msra.mxu3 %v3673_v48  ;;  %3656 = vmatmul.msk.f32.vlgmr.msra.gmra.mxu2 %vm674_vm1, %v1080_v49  ;;  %679 = vst.msk [vmem:[#allocation2 + $0x20] sm:$0xff] %vm674_vm1, %v636_v51  ;;  %v3716_v46 = vld [vmem:[%s5220_s9 + $0x138] sm:$0xff]  ;;  %v3715_v49 = vld [vmem:[%s5220_s9 + $0x130] sm:$0xff] }
  0xd0   : > { %927 = vst.msk [vmem:[#allocation3 + $0x20] sm:$0xff] %vm922_vm2, %v884_v50  ;;  %3669 = vmatmul.msk.f32.vlgmr.msrb.gmra.mxu3 %vm922_vm2, %v1141_v54  ;;  %3671 = vmatpush.msk.msra.mxu2 %vm979_vm0, %v3670_v53  ;;  %v3714_v50 = vld [vmem:[%s5220_s9 + $0x128] sm:$0xff] }
  0xd1   : > { %1311 = vmatpush.msrb.mxu3 %v3684_v52  ;;  %v452_v52 = vld [vmem:[%s4180_s19 + $0xc8] sm:$0xff] }
  0xd2   : > { %v521_v61 = vpop.f32.mrf.mxu0 }
  0xd3   : > { %v769_v57 = vpop.f32.mrf.mxu1  ;;  %1312 = vmatpush.msrb.mxu3 %v3683_v55  ;;  %v522_v63 = vadd.f32 %v4239_v59, %v521_v61 }
  0xd4   : > { %v770_v62 = vadd.f32 %v4244_v60, %v769_v57 }
  0xd5   : > { %1313 = vmatpush.msrb.mxu3 %v3682_v56  ;;  %v637_v3 = vmax.f32 %v522_v63, 0.0  ;;  %568 = vmatmul.f32.gmra.mxu0 %v448_v58  ;;  %v3713_v56 = vld [vmem:[%s5220_s9 + $0x120] sm:$0xff] }
  0xd6   : > { %v885_v2 = vmax.f32 %v770_v62, 0.0  ;;  %816 = vmatmul.f32.gmra.mxu1 %v448_v58  ;;  %v1200_v15 = vld [vmem:[#allocation2 + $0x20] sm:$0xff]  ;;  %v3724_v62 = vld [vmem:[%s5220_s9 + $0x158] sm:$0xff] }
  0xd7   : > { %v1201_v6 = vld [vmem:[#allocation3 + $0x20] sm:$0xff]  ;;  %1314 = vmatpush.msrb.mxu3 %v3681_v0  ;;  %3664 = vmatmul.msk.f32.vlgmr.msrb.gmra.mxu2 %vm674_vm1, %v1140_v1  ;;  %680 = vst.msk [vmem:[#allocation2 + $0x28] sm:$0xff] %vm674_vm1, %v637_v3  ;;  %v3710_v63 = vld [vmem:[%s5214_s3 + $0x24] sm:$0x7] }
  0xd8   : > { %928 = vst.msk [vmem:[#allocation3 + $0x28] sm:$0xff] %vm922_vm2, %v885_v2  ;;  %3677 = vmatmul.msk.f32.vlgmr.msra.gmra.mxu3 %vm922_vm2, %v1201_v6  ;;  %3679 = vmatpush.msk.msrb.mxu2 %vm979_vm0, %v3678_v5  ;;  %v3723_v1 = vld [vmem:[%s5220_s9 + $0x150] sm:$0xff]  ;;  %v3722_v2 = vld [vmem:[%s5220_s9 + $0x148] sm:$0xff] }
  0xd9   : > { %1371 = vmatpush.msra.mxu3 %v3692_v4  ;;  %v453_v4 = vld [vmem:[%s4180_s19 + $0xd0] sm:$0xff] }
  0xda   : > { %v524_v11 = vpop.f32.mrf.mxu0 }
  0xdb   : > { %v772_v9 = vpop.f32.mrf.mxu1  ;;  %1372 = vmatpush.msra.mxu3 %v3691_v7  ;;  %v525_v13 = vadd.f32 %v4239_v59, %v524_v11 }
  0xdc   : > { %v773_v12 = vadd.f32 %v4244_v60, %v772_v9 }
  0xdd   : > { %1373 = vmatpush.msra.mxu3 %v3690_v8  ;;  %v638_v17 = vmax.f32 %v525_v13, 0.0  ;;  %571 = vmatmul.f32.gmra.mxu0 %v449_v10  ;;  %v3721_v8 = vld [vmem:[%s5220_s9 + $0x140] sm:$0xff]  ;;  %v3718_v13 = vld [vmem:[%s5214_s3 + $0x28] sm:$0x7] }
  0xde   : > { %v886_v16 = vmax.f32 %v773_v12, 0.0  ;;  %819 = vmatmul.f32.gmra.mxu1 %v449_v10  ;;  %v1260_v29 = vld [vmem:[#allocation2 + $0x28] sm:$0xff]  ;;  %v3732_v12 = vld [vmem:[%s5220_s9 + $0x178] sm:$0xff] }
  0xdf   : > { %v1261_v20 = vld [vmem:[#allocation3 + $0x28] sm:$0xff]  ;;  %1374 = vmatpush.msra.mxu3 %v3689_v14  ;;  %3672 = vmatmul.msk.f32.vlgmr.msra.gmra.mxu2 %vm674_vm1, %v1200_v15  ;;  %681 = vst.msk [vmem:[#allocation2 + $0x30] sm:$0xff] %vm674_vm1, %v638_v17  ;;  %v3731_v15 = vld [vmem:[%s5220_s9 + $0x170] sm:$0xff] }
  0xe0   : > { %929 = vst.msk [vmem:[#allocation3 + $0x30] sm:$0xff] %vm922_vm2, %v886_v16  ;;  %3685 = vmatmul.msk.f32.vlgmr.msrb.gmra.mxu3 %vm922_vm2, %v1261_v20  ;;  %3687 = vmatpush.msk.msra.mxu2 %vm979_vm0, %v3686_v19  ;;  %v3730_v16 = vld [vmem:[%s5220_s9 + $0x168] sm:$0xff] }
  0xe1   : > { %1431 = vmatpush.msrb.mxu3 %v3700_v18  ;;  %v454_v18 = vld [vmem:[%s4180_s19 + $0xd8] sm:$0xff] }
  0xe2   : > { %v527_v25 = vpop.f32.mrf.mxu0 }
  0xe3   : > { %v775_v23 = vpop.f32.mrf.mxu1  ;;  %1432 = vmatpush.msrb.mxu3 %v3699_v21  ;;  %v528_v27 = vadd.f32 %v4239_v59, %v527_v25 }
  0xe4   : > { %v776_v26 = vadd.f32 %v4244_v60, %v775_v23 }
  0xe5   : > { %1433 = vmatpush.msrb.mxu3 %v3698_v22  ;;  %v639_v31 = vmax.f32 %v528_v27, 0.0  ;;  %574 = vmatmul.f32.gmra.mxu0 %v450_v24  ;;  %v3729_v22 = vld [vmem:[%s5220_s9 + $0x160] sm:$0xff]  ;;  %v3726_v27 = vld [vmem:[%s5214_s3 + $0x2c] sm:$0x7] }
  0xe6   : > { %v887_v30 = vmax.f32 %v776_v26, 0.0  ;;  %822 = vmatmul.f32.gmra.mxu1 %v450_v24  ;;  %v1320_v43 = vld [vmem:[#allocation2 + $0x30] sm:$0xff]  ;;  %v3740_v26 = vld [vmem:[%s5220_s9 + $0x198] sm:$0xff] }
  0xe7   : > { %v1321_v34 = vld [vmem:[#allocation3 + $0x30] sm:$0xff]  ;;  %1434 = vmatpush.msrb.mxu3 %v3697_v28  ;;  %3680 = vmatmul.msk.f32.vlgmr.msrb.gmra.mxu2 %vm674_vm1, %v1260_v29  ;;  %682 = vst.msk [vmem:[#allocation2 + $0x38] sm:$0xff] %vm674_vm1, %v639_v31  ;;  %v3739_v29 = vld [vmem:[%s5220_s9 + $0x190] sm:$0xff] }
  0xe8   : > { %930 = vst.msk [vmem:[#allocation3 + $0x38] sm:$0xff] %vm922_vm2, %v887_v30  ;;  %3693 = vmatmul.msk.f32.vlgmr.msra.gmra.mxu3 %vm922_vm2, %v1321_v34  ;;  %3695 = vmatpush.msk.msrb.mxu2 %vm979_vm0, %v3694_v33  ;;  %v3738_v30 = vld [vmem:[%s5220_s9 + $0x188] sm:$0xff] }
  0xe9   : > { %1491 = vmatpush.msra.mxu3 %v3708_v32  ;;  %v455_v32 = vld [vmem:[%s4180_s19 + $0xe0] sm:$0xff] }
  0xea   : > { %v530_v39 = vpop.f32.mrf.mxu0 }
  0xeb   : > { %v778_v37 = vpop.f32.mrf.mxu1  ;;  %1492 = vmatpush.msra.mxu3 %v3707_v35  ;;  %v531_v41 = vadd.f32 %v4239_v59, %v530_v39 }
  0xec   : > { %v779_v40 = vadd.f32 %v4244_v60, %v778_v37 }
  0xed   : > { %1493 = vmatpush.msra.mxu3 %v3706_v36  ;;  %v640_v45 = vmax.f32 %v531_v41, 0.0  ;;  %577 = vmatmul.f32.gmra.mxu0 %v451_v38  ;;  %v3737_v36 = vld [vmem:[%s5220_s9 + $0x180] sm:$0xff]  ;;  %v3734_v41 = vld [vmem:[%s5214_s3 + $0x30] sm:$0x7] }
  0xee   : > { %v888_v44 = vmax.f32 %v779_v40, 0.0  ;;  %825 = vmatmul.f32.gmra.mxu1 %v451_v38  ;;  %v1380_v57 = vld [vmem:[#allocation2 + $0x38] sm:$0xff] }
  0xef   : > { %v1381_v48 = vld [vmem:[#allocation3 + $0x38] sm:$0xff]  ;;  %1494 = vmatpush.msra.mxu3 %v3705_v42  ;;  %3688 = vmatmul.msk.f32.vlgmr.msra.gmra.mxu2 %vm674_vm1, %v1320_v43  ;;  %683 = vst.msk [vmem:[#allocation2 + $0x40] sm:$0xff] %vm674_vm1, %v640_v45  ;;  %v3748_v40 = vld [vmem:[%s5220_s9 + $0x1b8] sm:$0xff]  ;;  %v3747_v43 = vld [vmem:[%s5220_s9 + $0x1b0] sm:$0xff] }
  0xf0   : > { %931 = vst.msk [vmem:[#allocation3 + $0x40] sm:$0xff] %vm922_vm2, %v888_v44  ;;  %3701 = vmatmul.msk.f32.vlgmr.msrb.gmra.mxu3 %vm922_vm2, %v1381_v48  ;;  %3703 = vmatpush.msk.msra.mxu2 %vm979_vm0, %v3702_v47  ;;  %v3746_v44 = vld [vmem:[%s5220_s9 + $0x1a8] sm:$0xff] }
  0xf1   : > { %1551 = vmatpush.msrb.mxu3 %v3716_v46  ;;  %v456_v46 = vld [vmem:[%s4180_s19 + $0xe8] sm:$0xff] }
  0xf2   : > { %v533_v53 = vpop.f32.mrf.mxu0 }
  0xf3   : > { %v781_v51 = vpop.f32.mrf.mxu1  ;;  %1552 = vmatpush.msrb.mxu3 %v3715_v49  ;;  %v534_v55 = vadd.f32 %v4239_v59, %v533_v53 }
  0xf4   : > { %v782_v54 = vadd.f32 %v4244_v60, %v781_v51 }
  0xf5   : > { %1553 = vmatpush.msrb.mxu3 %v3714_v50  ;;  %v641_v61 = vmax.f32 %v534_v55, 0.0  ;;  %580 = vmatmul.f32.gmra.mxu0 %v452_v52  ;;  %v3745_v50 = vld [vmem:[%s5220_s9 + $0x1a0] sm:$0xff]  ;;  %v3742_v55 = vld [vmem:[%s5214_s3 + $0x34] sm:$0x7] }
  0xf6   : > { %v889_v58 = vmax.f32 %v782_v54, 0.0  ;;  %828 = vmatmul.f32.gmra.mxu1 %v452_v52  ;;  %v1440_v9 = vld [vmem:[#allocation2 + $0x40] sm:$0xff]  ;;  %v3756_v54 = vld [vmem:[%s5220_s9 + $0x1d8] sm:$0xff] }
  0xf7   : > { %v1441_v0 = vld [vmem:[#allocation3 + $0x40] sm:$0xff]  ;;  %1554 = vmatpush.msrb.mxu3 %v3713_v56  ;;  %3696 = vmatmul.msk.f32.vlgmr.msrb.gmra.mxu2 %vm674_vm1, %v1380_v57  ;;  %684 = vst.msk [vmem:[#allocation2 + $0x48] sm:$0xff] %vm674_vm1, %v641_v61 }
  0xf8   : > { %932 = vst.msk [vmem:[#allocation3 + $0x48] sm:$0xff] %vm922_vm2, %v889_v58  ;;  %3709 = vmatmul.msk.f32.vlgmr.msra.gmra.mxu3 %vm922_vm2, %v1441_v0  ;;  %3711 = vmatpush.msk.msrb.mxu2 %vm979_vm0, %v3710_v63  ;;  %v3755_v57 = vld [vmem:[%s5220_s9 + $0x1d0] sm:$0xff]  ;;  %v3754_v58 = vld [vmem:[%s5220_s9 + $0x1c8] sm:$0xff] }
  0xf9   : > { %1611 = vmatpush.msra.mxu3 %v3724_v62  ;;  %v457_v62 = vld [vmem:[%s4180_s19 + $0xf0] sm:$0xff] }
  0xfa   : > { %v536_v5 = vpop.f32.mrf.mxu0 }
  0xfb   : > { %v784_v3 = vpop.f32.mrf.mxu1  ;;  %1612 = vmatpush.msra.mxu3 %v3723_v1  ;;  %v537_v7 = vadd.f32 %v4239_v59, %v536_v5 }
  0xfc   : > { %v785_v6 = vadd.f32 %v4244_v60, %v784_v3 }
  0xfd   : > { %1613 = vmatpush.msra.mxu3 %v3722_v2  ;;  %v642_v11 = vmax.f32 %v537_v7, 0.0  ;;  %583 = vmatmul.f32.gmra.mxu0 %v453_v4  ;;  %v3753_v2 = vld [vmem:[%s5220_s9 + $0x1c0] sm:$0xff]  ;;  %v3750_v7 = vld [vmem:[%s5214_s3 + $0x38] sm:$0x7] }
  0xfe   : > { %v890_v10 = vmax.f32 %v785_v6, 0.0  ;;  %831 = vmatmul.f32.gmra.mxu1 %v453_v4  ;;  %v1500_v23 = vld [vmem:[#allocation2 + $0x48] sm:$0xff]  ;;  %v3764_v6 = vld [vmem:[%s5220_s9 + $0x1f8] sm:$0xff] }
  0xff   : > { %v1501_v14 = vld [vmem:[#allocation3 + $0x48] sm:$0xff]  ;;  %1614 = vmatpush.msra.mxu3 %v3721_v8  ;;  %3704 = vmatmul.msk.f32.vlgmr.msra.gmra.mxu2 %vm674_vm1, %v1440_v9  ;;  %685 = vst.msk [vmem:[#allocation2 + $0x50] sm:$0xff] %vm674_vm1, %v642_v11  ;;  %v3763_v9 = vld [vmem:[%s5220_s9 + $0x1f0] sm:$0xff] }
 0x100   : > { %933 = vst.msk [vmem:[#allocation3 + $0x50] sm:$0xff] %vm922_vm2, %v890_v10  ;;  %3717 = vmatmul.msk.f32.vlgmr.msrb.gmra.mxu3 %vm922_vm2, %v1501_v14  ;;  %3719 = vmatpush.msk.msra.mxu2 %vm979_vm0, %v3718_v13  ;;  %v3762_v10 = vld [vmem:[%s5220_s9 + $0x1e8] sm:$0xff] }
 0x101   : > { %1671 = vmatpush.msrb.mxu3 %v3732_v12  ;;  %v458_v12 = vld [vmem:[%s4180_s19 + $0xf8] sm:$0xff] }
 0x102   : > { %v539_v19 = vpop.f32.mrf.mxu0 }
 0x103   : > { %v787_v17 = vpop.f32.mrf.mxu1  ;;  %1672 = vmatpush.msrb.mxu3 %v3731_v15  ;;  %v540_v21 = vadd.f32 %v4239_v59, %v539_v19 }
 0x104   : > { %v788_v20 = vadd.f32 %v4244_v60, %v787_v17 }
 0x105   : > { %1673 = vmatpush.msrb.mxu3 %v3730_v16  ;;  %v643_v25 = vmax.f32 %v540_v21, 0.0  ;;  %586 = vmatmul.f32.gmra.mxu0 %v454_v18  ;;  %v3761_v16 = vld [vmem:[%s5220_s9 + $0x1e0] sm:$0xff]  ;;  %v3758_v21 = vld [vmem:[%s5214_s3 + $0x3c] sm:$0x7] }
 0x106   : > { %v891_v24 = vmax.f32 %v788_v20, 0.0  ;;  %834 = vmatmul.f32.gmra.mxu1 %v454_v18  ;;  %v1560_v37 = vld [vmem:[#allocation2 + $0x50] sm:$0xff]  ;;  %v3772_v20 = vld [vmem:[%s5220_s9 + $0x218] sm:$0xff] }
 0x107   : > { %v1561_v28 = vld [vmem:[#allocation3 + $0x50] sm:$0xff]  ;;  %1674 = vmatpush.msrb.mxu3 %v3729_v22  ;;  %3712 = vmatmul.msk.f32.vlgmr.msrb.gmra.mxu2 %vm674_vm1, %v1500_v23  ;;  %686 = vst.msk [vmem:[#allocation2 + $0x58] sm:$0xff] %vm674_vm1, %v643_v25  ;;  %v3771_v23 = vld [vmem:[%s5220_s9 + $0x210] sm:$0xff] }
 0x108   : > { %934 = vst.msk [vmem:[#allocation3 + $0x58] sm:$0xff] %vm922_vm2, %v891_v24  ;;  %3725 = vmatmul.msk.f32.vlgmr.msra.gmra.mxu3 %vm922_vm2, %v1561_v28  ;;  %3727 = vmatpush.msk.msrb.mxu2 %vm979_vm0, %v3726_v27  ;;  %v3770_v24 = vld [vmem:[%s5220_s9 + $0x208] sm:$0xff] }
 0x109   : > { %1731 = vmatpush.msra.mxu3 %v3740_v26  ;;  %v459_v26 = vld [vmem:[%s4180_s19 + $0x100] sm:$0xff] }
 0x10a   : > { %v542_v33 = vpop.f32.mrf.mxu0 }
 0x10b   : > { %v790_v31 = vpop.f32.mrf.mxu1  ;;  %1732 = vmatpush.msra.mxu3 %v3739_v29  ;;  %v543_v35 = vadd.f32 %v4239_v59, %v542_v33 }
 0x10c   : > { %v791_v34 = vadd.f32 %v4244_v60, %v790_v31 }
 0x10d   : > { %1733 = vmatpush.msra.mxu3 %v3738_v30  ;;  %v644_v39 = vmax.f32 %v543_v35, 0.0  ;;  %589 = vmatmul.f32.gmra.mxu0 %v455_v32  ;;  %v3769_v30 = vld [vmem:[%s5220_s9 + $0x200] sm:$0xff] }
 0x10e   : > { %v892_v38 = vmax.f32 %v791_v34, 0.0  ;;  %837 = vmatmul.f32.gmra.mxu1 %v455_v32  ;;  %v1620_v51 = vld [vmem:[#allocation2 + $0x58] sm:$0xff]  ;;  %v3766_v35 = vld [vmem:[%s5214_s3 + $0x40] sm:$0x7] }
 0x10f   : > { %v1621_v42 = vld [vmem:[#allocation3 + $0x58] sm:$0xff]  ;;  %1734 = vmatpush.msra.mxu3 %v3737_v36  ;;  %3720 = vmatmul.msk.f32.vlgmr.msra.gmra.mxu2 %vm674_vm1, %v1560_v37  ;;  %687 = vst.msk [vmem:[#allocation2 + $0x60] sm:$0xff] %vm674_vm1, %v644_v39  ;;  %v3780_v34 = vld [vmem:[%s5220_s9 + $0x238] sm:$0xff]  ;;  %v3779_v37 = vld [vmem:[%s5220_s9 + $0x230] sm:$0xff] }
 0x110   : > { %935 = vst.msk [vmem:[#allocation3 + $0x60] sm:$0xff] %vm922_vm2, %v892_v38  ;;  %3733 = vmatmul.msk.f32.vlgmr.msrb.gmra.mxu3 %vm922_vm2, %v1621_v42  ;;  %3735 = vmatpush.msk.msra.mxu2 %vm979_vm0, %v3734_v41  ;;  %v3778_v38 = vld [vmem:[%s5220_s9 + $0x228] sm:$0xff] }
 0x111   : > { %1791 = vmatpush.msrb.mxu3 %v3748_v40  ;;  %v460_v40 = vld [vmem:[%s4180_s19 + $0x108] sm:$0xff] }
 0x112   : > { %v545_v47 = vpop.f32.mrf.mxu0 }
 0x113   : > { %v793_v45 = vpop.f32.mrf.mxu1  ;;  %1792 = vmatpush.msrb.mxu3 %v3747_v43  ;;  %v546_v49 = vadd.f32 %v4239_v59, %v545_v47 }
 0x114   : > { %v794_v48 = vadd.f32 %v4244_v60, %v793_v45 }
 0x115   : > { %1793 = vmatpush.msrb.mxu3 %v3746_v44  ;;  %v645_v53 = vmax.f32 %v546_v49, 0.0  ;;  %592 = vmatmul.f32.gmra.mxu0 %v456_v46  ;;  %v3777_v44 = vld [vmem:[%s5220_s9 + $0x220] sm:$0xff] }
 0x116   : > { %v893_v52 = vmax.f32 %v794_v48, 0.0  ;;  %840 = vmatmul.f32.gmra.mxu1 %v456_v46  ;;  %v1680_v3 = vld [vmem:[#allocation2 + $0x60] sm:$0xff]  ;;  %v3788_v48 = vld [vmem:[%s5220_s9 + $0x258] sm:$0xff] }
 0x117   : > { %v1681_v56 = vld [vmem:[#allocation3 + $0x60] sm:$0xff]  ;;  %1794 = vmatpush.msrb.mxu3 %v3745_v50  ;;  %3728 = vmatmul.msk.f32.vlgmr.msrb.gmra.mxu2 %vm674_vm1, %v1620_v51  ;;  %688 = vst.msk [vmem:[#allocation2 + $0x68] sm:$0xff] %vm674_vm1, %v645_v53  ;;  %v3774_v49 = vld [vmem:[%s5214_s3 + $0x44] sm:$0x7] }
 0x118   : > { %936 = vst.msk [vmem:[#allocation3 + $0x68] sm:$0xff] %vm922_vm2, %v893_v52  ;;  %3741 = vmatmul.msk.f32.vlgmr.msra.gmra.mxu3 %vm922_vm2, %v1681_v56  ;;  %3743 = vmatpush.msk.msrb.mxu2 %vm979_vm0, %v3742_v55  ;;  %v3787_v51 = vld [vmem:[%s5220_s9 + $0x250] sm:$0xff]  ;;  %v3786_v52 = vld [vmem:[%s5220_s9 + $0x248] sm:$0xff] }
 0x119   : > { %1851 = vmatpush.msra.mxu3 %v3756_v54  ;;  %v461_v55 = vld [vmem:[%s4180_s19 + $0x110] sm:$0xff] }
 0x11a   : > { %v548_v63 = vpop.f32.mrf.mxu0 }
 0x11b   : > { %v796_v61 = vpop.f32.mrf.mxu1  ;;  %1852 = vmatpush.msra.mxu3 %v3755_v57  ;;  %v549_v1 = vadd.f32 %v4239_v59, %v548_v63 }
 0x11c   : > { %v797_v0 = vadd.f32 %v4244_v60, %v796_v61 }
 0x11d   : > { %1853 = vmatpush.msra.mxu3 %v3754_v58  ;;  %v646_v5 = vmax.f32 %v549_v1, 0.0  ;;  %595 = vmatmul.f32.gmra.mxu0 %v457_v62  ;;  %v3785_v58 = vld [vmem:[%s5220_s9 + $0x240] sm:$0xff]  ;;  %v3782_v1 = vld [vmem:[%s5214_s3 + $0x48] sm:$0x7] }
 0x11e   : > { %v894_v4 = vmax.f32 %v797_v0, 0.0  ;;  %843 = vmatmul.f32.gmra.mxu1 %v457_v62  ;;  %v1740_v17 = vld [vmem:[#allocation2 + $0x68] sm:$0xff]  ;;  %v3796_v0 = vld [vmem:[%s5220_s9 + $0x278] sm:$0xff] }
 0x11f   : > { %v1741_v8 = vld [vmem:[#allocation3 + $0x68] sm:$0xff]  ;;  %1854 = vmatpush.msra.mxu3 %v3753_v2  ;;  %3736 = vmatmul.msk.f32.vlgmr.msra.gmra.mxu2 %vm674_vm1, %v1680_v3  ;;  %689 = vst.msk [vmem:[#allocation2 + $0x70] sm:$0xff] %vm674_vm1, %v646_v5  ;;  %v3794_v5 = vld [vmem:[%s5220_s9 + $0x268] sm:$0xff] }
 0x120   : > { %937 = vst.msk [vmem:[#allocation3 + $0x70] sm:$0xff] %vm922_vm2, %v894_v4  ;;  %3749 = vmatmul.msk.f32.vlgmr.msrb.gmra.mxu3 %vm922_vm2, %v1741_v8  ;;  %3751 = vmatpush.msk.msra.mxu2 %vm979_vm0, %v3750_v7  ;;  %v3795_v4 = vld [vmem:[%s5220_s9 + $0x270] sm:$0xff]  ;;  %v462_v8 = vld [vmem:[%s4180_s19 + $0x118] sm:$0xff] }
 0x121   : > { %1911 = vmatpush.msrb.mxu3 %v3764_v6 }
 0x122   : > { %v551_v13 = vpop.f32.mrf.mxu0 }
 0x123   : > { %v799_v11 = vpop.f32.mrf.mxu1  ;;  %1912 = vmatpush.msrb.mxu3 %v3763_v9  ;;  %v552_v15 = vadd.f32 %v4239_v59, %v551_v13  ;;  %v3793_v13 = vld [vmem:[%s5220_s9 + $0x260] sm:$0xff] }
 0x124   : > { %v800_v14 = vadd.f32 %v4244_v60, %v799_v11 }
 0x125   : > { %1913 = vmatpush.msrb.mxu3 %v3762_v10  ;;  %v647_v19 = vmax.f32 %v552_v15, 0.0  ;;  %598 = vmatmul.f32.gmra.mxu0 %v458_v12 }
 0x126   : > { %v895_v18 = vmax.f32 %v800_v14, 0.0  ;;  %846 = vmatmul.f32.gmra.mxu1 %v458_v12  ;;  %v1800_v31 = vld [vmem:[#allocation2 + $0x70] sm:$0xff] }
 0x127   : > { %v1801_v22 = vld [vmem:[#allocation3 + $0x70] sm:$0xff]  ;;  %1914 = vmatpush.msrb.mxu3 %v3761_v16  ;;  %3744 = vmatmul.msk.f32.vlgmr.msrb.gmra.mxu2 %vm674_vm1, %v1740_v17  ;;  %690 = vst.msk [vmem:[#allocation2 + $0x78] sm:$0xff] %vm674_vm1, %v647_v19  ;;  %v3804_v17 = vld [vmem:[%s5220_s9 + $0x298] sm:$0xff] }
 0x128   : > { %938 = vst.msk [vmem:[#allocation3 + $0x78] sm:$0xff] %vm922_vm2, %v895_v18  ;;  %3757 = vmatmul.msk.f32.vlgmr.msra.gmra.mxu3 %vm922_vm2, %v1801_v22  ;;  %3759 = vmatpush.msk.msrb.mxu2 %vm979_vm0, %v3758_v21  ;;  %v3790_v18 = vld [vmem:[%s5214_s3 + $0x4c] sm:$0x7]  ;;  %v3803_v21 = vld [vmem:[%s5220_s9 + $0x290] sm:$0xff] }
 0x129   : > { %1971 = vmatpush.msra.mxu3 %v3772_v20  ;;  %v3802_v22 = vld [vmem:[%s5220_s9 + $0x288] sm:$0xff] }
 0x12a   : > { %v554_v27 = vpop.f32.mrf.mxu0 }
 0x12b   : > { %v802_v25 = vpop.f32.mrf.mxu1  ;;  %1972 = vmatpush.msra.mxu3 %v3771_v23  ;;  %v555_v29 = vadd.f32 %v4239_v59, %v554_v27 }
 0x12c   : > { %v803_v28 = vadd.f32 %v4244_v60, %v802_v25  ;;  %v463_v25 = vld [vmem:[%s4180_s19 + $0x120] sm:$0xff] }
 0x12d   : > { %1973 = vmatpush.msra.mxu3 %v3770_v24  ;;  %v648_v33 = vmax.f32 %v555_v29, 0.0  ;;  %601 = vmatmul.f32.gmra.mxu0 %v459_v26 }
 0x12e   : > { %v896_v32 = vmax.f32 %v803_v28, 0.0  ;;  %849 = vmatmul.f32.gmra.mxu1 %v459_v26  ;;  %v1860_v45 = vld [vmem:[#allocation2 + $0x78] sm:$0xff] }
 0x12f   : > { %v1861_v36 = vld [vmem:[#allocation3 + $0x78] sm:$0xff]  ;;  %1974 = vmatpush.msra.mxu3 %v3769_v30  ;;  %3752 = vmatmul.msk.f32.vlgmr.msra.gmra.mxu2 %vm674_vm1, %v1800_v31  ;;  %691 = vst.msk [vmem:[#allocation2 + $0x80] sm:$0xff] %vm674_vm1, %v648_v33  ;;  %v3801_v30 = vld [vmem:[%s5220_s9 + $0x280] sm:$0xff] }
 0x130   : > { %939 = vst.msk [vmem:[#allocation3 + $0x80] sm:$0xff] %vm922_vm2, %v896_v32  ;;  %3765 = vmatmul.msk.f32.vlgmr.msrb.gmra.mxu3 %vm922_vm2, %v1861_v36  ;;  %3767 = vmatpush.msk.msra.mxu2 %vm979_vm0, %v3766_v35  ;;  %v3798_v35 = vld [vmem:[%s5214_s3 + $0x50] sm:$0x7] }
 0x131   : > { %2031 = vmatpush.msrb.mxu3 %v3780_v34 }
 0x132   : > { %v557_v41 = vpop.f32.mrf.mxu0 }
 0x133   : > { %v805_v39 = vpop.f32.mrf.mxu1  ;;  %2032 = vmatpush.msrb.mxu3 %v3779_v37  ;;  %v558_v43 = vadd.f32 %v4239_v59, %v557_v41  ;;  %v464_v41 = vld [vmem:[%s4180_s19 + $0x128] sm:$0xff] }
 0x134   : > { %v806_v42 = vadd.f32 %v4244_v60, %v805_v39 }
 0x135   : > { %2033 = vmatpush.msrb.mxu3 %v3778_v38  ;;  %v649_v47 = vmax.f32 %v558_v43, 0.0  ;;  %604 = vmatmul.f32.gmra.mxu0 %v460_v40  ;;  %v3810_v38 = vld [vmem:[%s5220_s9 + $0x2a8] sm:$0xff] }
 0x136   : > { %v897_v46 = vmax.f32 %v806_v42, 0.0  ;;  %852 = vmatmul.f32.gmra.mxu1 %v460_v40  ;;  %v1920_v61 = vld [vmem:[#allocation2 + $0x80] sm:$0xff] }
 0x137   : > { %v1921_v50 = vld [vmem:[#allocation3 + $0x80] sm:$0xff]  ;;  %2034 = vmatpush.msrb.mxu3 %v3777_v44  ;;  %3760 = vmatmul.msk.f32.vlgmr.msrb.gmra.mxu2 %vm674_vm1, %v1860_v45  ;;  %692 = vst.msk [vmem:[#allocation2 + $0x88] sm:$0xff] %vm674_vm1, %v649_v47  ;;  %v4707_v42 = vld [vmem:[%s5219_s8] ss:$0 sm:$0xff] }
 0x138   : > { %940 = vst.msk [vmem:[#allocation3 + $0x88] sm:$0xff] %vm922_vm2, %v897_v46  ;;  %3773 = vmatmul.msk.f32.vlgmr.msra.gmra.mxu3 %vm922_vm2, %v1921_v50  ;;  %3775 = vmatpush.msk.msrb.mxu2 %vm979_vm0, %v3774_v49  ;;  %v3809_v47 = vld [vmem:[%s5220_s9 + $0x2a0] sm:$0xff] }
 0x139   : > { %2091 = vmatpush.msra.mxu3 %v3788_v48  ;;  %v4716_v50 = vld [vmem:[%s5213_s2] ss:$0 sm:$0xff] }
 0x13a   : > { %v1026_v54 = vpop.f32.mrf.mxu3  ;;  %v560_v57 = vpop.f32.mrf.mxu0 }
 0x13b   : > { %v808_v53 = vpop.f32.mrf.mxu1  ;;  %2092 = vmatpush.msra.mxu3 %v3787_v51  ;;  %v561_v62 = vadd.f32 %v4239_v59, %v560_v57  ;;  %v3819_v57 = vld [vmem:[%s5220_s9 + $0x2d0] sm:$0xff] }
 0x13c   : > { %v809_v56 = vadd.f32 %v4244_v60, %v808_v53  ;;  %v3820_v53 = vld [vmem:[%s5220_s9 + $0x2d8] sm:$0xff] }
 0x13d   : > { %2093 = vmatpush.msra.mxu3 %v3786_v52  ;;  %607 = vmatmul.f32.gmra.mxu0 %v461_v55  ;;  %v650_v3 = vmax.f32 %v561_v62, 0.0 }
 0x13e   : > { %v898_v63 = vmax.f32 %v809_v56, 0.0  ;;  %855 = vmatmul.f32.gmra.mxu1 %v461_v55  ;;  %v1980_v14 = vld [vmem:[#allocation2 + $0x88] sm:$0xff] }
 0x13f   : > { %v1981_v2 = vld [vmem:[#allocation3 + $0x88] sm:$0xff]  ;;  %2094 = vmatpush.msra.mxu3 %v3785_v58  ;;  %3768 = vmatmul.msk.f32.vlgmr.msra.gmra.mxu2 %vm674_vm1, %v1920_v61  ;;  %693 = vst.msk [vmem:[#allocation2 + $0x90] sm:$0xff] %vm674_vm1, %v650_v3  ;;  %v3818_v58 = vld [vmem:[%s5220_s9 + $0x2c8] sm:$0xff] }
 0x140   : > { %941 = vst.msk [vmem:[#allocation3 + $0x90] sm:$0xff] %vm922_vm2, %v898_v63  ;;  %3781 = vmatmul.msk.f32.vlgmr.msrb.gmra.mxu3 %vm922_vm2, %v1981_v2  ;;  %3783 = vmatpush.msk.msra.mxu2 %vm979_vm0, %v3782_v1  ;;  %v465_v63 = vld [vmem:[%s4180_s19 + $0x130] sm:$0xff] }
 0x141   : > { %2151 = vmatpush.msrb.mxu3 %v3796_v0 }
 0x142   : > { %v1000_v7 = vpop.f32.mrf.mxu2  ;;  %v1077_v11 = vpop.f32.mrf.mxu3 }
 0x143   : > { %v811_v6 = vpop.f32.mrf.mxu1  ;;  %2152 = vmatpush.msrb.mxu3 %v3795_v4  ;;  %v1027_v10 = vadd.f32 %v1026_v54, %v1000_v7  ;;  %v563_v12 = vpop.f32.mrf.mxu0  ;;  %v3806_v54 = vld [vmem:[%s5214_s3 + $0x54] sm:$0x7]  ;;  %v3817_v4 = vld [vmem:[%s5220_s9 + $0x2c0] sm:$0xff] }
 0x144   : > { %v812_v9 = vadd.f32 %v4244_v60, %v811_v6  ;;  %v564_v15 = vadd.f32 %v4239_v59, %v563_v12 }
 0x145   : > { %2153 = vmatpush.msrb.mxu3 %v3794_v5  ;;  %610 = vmatmul.f32.gmra.mxu0 %v462_v8 }
 0x146   : > { %v899_v16 = vmax.f32 %v812_v9, 0.0  ;;  %858 = vmatmul.f32.gmra.mxu1 %v462_v8  ;;  %v651_v20 = vmax.f32 %v564_v15, 0.0  ;;  %v2040_v31 = vld [vmem:[#allocation2 + $0x90] sm:$0xff]  ;;  %v3828_v9 = vld [vmem:[%s5220_s9 + $0x2f8] sm:$0xff] }
 0x147   : > { %v2041_v19 = vld [vmem:[#allocation3 + $0x90] sm:$0xff]  ;;  %2154 = vmatpush.msrb.mxu3 %v3793_v13  ;;  %3776 = vmatmul.msk.f32.vlgmr.msrb.gmra.mxu2 %vm674_vm1, %v1980_v14  ;;  %v3827_v13 = vld [vmem:[%s5220_s9 + $0x2f0] sm:$0xff]  ;;  %v3826_v14 = vld [vmem:[%s5220_s9 + $0x2e8] sm:$0xff] }
 0x148   : > { %942 = vst.msk [vmem:[#allocation3 + $0x98] sm:$0xff] %vm922_vm2, %v899_v16  ;;  %3789 = vmatmul.msk.f32.vlgmr.msra.gmra.mxu3 %vm922_vm2, %v2041_v19  ;;  %3791 = vmatpush.msk.msrb.mxu2 %vm979_vm0, %v3790_v18 }
 0x149   : > { %694 = vst.msk [vmem:[#allocation2 + $0x98] sm:$0xff] %vm674_vm1, %v651_v20  ;;  %2211 = vmatpush.msra.mxu3 %v3804_v17  ;;  %v466_v17 = vld [vmem:[%s4180_s19 + $0x138] sm:$0xff] }
 0x14a   : > { %v1054_v24 = vpop.f32.mrf.mxu2 }
 0x14b   : > { %v814_v23 = vpop.f32.mrf.mxu1  ;;  %2212 = vmatpush.msra.mxu3 %v3803_v21  ;;  %v1078_v27 = vadd.f32 %v1077_v11, %v1054_v24  ;;  %v1136_v28 = vpop.f32.mrf.mxu3 }
 0x14c   : > { %v815_v26 = vadd.f32 %v4244_v60, %v814_v23  ;;  %v566_v29 = vpop.f32.mrf.mxu0  ;;  %v3812_v60 = vld [vmem:[%s5220_s9 + $0x2b8] sm:$0xff] }
 0x14d   : > { %v567_v32 = vadd.f32 %v4239_v59, %v566_v29  ;;  %2213 = vmatpush.msra.mxu3 %v3802_v22  ;;  %v1139_v34 = vadd.f32 %v1136_v28, %v1078_v27  ;;  %613 = vmatmul.f32.gmra.mxu0 %v463_v25  ;;  %v3811_v59 = vld [vmem:[%s5220_s9 + $0x2b0] sm:$0xff]  ;;  %v3825_v22 = vld [vmem:[%s5220_s9 + $0x2e0] sm:$0xff]  ;;  %v3836_v27 = vld [vmem:[%s5220_s9 + $0x318] sm:$0xff] }
 0x14e   : > { %v900_v33 = vmax.f32 %v815_v26, 0.0  ;;  %861 = vmatmul.f32.gmra.mxu1 %v463_v25  ;;  %v3822_v28 = vld [vmem:[%s5214_s3 + $0x5c] sm:$0x7] }
 0x14f   : > { %v2101_v36 = vld [vmem:[#allocation3 + $0x98] sm:$0xff]  ;;  %v652_v37 = vmax.f32 %v567_v32, 0.0  ;;  %2214 = vmatpush.msra.mxu3 %v3801_v30  ;;  %3784 = vmatmul.msk.f32.vlgmr.msra.gmra.mxu2 %vm674_vm1, %v2040_v31  ;;  %v3835_v31 = vld [vmem:[%s5220_s9 + $0x310] sm:$0xff] }
 0x150   : > { %943 = vst.msk [vmem:[#allocation3 + $0xa0] sm:$0xff] %vm922_vm2, %v900_v33  ;;  %3797 = vmatmul.msk.f32.vlgmr.msrb.gmra.mxu3 %vm922_vm2, %v2101_v36  ;;  %3799 = vmatpush.msk.msra.mxu2 %vm979_vm0, %v3798_v35  ;;  %v2100_v49 = vld [vmem:[#allocation2 + $0x98] sm:$0xff]  ;;  %v3834_v32 = vld [vmem:[%s5220_s9 + $0x308] sm:$0xff] }
 0x151   : > { %695 = vst.msk [vmem:[#allocation2 + $0xa0] sm:$0xff] %vm674_vm1, %v652_v37  ;;  %2271 = vmatpush.msrb.mxu3 %v3812_v60  ;;  %v467_v60 = vld [vmem:[%s4180_s19 + $0x140] sm:$0xff] }
 0x152   : > { %v1107_v40 = vpop.f32.mrf.mxu2 }
 0x153   : > { %v817_v39 = vpop.f32.mrf.mxu1  ;;  %2272 = vmatpush.msrb.mxu3 %v3811_v59  ;;  %v1110_v44 = vadd.f32 %v1107_v40, %v1027_v10  ;;  %v1196_v45 = vpop.f32.mrf.mxu3  ;;  %v3814_v10 = vld [vmem:[%s5214_s3 + $0x58] sm:$0x7] }
 0x154   : > { %v818_v43 = vadd.f32 %v4707_v42, %v817_v39  ;;  %v569_v46 = vpop.f32.mrf.mxu0  ;;  %v1199_v48 = vadd.f32 %v1196_v45, %v1139_v34  ;;  %v3830_v45 = vld [vmem:[%s5214_s3 + $0x60] sm:$0x7] }
 0x155   : > { %v570_v51 = vadd.f32 %v4716_v50, %v569_v46  ;;  %2273 = vmatpush.msrb.mxu3 %v3810_v38  ;;  %616 = vmatmul.f32.gmra.mxu0 %v464_v41  ;;  %v3833_v38 = vld [vmem:[%s5220_s9 + $0x300] sm:$0xff] }
 0x156   : > { %v901_v52 = vmax.f32 %v818_v43, 0.0  ;;  %864 = vmatmul.f32.gmra.mxu1 %v464_v41 }
 0x157   : > { %v2161_v55 = vld [vmem:[#allocation3 + $0xa0] sm:$0xff]  ;;  %v653_v56 = vmax.f32 %v570_v51, 0.0  ;;  %2274 = vmatpush.msrb.mxu3 %v3809_v47  ;;  %3792 = vmatmul.msk.f32.vlgmr.msrb.gmra.mxu2 %vm674_vm1, %v2100_v49  ;;  %v3842_v49 = vld [vmem:[%s5220_s9 + $0x328] sm:$0xff] }
 0x158   : > { %944 = vst.msk [vmem:[#allocation3 + $0xa8] sm:$0xff] %vm922_vm2, %v901_v52  ;;  %3805 = vmatmul.msk.f32.vlgmr.msra.gmra.mxu3 %vm922_vm2, %v2161_v55  ;;  %3807 = vmatpush.msk.msrb.mxu2 %vm979_vm0, %v3806_v54  ;;  %v2160_v6 = vld [vmem:[#allocation2 + $0xa0] sm:$0xff] }
 0x159   : > { %696 = vst.msk [vmem:[#allocation2 + $0xa8] sm:$0xff] %vm674_vm1, %v653_v56  ;;  %2331 = vmatpush.msra.mxu3 %v3820_v53  ;;  %v468_v53 = vld [vmem:[%s4180_s19 + $0x148] sm:$0xff] }
 0x15a   : > { %v1167_v62 = vpop.f32.mrf.mxu2 }
 0x15b   : > { %v820_v61 = vpop.f32.mrf.mxu1  ;;  %2332 = vmatpush.msra.mxu3 %v3819_v57  ;;  %v1170_v1 = vadd.f32 %v1167_v62, %v1110_v44  ;;  %v1256_v2 = vpop.f32.mrf.mxu3  ;;  %v3844_v44 = vld [vmem:[%s5220_s9 + $0x338] sm:$0xff] }
 0x15c   : > { %v821_v0 = vadd.f32 %v4707_v42, %v820_v61  ;;  %v572_v3 = vpop.f32.mrf.mxu0  ;;  %v1259_v5 = vadd.f32 %v1256_v2, %v1199_v48  ;;  %v3843_v48 = vld [vmem:[%s5220_s9 + $0x330] sm:$0xff]  ;;  %v3838_v2 = vld [vmem:[%s5214_s3 + $0x64] sm:$0x7] }
 0x15d   : > { %v573_v7 = vadd.f32 %v4716_v50, %v572_v3  ;;  %2333 = vmatpush.msra.mxu3 %v3818_v58  ;;  %619 = vmatmul.f32.gmra.mxu0 %v465_v63  ;;  %v3841_v58 = vld [vmem:[%s5220_s9 + $0x320] sm:$0xff] }
 0x15e   : > { %v902_v8 = vmax.f32 %v821_v0, 0.0  ;;  %867 = vmatmul.f32.gmra.mxu1 %v465_v63 }
 0x15f   : > { %v2221_v11 = vld [vmem:[#allocation3 + $0xa8] sm:$0xff]  ;;  %v654_v12 = vmax.f32 %v573_v7, 0.0  ;;  %2334 = vmatpush.msra.mxu3 %v3817_v4  ;;  %3800 = vmatmul.msk.f32.vlgmr.msra.gmra.mxu2 %vm674_vm1, %v2160_v6  ;;  %v3850_v6 = vld [vmem:[%s5220_s9 + $0x348] sm:$0xff] }
 0x160   : > { %945 = vst.msk [vmem:[#allocation3 + $0xb0] sm:$0xff] %vm922_vm2, %v902_v8  ;;  %3813 = vmatmul.msk.f32.vlgmr.msrb.gmra.mxu3 %vm922_vm2, %v2221_v11  ;;  %3815 = vmatpush.msk.msra.mxu2 %vm979_vm0, %v3814_v10  ;;  %v2220_v24 = vld [vmem:[#allocation2 + $0xa8] sm:$0xff] }
 0x161   : > { %697 = vst.msk [vmem:[#allocation2 + $0xb0] sm:$0xff] %vm674_vm1, %v654_v12  ;;  %2391 = vmatpush.msrb.mxu3 %v3828_v9 }
 0x162   : > { %v1227_v16 = vpop.f32.mrf.mxu2 }
 0x163   : > { %v823_v15 = vpop.f32.mrf.mxu1  ;;  %2392 = vmatpush.msrb.mxu3 %v3827_v13  ;;  %v1230_v19 = vadd.f32 %v1227_v16, %v1170_v1  ;;  %v1316_v20 = vpop.f32.mrf.mxu3  ;;  %v3852_v1 = vld [vmem:[%s5220_s9 + $0x358] sm:$0xff]  ;;  %v3849_v13 = vld [vmem:[%s5220_s9 + $0x340] sm:$0xff] }
 0x164   : > { %v824_v18 = vadd.f32 %v4707_v42, %v823_v15  ;;  %v575_v21 = vpop.f32.mrf.mxu0  ;;  %v1319_v23 = vadd.f32 %v1316_v20, %v1259_v5  ;;  %v3851_v5 = vld [vmem:[%s5220_s9 + $0x350] sm:$0xff] }
 0x165   : > { %v576_v25 = vadd.f32 %v4716_v50, %v575_v21  ;;  %2393 = vmatpush.msrb.mxu3 %v3826_v14  ;;  %622 = vmatmul.f32.gmra.mxu0 %v466_v17 }
 0x166   : > { %v903_v26 = vmax.f32 %v824_v18, 0.0  ;;  %870 = vmatmul.f32.gmra.mxu1 %v466_v17  ;;  %v3860_v18 = vld [vmem:[%s5220_s9 + $0x378] sm:$0xff] }
 0x167   : > { %v2281_v29 = vld [vmem:[#allocation3 + $0xb0] sm:$0xff]  ;;  %v655_v30 = vmax.f32 %v576_v25, 0.0  ;;  %2394 = vmatpush.msrb.mxu3 %v3825_v22  ;;  %3808 = vmatmul.msk.f32.vlgmr.msrb.gmra.mxu2 %vm674_vm1, %v2220_v24  ;;  %v3859_v22 = vld [vmem:[%s5220_s9 + $0x370] sm:$0xff] }
 0x168   : > { %946 = vst.msk [vmem:[#allocation3 + $0xb8] sm:$0xff] %vm922_vm2, %v903_v26  ;;  %3821 = vmatmul.msk.f32.vlgmr.msra.gmra.mxu3 %vm922_vm2, %v2281_v29  ;;  %3823 = vmatpush.msk.msrb.mxu2 %vm979_vm0, %v3822_v28  ;;  %v2280_v40 = vld [vmem:[#allocation2 + $0xb0] sm:$0xff] }
 0x169   : > { %698 = vst.msk [vmem:[#allocation2 + $0xb8] sm:$0xff] %vm674_vm1, %v655_v30  ;;  %2451 = vmatpush.msra.mxu3 %v3836_v27  ;;  %v3857_v30 = vld [vmem:[%s5220_s9 + $0x360] sm:$0xff] }
 0x16a   : > { %v1287_v34 = vpop.f32.mrf.mxu2 }
 0x16b   : > { %v826_v33 = vpop.f32.mrf.mxu1  ;;  %2452 = vmatpush.msra.mxu3 %v3835_v31  ;;  %v1290_v36 = vadd.f32 %v1287_v34, %v1230_v19  ;;  %v1376_v37 = vpop.f32.mrf.mxu3  ;;  %v3846_v19 = vld [vmem:[%s5214_s3 + $0x68] sm:$0x7] }
 0x16c   : > { %v827_v35 = vadd.f32 %v4707_v42, %v826_v33  ;;  %v578_v59 = vpop.f32.mrf.mxu0  ;;  %v1379_v39 = vadd.f32 %v1376_v37, %v1319_v23  ;;  %v3858_v23 = vld [vmem:[%s5220_s9 + $0x368] sm:$0xff] }
 0x16d   : > { %v579_v41 = vadd.f32 %v4716_v50, %v578_v59  ;;  %2453 = vmatpush.msra.mxu3 %v3834_v32  ;;  %625 = vmatmul.f32.gmra.mxu0 %v467_v60  ;;  %v3867_v59 = vld [vmem:[%s5220_s9 + $0x390] sm:$0xff] }
 0x16e   : > { %v904_v43 = vmax.f32 %v827_v35, 0.0  ;;  %873 = vmatmul.f32.gmra.mxu1 %v467_v60  ;;  %v3868_v60 = vld [vmem:[%s5220_s9 + $0x398] sm:$0xff]  ;;  %v3854_v35 = vld [vmem:[%s5214_s3 + $0x6c] sm:$0x7] }
 0x16f   : > { %v2341_v46 = vld [vmem:[#allocation3 + $0xb8] sm:$0xff]  ;;  %v656_v47 = vmax.f32 %v579_v41, 0.0  ;;  %2454 = vmatpush.msra.mxu3 %v3833_v38  ;;  %3816 = vmatmul.msk.f32.vlgmr.msra.gmra.mxu2 %vm674_vm1, %v2280_v40 }
 0x170   : > { %947 = vst.msk [vmem:[#allocation3 + $0xc0] sm:$0xff] %vm922_vm2, %v904_v43  ;;  %3829 = vmatmul.msk.f32.vlgmr.msrb.gmra.mxu3 %vm922_vm2, %v2341_v46  ;;  %3831 = vmatpush.msk.msra.mxu2 %vm979_vm0, %v3830_v45  ;;  %v2340_v62 = vld [vmem:[#allocation2 + $0xb8] sm:$0xff]  ;;  %v3866_v38 = vld [vmem:[%s5220_s9 + $0x388] sm:$0xff]  ;;  %v3865_v46 = vld [vmem:[%s5220_s9 + $0x380] sm:$0xff] }
 0x171   : > { %699 = vst.msk [vmem:[#allocation2 + $0xc0] sm:$0xff] %vm674_vm1, %v656_v47  ;;  %2511 = vmatpush.msrb.mxu3 %v3844_v44 }
 0x172   : > { %v1347_v52 = vpop.f32.mrf.mxu2 }
 0x173   : > { %v829_v51 = vpop.f32.mrf.mxu1  ;;  %2512 = vmatpush.msrb.mxu3 %v3843_v48  ;;  %v1350_v55 = vadd.f32 %v1347_v52, %v1290_v36  ;;  %v1436_v56 = vpop.f32.mrf.mxu3  ;;  %v3876_v52 = vld [vmem:[%s5220_s9 + $0x3b8] sm:$0xff] }
 0x174   : > { %v830_v54 = vadd.f32 %v4707_v42, %v829_v51  ;;  %v581_v57 = vpop.f32.mrf.mxu0  ;;  %v1439_v61 = vadd.f32 %v1436_v56, %v1379_v39  ;;  %v3875_v56 = vld [vmem:[%s5220_s9 + $0x3b0] sm:$0xff] }
 0x175   : > { %v582_v63 = vadd.f32 %v4716_v50, %v581_v57  ;;  %2513 = vmatpush.msrb.mxu3 %v3842_v49  ;;  %628 = vmatmul.f32.gmra.mxu0 %v468_v53  ;;  %v3874_v57 = vld [vmem:[%s5220_s9 + $0x3a8] sm:$0xff] }
 0x176   : > { %v905_v0 = vmax.f32 %v830_v54, 0.0  ;;  %876 = vmatmul.f32.gmra.mxu1 %v468_v53  ;;  %v3862_v53 = vld [vmem:[%s5214_s3 + $0x70] sm:$0x7] }
 0x177   : > { %v2401_v3 = vld [vmem:[#allocation3 + $0xc0] sm:$0xff]  ;;  %v657_v4 = vmax.f32 %v582_v63, 0.0  ;;  %2514 = vmatpush.msrb.mxu3 %v3841_v58  ;;  %3824 = vmatmul.msk.f32.vlgmr.msrb.gmra.mxu2 %vm674_vm1, %v2340_v62 }
 0x178   : > { %948 = vst.msk [vmem:[#allocation3 + $0xc8] sm:$0xff] %vm922_vm2, %v905_v0  ;;  %3837 = vmatmul.msk.f32.vlgmr.msra.gmra.mxu3 %vm922_vm2, %v2401_v3  ;;  %3839 = vmatpush.msk.msrb.mxu2 %vm979_vm0, %v3838_v2  ;;  %v2400_v15 = vld [vmem:[#allocation2 + $0xc0] sm:$0xff] }
 0x179   : > { %700 = vst.msk [vmem:[#allocation2 + $0xc8] sm:$0xff] %vm674_vm1, %v657_v4  ;;  %2571 = vmatpush.msra.mxu3 %v3852_v1  ;;  %v3873_v2 = vld [vmem:[%s5220_s9 + $0x3a0] sm:$0xff] }
 0x17a   : > { %v1407_v8 = vpop.f32.mrf.mxu2 }
 0x17b   : > { %v832_v7 = vpop.f32.mrf.mxu1  ;;  %2572 = vmatpush.msra.mxu3 %v3851_v5  ;;  %v1410_v10 = vadd.f32 %v1407_v8, %v1350_v55  ;;  %v1496_v11 = vpop.f32.mrf.mxu3  ;;  %v3870_v8 = vld [vmem:[%s5214_s3 + $0x74] sm:$0x7] }
 0x17c   : > { %v833_v9 = vadd.f32 %v4707_v42, %v832_v7  ;;  %v584_v12 = vpop.f32.mrf.mxu0  ;;  %v1499_v14 = vadd.f32 %v1496_v11, %v1439_v61  ;;  %v3884_v7 = vld [vmem:[%s5220_s9 + $0x3d8] sm:$0xff]  ;;  %v3883_v11 = vld [vmem:[%s5220_s9 + $0x3d0] sm:$0xff] }
 0x17d   : > { %v585_v16 = vadd.f32 %v4716_v50, %v584_v12  ;;  %2573 = vmatpush.msra.mxu3 %v3850_v6  ;;  %v3882_v12 = vld [vmem:[%s5220_s9 + $0x3c8] sm:$0xff] }
 0x17e   : > { %v906_v17 = vmax.f32 %v833_v9, 0.0 }
 0x17f   : > { %v2461_v20 = vld [vmem:[#allocation3 + $0xc8] sm:$0xff]  ;;  %v658_v21 = vmax.f32 %v585_v16, 0.0  ;;  %2574 = vmatpush.msra.mxu3 %v3849_v13  ;;  %3832 = vmatmul.msk.f32.vlgmr.msra.gmra.mxu2 %vm674_vm1, %v2400_v15 }
 0x180   : > { %949 = vst.msk [vmem:[#allocation3 + $0xd0] sm:$0xff] %vm922_vm2, %v906_v17  ;;  %3845 = vmatmul.msk.f32.vlgmr.msrb.gmra.mxu3 %vm922_vm2, %v2461_v20  ;;  %3847 = vmatpush.msk.msra.mxu2 %vm979_vm0, %v3846_v19  ;;  %v2460_v32 = vld [vmem:[#allocation2 + $0xc8] sm:$0xff]  ;;  %v3881_v19 = vld [vmem:[%s5220_s9 + $0x3c0] sm:$0xff] }
 0x181   : > { %701 = vst.msk [vmem:[#allocation2 + $0xd0] sm:$0xff] %vm674_vm1, %v658_v21  ;;  %2631 = vmatpush.msrb.mxu3 %v3860_v18 }
 0x182   : > { %v1467_v25 = vpop.f32.mrf.mxu2 }
 0x183   : > { %v835_v24 = vpop.f32.mrf.mxu1  ;;  %2632 = vmatpush.msrb.mxu3 %v3859_v22  ;;  %v1470_v27 = vadd.f32 %v1467_v25, %v1410_v10  ;;  %v1556_v28 = vpop.f32.mrf.mxu3  ;;  %v3878_v25 = vld [vmem:[%s5214_s3 + $0x78] sm:$0x7] }
 0x184   : > { %v836_v26 = vadd.f32 %v4707_v42, %v835_v24  ;;  %v587_v29 = vpop.f32.mrf.mxu0  ;;  %v1559_v31 = vadd.f32 %v1556_v28, %v1499_v14  ;;  %v3892_v24 = vld [vmem:[%s5220_s9 + $0x3f8] sm:$0xff]  ;;  %v3891_v28 = vld [vmem:[%s5220_s9 + $0x3f0] sm:$0xff] }
 0x185   : > { %v588_v33 = vadd.f32 %v4716_v50, %v587_v29  ;;  %2633 = vmatpush.msrb.mxu3 %v3858_v23  ;;  %v3890_v29 = vld [vmem:[%s5220_s9 + $0x3e8] sm:$0xff] }
 0x186   : > { %v907_v34 = vmax.f32 %v836_v26, 0.0 }
 0x187   : > { %v2521_v36 = vld [vmem:[#allocation3 + $0xd0] sm:$0xff]  ;;  %v659_v37 = vmax.f32 %v588_v33, 0.0  ;;  %2634 = vmatpush.msrb.mxu3 %v3857_v30  ;;  %3840 = vmatmul.msk.f32.vlgmr.msrb.gmra.mxu2 %vm674_vm1, %v2460_v32 }
 0x188   : > { %950 = vst.msk [vmem:[#allocation3 + $0xd8] sm:$0xff] %vm922_vm2, %v907_v34  ;;  %3853 = vmatmul.msk.f32.vlgmr.msra.gmra.mxu3 %vm922_vm2, %v2521_v36  ;;  %3855 = vmatpush.msk.msrb.mxu2 %vm979_vm0, %v3854_v35  ;;  %v2520_v48 = vld [vmem:[#allocation2 + $0xd0] sm:$0xff]  ;;  %v3889_v35 = vld [vmem:[%s5220_s9 + $0x3e0] sm:$0xff] }
 0x189   : > { %702 = vst.msk [vmem:[#allocation2 + $0xd8] sm:$0xff] %vm674_vm1, %v659_v37  ;;  %2691 = vmatpush.msra.mxu3 %v3868_v60 }
 0x18a   : > { %v1527_v40 = vpop.f32.mrf.mxu2 }
 0x18b   : > { %v838_v39 = vpop.f32.mrf.mxu1  ;;  %2692 = vmatpush.msra.mxu3 %v3867_v59  ;;  %v1530_v43 = vadd.f32 %v1527_v40, %v1470_v27  ;;  %v1616_v44 = vpop.f32.mrf.mxu3  ;;  %v3886_v40 = vld [vmem:[%s5214_s3 + $0x7c] sm:$0x7] }
 0x18c   : > { %v839_v41 = vadd.f32 %v4707_v42, %v838_v39  ;;  %v590_v45 = vpop.f32.mrf.mxu0  ;;  %v1619_v47 = vadd.f32 %v1616_v44, %v1559_v31  ;;  %v3900_v39 = vld [vmem:[%s5220_s9 + $0x418] sm:$0xff]  ;;  %v3899_v44 = vld [vmem:[%s5220_s9 + $0x410] sm:$0xff] }
 0x18d   : > { %v591_v49 = vadd.f32 %v4716_v50, %v590_v45  ;;  %2693 = vmatpush.msra.mxu3 %v3866_v38  ;;  %v3898_v45 = vld [vmem:[%s5220_s9 + $0x408] sm:$0xff] }
 0x18e   : > { %v908_v51 = vmax.f32 %v839_v41, 0.0 }
 0x18f   : > { %v2581_v54 = vld [vmem:[#allocation3 + $0xd8] sm:$0xff]  ;;  %v660_v55 = vmax.f32 %v591_v49, 0.0  ;;  %2694 = vmatpush.msra.mxu3 %v3865_v46  ;;  %3848 = vmatmul.msk.f32.vlgmr.msra.gmra.mxu2 %vm674_vm1, %v2520_v48 }
 0x190   : > { %951 = vst.msk [vmem:[#allocation3 + $0xe0] sm:$0xff] %vm922_vm2, %v908_v51  ;;  %3861 = vmatmul.msk.f32.vlgmr.msrb.gmra.mxu3 %vm922_vm2, %v2581_v54  ;;  %3863 = vmatpush.msk.msra.mxu2 %vm979_vm0, %v3862_v53  ;;  %v2580_v4 = vld [vmem:[#allocation2 + $0xd8] sm:$0xff]  ;;  %v3897_v53 = vld [vmem:[%s5220_s9 + $0x400] sm:$0xff] }
 0x191   : > { %703 = vst.msk [vmem:[#allocation2 + $0xe0] sm:$0xff] %vm674_vm1, %v660_v55  ;;  %2751 = vmatpush.msrb.mxu3 %v3876_v52 }
 0x192   : > { %v1587_v61 = vpop.f32.mrf.mxu2 }
 0x193   : > { %v841_v58 = vpop.f32.mrf.mxu1  ;;  %2752 = vmatpush.msrb.mxu3 %v3875_v56  ;;  %v1590_v63 = vadd.f32 %v1587_v61, %v1530_v43  ;;  %v1676_v0 = vpop.f32.mrf.mxu3  ;;  %v3894_v61 = vld [vmem:[%s5214_s3 + $0x80] sm:$0x7] }
 0x194   : > { %v842_v62 = vadd.f32 %v4707_v42, %v841_v58  ;;  %v593_v1 = vpop.f32.mrf.mxu0  ;;  %v1679_v3 = vadd.f32 %v1676_v0, %v1619_v47  ;;  %v3908_v58 = vld [vmem:[%s5220_s9 + $0x438] sm:$0xff]  ;;  %v3907_v0 = vld [vmem:[%s5220_s9 + $0x430] sm:$0xff] }
 0x195   : > { %v594_v5 = vadd.f32 %v4716_v50, %v593_v1  ;;  %2753 = vmatpush.msrb.mxu3 %v3874_v57  ;;  %v3906_v1 = vld [vmem:[%s5220_s9 + $0x428] sm:$0xff] }
 0x196   : > { %v909_v6 = vmax.f32 %v842_v62, 0.0 }
 0x197   : > { %v2641_v9 = vld [vmem:[#allocation3 + $0xe0] sm:$0xff]  ;;  %v661_v10 = vmax.f32 %v594_v5, 0.0  ;;  %2754 = vmatpush.msrb.mxu3 %v3873_v2  ;;  %3856 = vmatmul.msk.f32.vlgmr.msrb.gmra.mxu2 %vm674_vm1, %v2580_v4 }
 0x198   : > { %952 = vst.msk [vmem:[#allocation3 + $0xe8] sm:$0xff] %vm922_vm2, %v909_v6  ;;  %3869 = vmatmul.msk.f32.vlgmr.msra.gmra.mxu3 %vm922_vm2, %v2641_v9  ;;  %3871 = vmatpush.msk.msrb.mxu2 %vm979_vm0, %v3870_v8  ;;  %v2640_v21 = vld [vmem:[#allocation2 + $0xe0] sm:$0xff] }
 0x199   : > { %704 = vst.msk [vmem:[#allocation2 + $0xe8] sm:$0xff] %vm674_vm1, %v661_v10  ;;  %2811 = vmatpush.msra.mxu3 %v3884_v7  ;;  %v3905_v8 = vld [vmem:[%s5220_s9 + $0x420] sm:$0xff] }
 0x19a   : > { %v1647_v14 = vpop.f32.mrf.mxu2 }
 0x19b   : > { %v844_v13 = vpop.f32.mrf.mxu1  ;;  %2812 = vmatpush.msra.mxu3 %v3883_v11  ;;  %v1650_v16 = vadd.f32 %v1647_v14, %v1590_v63  ;;  %v1736_v17 = vpop.f32.mrf.mxu3  ;;  %v3902_v14 = vld [vmem:[%s5214_s3 + $0x84] sm:$0x7] }
 0x19c   : > { %v845_v15 = vadd.f32 %v4707_v42, %v844_v13  ;;  %v596_v18 = vpop.f32.mrf.mxu0  ;;  %v1739_v20 = vadd.f32 %v1736_v17, %v1679_v3  ;;  %v3916_v13 = vld [vmem:[%s5220_s9 + $0x458] sm:$0xff]  ;;  %v3915_v17 = vld [vmem:[%s5220_s9 + $0x450] sm:$0xff] }
 0x19d   : > { %v597_v22 = vadd.f32 %v4716_v50, %v596_v18  ;;  %2813 = vmatpush.msra.mxu3 %v3882_v12  ;;  %v3914_v18 = vld [vmem:[%s5220_s9 + $0x448] sm:$0xff] }
 0x19e   : > { %v910_v23 = vmax.f32 %v845_v15, 0.0 }
 0x19f   : > { %v2701_v26 = vld [vmem:[#allocation3 + $0xe8] sm:$0xff]  ;;  %v662_v27 = vmax.f32 %v597_v22, 0.0  ;;  %2814 = vmatpush.msra.mxu3 %v3881_v19  ;;  %3864 = vmatmul.msk.f32.vlgmr.msra.gmra.mxu2 %vm674_vm1, %v2640_v21 }
 0x1a0   : > { %953 = vst.msk [vmem:[#allocation3 + $0xf0] sm:$0xff] %vm922_vm2, %v910_v23  ;;  %3877 = vmatmul.msk.f32.vlgmr.msrb.gmra.mxu3 %vm922_vm2, %v2701_v26  ;;  %3879 = vmatpush.msk.msra.mxu2 %vm979_vm0, %v3878_v25  ;;  %v2700_v37 = vld [vmem:[#allocation2 + $0xe8] sm:$0xff]  ;;  %v3913_v25 = vld [vmem:[%s5220_s9 + $0x440] sm:$0xff] }
 0x1a1   : > { %705 = vst.msk [vmem:[#allocation2 + $0xf0] sm:$0xff] %vm674_vm1, %v662_v27  ;;  %2871 = vmatpush.msrb.mxu3 %v3892_v24 }
 0x1a2   : > { %v1707_v31 = vpop.f32.mrf.mxu2 }
 0x1a3   : > { %v847_v30 = vpop.f32.mrf.mxu1  ;;  %2872 = vmatpush.msrb.mxu3 %v3891_v28  ;;  %v1710_v33 = vadd.f32 %v1707_v31, %v1650_v16  ;;  %v1796_v34 = vpop.f32.mrf.mxu3  ;;  %v3910_v31 = vld [vmem:[%s5214_s3 + $0x88] sm:$0x7] }
 0x1a4   : > { %v848_v32 = vadd.f32 %v4707_v42, %v847_v30  ;;  %v599_v60 = vpop.f32.mrf.mxu0  ;;  %v1799_v36 = vadd.f32 %v1796_v34, %v1739_v20  ;;  %v3924_v30 = vld [vmem:[%s5220_s9 + $0x478] sm:$0xff]  ;;  %v3923_v34 = vld [vmem:[%s5220_s9 + $0x470] sm:$0xff] }
 0x1a5   : > { %v600_v59 = vadd.f32 %v4716_v50, %v599_v60  ;;  %2873 = vmatpush.msrb.mxu3 %v3890_v29  ;;  %v3922_v60 = vld [vmem:[%s5220_s9 + $0x468] sm:$0xff] }
 0x1a6   : > { %v911_v38 = vmax.f32 %v848_v32, 0.0 }
 0x1a7   : > { %v2761_v41 = vld [vmem:[#allocation3 + $0xf0] sm:$0xff]  ;;  %v663_v43 = vmax.f32 %v600_v59, 0.0  ;;  %2874 = vmatpush.msrb.mxu3 %v3889_v35  ;;  %3872 = vmatmul.msk.f32.vlgmr.msrb.gmra.mxu2 %vm674_vm1, %v2700_v37 }
 0x1a8   : > { %954 = vst.msk [vmem:[#allocation3 + $0xf8] sm:$0xff] %vm922_vm2, %v911_v38  ;;  %3885 = vmatmul.msk.f32.vlgmr.msra.gmra.mxu3 %vm922_vm2, %v2761_v41  ;;  %3887 = vmatpush.msk.msrb.mxu2 %vm979_vm0, %v3886_v40  ;;  %v2760_v55 = vld [vmem:[#allocation2 + $0xf0] sm:$0xff]  ;;  %v3921_v40 = vld [vmem:[%s5220_s9 + $0x460] sm:$0xff] }
 0x1a9   : > { %706 = vst.msk [vmem:[#allocation2 + $0xf8] sm:$0xff] %vm674_vm1, %v663_v43  ;;  %2931 = vmatpush.msra.mxu3 %v3900_v39 }
 0x1aa   : > { %v1767_v47 = vpop.f32.mrf.mxu2 }
 0x1ab   : > { %v850_v46 = vpop.f32.mrf.mxu1  ;;  %2932 = vmatpush.msra.mxu3 %v3899_v44  ;;  %v1770_v49 = vadd.f32 %v1767_v47, %v1710_v33  ;;  %v1856_v51 = vpop.f32.mrf.mxu3  ;;  %v3918_v47 = vld [vmem:[%s5214_s3 + $0x8c] sm:$0x7] }
 0x1ac   : > { %v851_v48 = vadd.f32 %v4707_v42, %v850_v46  ;;  %v602_v52 = vpop.f32.mrf.mxu0  ;;  %v1859_v54 = vadd.f32 %v1856_v51, %v1799_v36  ;;  %v3932_v46 = vld [vmem:[%s5220_s9 + $0x498] sm:$0xff]  ;;  %v3931_v51 = vld [vmem:[%s5220_s9 + $0x490] sm:$0xff] }
 0x1ad   : > { %v603_v56 = vadd.f32 %v4716_v50, %v602_v52  ;;  %2933 = vmatpush.msra.mxu3 %v3898_v45  ;;  %v3930_v52 = vld [vmem:[%s5220_s9 + $0x488] sm:$0xff] }
 0x1ae   : > { %v912_v57 = vmax.f32 %v851_v48, 0.0 }
 0x1af   : > { %v2821_v62 = vld [vmem:[#allocation3 + $0xf8] sm:$0xff]  ;;  %v664_v63 = vmax.f32 %v603_v56, 0.0  ;;  %2934 = vmatpush.msra.mxu3 %v3897_v53  ;;  %3880 = vmatmul.msk.f32.vlgmr.msra.gmra.mxu2 %vm674_vm1, %v2760_v55 }
 0x1b0   : > { %955 = vst.msk [vmem:[#allocation3 + $0x100] sm:$0xff] %vm922_vm2, %v912_v57  ;;  %3893 = vmatmul.msk.f32.vlgmr.msrb.gmra.mxu3 %vm922_vm2, %v2821_v62  ;;  %3895 = vmatpush.msk.msra.mxu2 %vm979_vm0, %v3894_v61  ;;  %v2820_v10 = vld [vmem:[#allocation2 + $0xf8] sm:$0xff]  ;;  %v3929_v61 = vld [vmem:[%s5220_s9 + $0x480] sm:$0xff] }
 0x1b1   : > { %707 = vst.msk [vmem:[#allocation2 + $0x100] sm:$0xff] %vm674_vm1, %v664_v63  ;;  %2991 = vmatpush.msrb.mxu3 %v3908_v58 }
 0x1b2   : > { %v1827_v3 = vpop.f32.mrf.mxu2 }
 0x1b3   : > { %v853_v2 = vpop.f32.mrf.mxu1  ;;  %2992 = vmatpush.msrb.mxu3 %v3907_v0  ;;  %v1830_v5 = vadd.f32 %v1827_v3, %v1770_v49  ;;  %v1916_v6 = vpop.f32.mrf.mxu3  ;;  %v3926_v3 = vld [vmem:[%s5214_s3 + $0x90] sm:$0x7] }
 0x1b4   : > { %v854_v4 = vadd.f32 %v4707_v42, %v853_v2  ;;  %v605_v7 = vpop.f32.mrf.mxu0  ;;  %v1919_v9 = vadd.f32 %v1916_v6, %v1859_v54  ;;  %v3940_v2 = vld [vmem:[%s5220_s9 + $0x4b8] sm:$0xff]  ;;  %v3939_v6 = vld [vmem:[%s5220_s9 + $0x4b0] sm:$0xff] }
 0x1b5   : > { %v606_v11 = vadd.f32 %v4716_v50, %v605_v7  ;;  %2993 = vmatpush.msrb.mxu3 %v3906_v1  ;;  %v3938_v7 = vld [vmem:[%s5220_s9 + $0x4a8] sm:$0xff] }
 0x1b6   : > { %v913_v12 = vmax.f32 %v854_v4, 0.0 }
 0x1b7   : > { %v2881_v15 = vld [vmem:[#allocation3 + $0x100] sm:$0xff]  ;;  %v665_v16 = vmax.f32 %v606_v11, 0.0  ;;  %2994 = vmatpush.msrb.mxu3 %v3905_v8  ;;  %3888 = vmatmul.msk.f32.vlgmr.msrb.gmra.mxu2 %vm674_vm1, %v2820_v10 }
 0x1b8   : > { %956 = vst.msk [vmem:[#allocation3 + $0x108] sm:$0xff] %vm922_vm2, %v913_v12  ;;  %3901 = vmatmul.msk.f32.vlgmr.msra.gmra.mxu3 %vm922_vm2, %v2881_v15  ;;  %3903 = vmatpush.msk.msrb.mxu2 %vm979_vm0, %v3902_v14  ;;  %v2880_v27 = vld [vmem:[#allocation2 + $0x100] sm:$0xff] }
 0x1b9   : > { %708 = vst.msk [vmem:[#allocation2 + $0x108] sm:$0xff] %vm674_vm1, %v665_v16  ;;  %3051 = vmatpush.msra.mxu3 %v3916_v13  ;;  %v3937_v13 = vld [vmem:[%s5220_s9 + $0x4a0] sm:$0xff] }
 0x1ba   : > { %v1887_v20 = vpop.f32.mrf.mxu2 }
 0x1bb   : > { %v856_v19 = vpop.f32.mrf.mxu1  ;;  %3052 = vmatpush.msra.mxu3 %v3915_v17  ;;  %v1890_v22 = vadd.f32 %v1887_v20, %v1830_v5  ;;  %v1976_v23 = vpop.f32.mrf.mxu3 }
 0x1bc   : > { %v857_v21 = vadd.f32 %v4707_v42, %v856_v19  ;;  %v608_v24 = vpop.f32.mrf.mxu0  ;;  %v1979_v26 = vadd.f32 %v1976_v23, %v1919_v9  ;;  %v3934_v19 = vld [vmem:[%s5214_s3 + $0x94] sm:$0x7] }
 0x1bd   : > { %v609_v28 = vadd.f32 %v4716_v50, %v608_v24  ;;  %3053 = vmatpush.msra.mxu3 %v3914_v18  ;;  %v3948_v18 = vld [vmem:[%s5220_s9 + $0x4d8] sm:$0xff]  ;;  %v3946_v24 = vld [vmem:[%s5220_s9 + $0x4c8] sm:$0xff] }
 0x1be   : > { %v914_v29 = vmax.f32 %v857_v21, 0.0 }
 0x1bf   : > { %v2941_v32 = vld [vmem:[#allocation3 + $0x108] sm:$0xff]  ;;  %v666_v33 = vmax.f32 %v609_v28, 0.0  ;;  %3054 = vmatpush.msra.mxu3 %v3913_v25  ;;  %3896 = vmatmul.msk.f32.vlgmr.msra.gmra.mxu2 %vm674_vm1, %v2880_v27 }
 0x1c0   : > { %957 = vst.msk [vmem:[#allocation3 + $0x110] sm:$0xff] %vm922_vm2, %v914_v29  ;;  %3909 = vmatmul.msk.f32.vlgmr.msrb.gmra.mxu3 %vm922_vm2, %v2941_v32  ;;  %3911 = vmatpush.msk.msra.mxu2 %vm979_vm0, %v3910_v31  ;;  %v2940_v43 = vld [vmem:[#allocation2 + $0x108] sm:$0xff]  ;;  %v3945_v31 = vld [vmem:[%s5220_s9 + $0x4c0] sm:$0xff] }
 0x1c1   : > { %709 = vst.msk [vmem:[#allocation2 + $0x110] sm:$0xff] %vm674_vm1, %v666_v33  ;;  %3111 = vmatpush.msrb.mxu3 %v3924_v30 }
 0x1c2   : > { %v1947_v36 = vpop.f32.mrf.mxu2 }
 0x1c3   : > { %v859_v35 = vpop.f32.mrf.mxu1  ;;  %3112 = vmatpush.msrb.mxu3 %v3923_v34  ;;  %v1950_v59 = vadd.f32 %v1947_v36, %v1890_v22  ;;  %v2036_v38 = vpop.f32.mrf.mxu3  ;;  %v3947_v22 = vld [vmem:[%s5220_s9 + $0x4d0] sm:$0xff]  ;;  %v3942_v36 = vld [vmem:[%s5214_s3 + $0x98] sm:$0x7] }
 0x1c4   : > { %v860_v37 = vadd.f32 %v4707_v42, %v859_v35  ;;  %v611_v39 = vpop.f32.mrf.mxu0  ;;  %v2039_v41 = vadd.f32 %v2036_v38, %v1979_v26  ;;  %v3956_v35 = vld [vmem:[%s5220_s9 + $0x4f8] sm:$0xff]  ;;  %v3955_v38 = vld [vmem:[%s5220_s9 + $0x4f0] sm:$0xff] }
 0x1c5   : > { %v612_v44 = vadd.f32 %v4716_v50, %v611_v39  ;;  %3113 = vmatpush.msrb.mxu3 %v3922_v60  ;;  %v3954_v39 = vld [vmem:[%s5220_s9 + $0x4e8] sm:$0xff] }
 0x1c6   : > { %v915_v45 = vmax.f32 %v860_v37, 0.0 }
 0x1c7   : > { %v3001_v48 = vld [vmem:[#allocation3 + $0x110] sm:$0xff]  ;;  %v667_v49 = vmax.f32 %v612_v44, 0.0  ;;  %3114 = vmatpush.msrb.mxu3 %v3921_v40  ;;  %3904 = vmatmul.msk.f32.vlgmr.msrb.gmra.mxu2 %vm674_vm1, %v2940_v43 }
 0x1c8   : > { %958 = vst.msk [vmem:[#allocation3 + $0x118] sm:$0xff] %vm922_vm2, %v915_v45  ;;  %3917 = vmatmul.msk.f32.vlgmr.msra.gmra.mxu3 %vm922_vm2, %v3001_v48  ;;  %3919 = vmatpush.msk.msrb.mxu2 %vm979_vm0, %v3918_v47  ;;  %v3000_v63 = vld [vmem:[#allocation2 + $0x110] sm:$0xff]  ;;  %v3953_v47 = vld [vmem:[%s5220_s9 + $0x4e0] sm:$0xff] }
 0x1c9   : > { %710 = vst.msk [vmem:[#allocation2 + $0x118] sm:$0xff] %vm674_vm1, %v667_v49  ;;  %3171 = vmatpush.msra.mxu3 %v3932_v46 }
 0x1ca   : > { %v2007_v54 = vpop.f32.mrf.mxu2 }
 0x1cb   : > { %v862_v53 = vpop.f32.mrf.mxu1  ;;  %3172 = vmatpush.msra.mxu3 %v3931_v51  ;;  %v2010_v56 = vadd.f32 %v2007_v54, %v1950_v59  ;;  %v2096_v57 = vpop.f32.mrf.mxu3  ;;  %v3950_v54 = vld [vmem:[%s5214_s3 + $0x9c] sm:$0x7] }
 0x1cc   : > { %v863_v55 = vadd.f32 %v4707_v42, %v862_v53  ;;  %v614_v58 = vpop.f32.mrf.mxu0  ;;  %v2099_v62 = vadd.f32 %v2096_v57, %v2039_v41  ;;  %v3964_v53 = vld [vmem:[%s5220_s9 + $0x518] sm:$0xff]  ;;  %v3963_v57 = vld [vmem:[%s5220_s9 + $0x510] sm:$0xff] }
 0x1cd   : > { %v615_v0 = vadd.f32 %v4716_v50, %v614_v58  ;;  %3173 = vmatpush.msra.mxu3 %v3930_v52  ;;  %v3962_v58 = vld [vmem:[%s5220_s9 + $0x508] sm:$0xff] }
 0x1ce   : > { %v916_v1 = vmax.f32 %v863_v55, 0.0 }
 0x1cf   : > { %v3061_v4 = vld [vmem:[#allocation3 + $0x118] sm:$0xff]  ;;  %v668_v5 = vmax.f32 %v615_v0, 0.0  ;;  %3174 = vmatpush.msra.mxu3 %v3929_v61  ;;  %3912 = vmatmul.msk.f32.vlgmr.msra.gmra.mxu2 %vm674_vm1, %v3000_v63 }
 0x1d0   : > { %959 = vst.msk [vmem:[#allocation3 + $0x120] sm:$0xff] %vm922_vm2, %v916_v1  ;;  %3925 = vmatmul.msk.f32.vlgmr.msrb.gmra.mxu3 %vm922_vm2, %v3061_v4  ;;  %3927 = vmatpush.msk.msra.mxu2 %vm979_vm0, %v3926_v3  ;;  %v3060_v15 = vld [vmem:[#allocation2 + $0x118] sm:$0xff]  ;;  %v3961_v3 = vld [vmem:[%s5220_s9 + $0x500] sm:$0xff] }
 0x1d1   : > { %711 = vst.msk [vmem:[#allocation2 + $0x120] sm:$0xff] %vm674_vm1, %v668_v5  ;;  %3231 = vmatpush.msrb.mxu3 %v3940_v2 }
 0x1d2   : > { %v2067_v9 = vpop.f32.mrf.mxu2 }
 0x1d3   : > { %v865_v8 = vpop.f32.mrf.mxu1  ;;  %3232 = vmatpush.msrb.mxu3 %v3939_v6  ;;  %v2156_v11 = vpop.f32.mrf.mxu3  ;;  %v2070_v23 = vadd.f32 %v2067_v9, %v2010_v56 }
 0x1d4   : > { %v866_v10 = vadd.f32 %v4707_v42, %v865_v8  ;;  %v617_v12 = vpop.f32.mrf.mxu0  ;;  %v2159_v14 = vadd.f32 %v2156_v11, %v2099_v62  ;;  %v3972_v8 = vld [vmem:[%s5220_s9 + $0x538] sm:$0xff]  ;;  %v3970_v11 = vld [vmem:[%s5220_s9 + $0x528] sm:$0xff] }
 0x1d5   : > { %v618_v16 = vadd.f32 %v4716_v50, %v617_v12  ;;  %3233 = vmatpush.msrb.mxu3 %v3938_v7 }
 0x1d6   : > { %v917_v17 = vmax.f32 %v866_v10, 0.0 }
 0x1d7   : > { %v3121_v20 = vld [vmem:[#allocation3 + $0x120] sm:$0xff]  ;;  %v669_v21 = vmax.f32 %v618_v16, 0.0  ;;  %3234 = vmatpush.msrb.mxu3 %v3937_v13  ;;  %3920 = vmatmul.msk.f32.vlgmr.msrb.gmra.mxu2 %vm674_vm1, %v3060_v15 }
 0x1d8   : > { %960 = vst.msk [vmem:[#allocation3 + $0x128] sm:$0xff] %vm922_vm2, %v917_v17  ;;  %3933 = vmatmul.msk.f32.vlgmr.msra.gmra.mxu3 %vm922_vm2, %v3121_v20  ;;  %3935 = vmatpush.msk.msrb.mxu2 %vm979_vm0, %v3934_v19  ;;  %v3120_v33 = vld [vmem:[#allocation2 + $0x120] sm:$0xff] }
 0x1d9   : > { %712 = vst.msk [vmem:[#allocation2 + $0x128] sm:$0xff] %vm674_vm1, %v669_v21  ;;  %3291 = vmatpush.msra.mxu3 %v3948_v18  ;;  %v3969_v19 = vld [vmem:[%s5220_s9 + $0x520] sm:$0xff] }
 0x1da   : > { %v2127_v26 = vpop.f32.mrf.mxu2 }
 0x1db   : > { %v868_v25 = vpop.f32.mrf.mxu1  ;;  %3292 = vmatpush.msra.mxu3 %v3947_v22  ;;  %v2130_v28 = vadd.f32 %v2127_v26, %v2070_v23  ;;  %v2216_v29 = vpop.f32.mrf.mxu3  ;;  %v3999_v22 = vld [vmem:[%s5213_s2] ss:$0 sm:$0xff] }
 0x1dc   : > { %v869_v27 = vadd.f32 %v4707_v42, %v868_v25  ;;  %v620_v30 = vpop.f32.mrf.mxu0  ;;  %v2219_v32 = vadd.f32 %v2216_v29, %v2159_v14  ;;  %v3998_v14 = vld [vmem:[%s5219_s8] ss:$0 sm:$0xff]  ;;  %v3966_v25 = vld [vmem:[%s5214_s3 + $0xa4] sm:$0x7] }
 0x1dd   : > { %v621_v34 = vadd.f32 %v4716_v50, %v620_v30  ;;  %3293 = vmatpush.msra.mxu3 %v3946_v24 }
 0x1de   : > { %v918_v60 = vmax.f32 %v869_v27, 0.0 }
 0x1df   : > { %v3181_v37 = vld [vmem:[#allocation3 + $0x128] sm:$0xff]  ;;  %v670_v59 = vmax.f32 %v621_v34, 0.0  ;;  %3294 = vmatpush.msra.mxu3 %v3945_v31  ;;  %3928 = vmatmul.msk.f32.vlgmr.msra.gmra.mxu2 %vm674_vm1, %v3120_v33 }
 0x1e0   : > { %961 = vst.msk [vmem:[#allocation3 + $0x130] sm:$0xff] %vm922_vm2, %v918_v60  ;;  %3941 = vmatmul.msk.f32.vlgmr.msrb.gmra.mxu3 %vm922_vm2, %v3181_v37  ;;  %3943 = vmatpush.msk.msra.mxu2 %vm979_vm0, %v3942_v36  ;;  %v3180_v49 = vld [vmem:[#allocation2 + $0x128] sm:$0xff] }
 0x1e1   : > { %713 = vst.msk [vmem:[#allocation2 + $0x130] sm:$0xff] %vm674_vm1, %v670_v59  ;;  %3351 = vmatpush.msrb.mxu3 %v3956_v35 }
 0x1e2   : > { %v2187_v41 = vpop.f32.mrf.mxu2 }
 0x1e3   : > { %v871_v40 = vpop.f32.mrf.mxu1  ;;  %3352 = vmatpush.msrb.mxu3 %v3955_v38  ;;  %v2190_v44 = vadd.f32 %v2187_v41, %v2130_v28  ;;  %v2276_v45 = vpop.f32.mrf.mxu3 }
 0x1e4   : > { %v872_v43 = vadd.f32 %v4707_v42, %v871_v40  ;;  %v623_v46 = vpop.f32.mrf.mxu0  ;;  %v2279_v48 = vadd.f32 %v2276_v45, %v2219_v32 }
 0x1e5   : > { %v624_v51 = vadd.f32 %v4716_v50, %v623_v46  ;;  %3353 = vmatpush.msrb.mxu3 %v3954_v39 }
 0x1e6   : > { %v919_v52 = vmax.f32 %v872_v43, 0.0 }
 0x1e7   : > { %v3241_v55 = vld [vmem:[#allocation3 + $0x130] sm:$0xff]  ;;  %v671_v56 = vmax.f32 %v624_v51, 0.0  ;;  %3354 = vmatpush.msrb.mxu3 %v3953_v47  ;;  %3936 = vmatmul.msk.f32.vlgmr.msrb.gmra.mxu2 %vm674_vm1, %v3180_v49 }
 0x1e8   : > { %962 = vst.msk [vmem:[#allocation3 + $0x138] sm:$0xff] %vm922_vm2, %v919_v52  ;;  %3949 = vmatmul.msk.f32.vlgmr.msra.gmra.mxu3 %vm922_vm2, %v3241_v55  ;;  %3951 = vmatpush.msk.msrb.mxu2 %vm979_vm0, %v3950_v54  ;;  %v3240_v5 = vld [vmem:[#allocation2 + $0x130] sm:$0xff] }
 0x1e9   : > { %714 = vst.msk [vmem:[#allocation2 + $0x138] sm:$0xff] %vm674_vm1, %v671_v56  ;;  %3411 = vmatpush.msra.mxu3 %v3964_v53 }
 0x1ea   : > { %v2247_v62 = vpop.f32.mrf.mxu2 }
 0x1eb   : > { %v874_v61 = vpop.f32.mrf.mxu1  ;;  %3412 = vmatpush.msra.mxu3 %v3963_v57  ;;  %v2250_v0 = vadd.f32 %v2247_v62, %v2190_v44  ;;  %v2336_v1 = vpop.f32.mrf.mxu3 }
 0x1ec   : > { %v875_v63 = vadd.f32 %v4707_v42, %v874_v61  ;;  %v626_v2 = vpop.f32.mrf.mxu0  ;;  %v2339_v4 = vadd.f32 %v2336_v1, %v2279_v48  ;;  %v3958_v42 = vld [vmem:[%s5214_s3 + $0xa0] sm:$0x7] }
 0x1ed   : > { %v627_v6 = vadd.f32 %v4716_v50, %v626_v2  ;;  %3413 = vmatpush.msra.mxu3 %v3962_v58  ;;  %v3971_v50 = vld [vmem:[%s5220_s9 + $0x530] sm:$0xff] }
 0x1ee   : > { %v920_v7 = vmax.f32 %v875_v63, 0.0 }
 0x1ef   : > { %v3301_v9 = vld [vmem:[#allocation3 + $0x138] sm:$0xff]  ;;  %v672_v10 = vmax.f32 %v627_v6, 0.0  ;;  %3414 = vmatpush.msra.mxu3 %v3961_v3  ;;  %3944 = vmatmul.msk.f32.vlgmr.msra.gmra.mxu2 %vm674_vm1, %v3240_v5 }
 0x1f0   : > { %963 = vst.msk [vmem:[#allocation3 + $0x140] sm:$0xff] %vm922_vm2, %v920_v7  ;;  %3957 = vmatmul.msk.f32.vlgmr.msrb.gmra.mxu3 %vm922_vm2, %v3301_v9  ;;  %3959 = vmatpush.msk.msra.mxu2 %vm979_vm0, %v3958_v42  ;;  %v3300_v21 = vld [vmem:[#allocation2 + $0x138] sm:$0xff] }
 0x1f1   : > { %715 = vst.msk [vmem:[#allocation2 + $0x140] sm:$0xff] %vm674_vm1, %v672_v10  ;;  %3471 = vmatpush.msrb.mxu3 %v3972_v8 }
 0x1f2   : > { %v2307_v13 = vpop.f32.mrf.mxu2 }
 0x1f3   : > { %v877_v12 = vpop.f32.mrf.mxu1  ;;  %3472 = vmatpush.msrb.mxu3 %v3971_v50  ;;  %v2310_v16 = vadd.f32 %v2307_v13, %v2250_v0  ;;  %v2396_v17 = vpop.f32.mrf.mxu3  ;;  %v3488_v13 = vld [vmem:[%s5216_s5 + $0x10] sm:$0xff] }
 0x1f4   : > { %v878_v15 = vadd.f32 %v3998_v14, %v877_v12  ;;  %v629_v18 = vpop.f32.mrf.mxu0  ;;  %v2399_v20 = vadd.f32 %v2396_v17, %v2339_v4  ;;  %v3487_v14 = vld [vmem:[%s5216_s5 + $0x8] sm:$0xff] }
 0x1f5   : > { %v630_v23 = vadd.f32 %v3999_v22, %v629_v18  ;;  %3473 = vmatpush.msrb.mxu3 %v3970_v11  ;;  %v3489_v11 = vld [vmem:[%s5216_s5 + $0x18] sm:$0xff] }
 0x1f6   : > { %v921_v24 = vmax.f32 %v878_v15, 0.0  ;;  %v3486_v15 = vld [vmem:[%s5216_s5] sm:$0xff] }
 0x1f7   : > { %v3361_v26 = vld [vmem:[#allocation3 + $0x140] sm:$0xff]  ;;  %v673_v27 = vmax.f32 %v630_v23, 0.0  ;;  %3474 = vmatpush.msrb.mxu3 %v3969_v19  ;;  %3952 = vmatmul.msk.f32.vlgmr.msrb.gmra.mxu2 %vm674_vm1, %v3300_v21 }
 0x1f8   : > { %964 = vst.msk [vmem:[#allocation3 + $0x148] sm:$0xff] %vm922_vm2, %v921_v24  ;;  %3965 = vmatmul.msk.f32.vlgmr.msra.gmra.mxu3 %vm922_vm2, %v3361_v26  ;;  %3967 = vmatpush.msk.msrb.mxu2 %vm979_vm0, %v3966_v25  ;;  %v3360_v32 = vld [vmem:[#allocation2 + $0x140] sm:$0xff] }
 0x1f9   : > { %716 = vst.msk [vmem:[#allocation2 + $0x148] sm:$0xff] %vm674_vm1, %v673_v27 }
 0x1fa   : > { %v2367_v28 = vpop.f32.mrf.mxu2 }
 0x1fb   : > { %v2370_v29 = vadd.f32 %v2367_v28, %v2310_v16  ;;  %v2456_v30 = vpop.f32.mrf.mxu3 }
 0x1fc   : > { %v2459_v31 = vadd.f32 %v2456_v30, %v2399_v20 }
 0x1ff   : > { %v3421_v33 = vld [vmem:[#allocation3 + $0x148] sm:$0xff]  ;;  %3960 = vmatmul.msk.f32.vlgmr.msra.gmra.mxu2 %vm674_vm1, %v3360_v32 }
 0x200   : > { %3973 = vmatmul.msk.f32.vlgmr.msrb.gmra.mxu3 %vm922_vm2, %v3421_v33  ;;  %v3420_v37 = vld [vmem:[#allocation2 + $0x148] sm:$0xff]  ;;  %3509 = vmatpush.msra.mxu2 %v3489_v11 }
 0x202   : > { %v2427_v34 = vpop.f32.mrf.mxu2  ;;  %3510 = vmatpush.msra.mxu2 %v3488_v13 }
 0x203   : > { %v2430_v60 = vadd.f32 %v2427_v34, %v2370_v29  ;;  %v2516_v35 = vpop.f32.mrf.mxu3 }
 0x204   : > { %v2519_v36 = vadd.f32 %v2516_v35, %v2459_v31  ;;  %3511 = vmatpush.msra.mxu2 %v3487_v14 }
 0x206   : > { %3512 = vmatpush.msra.mxu2 %v3486_v15 }
 0x207   : > { %3968 = vmatmul.msk.f32.vlgmr.msrb.gmra.mxu2 %vm674_vm1, %v3420_v37 }
 0x20a   : > { %v2487_v59 = vpop.f32.mrf.mxu2 }
 0x20b   : > { %v2490_v38 = vadd.f32 %v2487_v59, %v2430_v60  ;;  %v2576_v39 = vpop.f32.mrf.mxu3 }
 0x20c   : > { %v2579_v40 = vadd.f32 %v2576_v39, %v2519_v36  ;;  %v3987_v36 = vld [vmem:[%s5221_s10] ss:$0 sm:$0xff] }
 0x212   : > { %v2547_v41 = vpop.f32.mrf.mxu2 }
 0x213   : > { %v2550_v43 = vadd.f32 %v2547_v41, %v2490_v38  ;;  %v2636_v44 = vpop.f32.mrf.mxu3 }
 0x214   : > { %v2639_v45 = vadd.f32 %v2636_v44, %v2579_v40 }
 0x21a   : > { %v2607_v46 = vpop.f32.mrf.mxu2 }
 0x21b   : > { %v2610_v47 = vadd.f32 %v2607_v46, %v2550_v43  ;;  %v2696_v48 = vpop.f32.mrf.mxu3 }
 0x21c   : > { %v2699_v49 = vadd.f32 %v2696_v48, %v2639_v45  ;;  %v3988_v45 = vld [vmem:[%s5215_s4] ss:$0 sm:$0xff] }
 0x222   : > { %v2667_v51 = vpop.f32.mrf.mxu2 }
 0x223   : > { %v2670_v52 = vadd.f32 %v2667_v51, %v2610_v47  ;;  %v2756_v53 = vpop.f32.mrf.mxu3 }
 0x224   : > { %v2759_v54 = vadd.f32 %v2756_v53, %v2699_v49 }
 0x22a   : > { %v2727_v55 = vpop.f32.mrf.mxu2 }
 0x22b   : > { %v2730_v56 = vadd.f32 %v2727_v55, %v2670_v52  ;;  %v2816_v57 = vpop.f32.mrf.mxu3 }
 0x22c   : > { %v2819_v58 = vadd.f32 %v2816_v57, %v2759_v54 }
 0x232   : > { %v2787_v61 = vpop.f32.mrf.mxu2 }
 0x233   : > { %v2790_v62 = vadd.f32 %v2787_v61, %v2730_v56  ;;  %v2876_v63 = vpop.f32.mrf.mxu3  ;;  %v3989_v56 = vld [vmem:[#allocation4] ss:$0 sm:$0xff] }
 0x234   : > { %v2879_v16 = vadd.f32 %v2876_v63, %v2819_v58 }
 0x23a   : > { %v2847_v0 = vpop.f32.mrf.mxu2 }
 0x23b   : > { %v2936_v1 = vpop.f32.mrf.mxu3  ;;  %v2850_v22 = vadd.f32 %v2847_v0, %v2790_v62 }
 0x23c   : > { %v2939_v17 = vadd.f32 %v2936_v1, %v2879_v16 }
 0x242   : > { %v2907_v2 = vpop.f32.mrf.mxu2 }
 0x243   : > { %v2996_v3 = vpop.f32.mrf.mxu3  ;;  %v2910_v24 = vadd.f32 %v2907_v2, %v2850_v22 }
 0x244   : > { %v2999_v20 = vadd.f32 %v2996_v3, %v2939_v17 }
 0x24a   : > { %v2967_v4 = vpop.f32.mrf.mxu2 }
 0x24b   : > { %v3056_v5 = vpop.f32.mrf.mxu3  ;;  %v2970_v27 = vadd.f32 %v2967_v4, %v2910_v24 }
 0x24c   : > { %v3059_v21 = vadd.f32 %v3056_v5, %v2999_v20 }
 0x252   : > { %v3027_v6 = vpop.f32.mrf.mxu2 }
 0x253   : > { %v3116_v7 = vpop.f32.mrf.mxu3  ;;  %v3030_v30 = vadd.f32 %v3027_v6, %v2970_v27 }
 0x254   : > { %v3119_v23 = vadd.f32 %v3116_v7, %v3059_v21 }
 0x25a   : > { %v3087_v8 = vpop.f32.mrf.mxu2 }
 0x25b   : > { %v3176_v42 = vpop.f32.mrf.mxu3  ;;  %v3090_v32 = vadd.f32 %v3087_v8, %v3030_v30 }
 0x25c   : > { %v3179_v25 = vadd.f32 %v3176_v42, %v3119_v23 }
 0x262   : > { %v3147_v9 = vpop.f32.mrf.mxu2 }
 0x263   : > { %v3236_v10 = vpop.f32.mrf.mxu3  ;;  %v3150_v34 = vadd.f32 %v3147_v9, %v3090_v32 }
 0x264   : > { %v3239_v29 = vadd.f32 %v3236_v10, %v3179_v25 }
 0x26a   : > { %v3207_v50 = vpop.f32.mrf.mxu2 }
 0x26b   : > { %v3296_v12 = vpop.f32.mrf.mxu3  ;;  %v3210_v37 = vadd.f32 %v3207_v50, %v3150_v34 }
 0x26c   : > { %v3299_v31 = vadd.f32 %v3296_v12, %v3239_v29 }
 0x272   : > { %v3267_v18 = vpop.f32.mrf.mxu2 }
 0x273   : > { %v3356_v19 = vpop.f32.mrf.mxu3  ;;  %v3270_v39 = vadd.f32 %v3267_v18, %v3210_v37 }
 0x274   : > { %v3359_v33 = vadd.f32 %v3356_v19, %v3299_v31 }
 0x27a   : > { %v3327_v26 = vpop.f32.mrf.mxu2 }
 0x27b   : > { %v3416_v28 = vpop.f32.mrf.mxu3  ;;  %v3330_v41 = vadd.f32 %v3327_v26, %v3270_v39 }
 0x27c   : > { %v3419_v60 = vadd.f32 %v3416_v28, %v3359_v33 }
 0x282   : > { %v3387_v35 = vpop.f32.mrf.mxu2 }
 0x283   : > { %v3476_v59 = vpop.f32.mrf.mxu3  ;;  %v3390_v44 = vadd.f32 %v3387_v35, %v3330_v41 }
 0x284   : > { %v3479_v38 = vadd.f32 %v3476_v59, %v3419_v60 }
 0x286   : > { %v3524_v40 = vadd.f32 %v3987_v36, %v3479_v38 }
 0x288   : > { %v3526_v43 = vsel %vm3525_vm3, %v3524_v40, -inf }
 0x289   : > { %3527 = vmax.xlane.f32.xlu0 %v3526_v43 }
 0x28a   : > { %v3447_v46 = vpop.f32.mrf.mxu2 }
 0x28b   : > { %v3450_v47 = vadd.f32 %v3447_v46, %v3390_v44 }
 0x28d   : > { %v3484_v48 = vadd.f32 %v3988_v45, %v3450_v47 }
 0x28f   : > { %v3485_v49 = vmax.f32 %v3484_v48, 0.0 }
 0x291   : > { %3974 = vmatmul.msk.f32.vlgmr.msra.gmra.mxu2 %vm922_vm2, %v3485_v49 }
 0x2fc   : > { %v3528_v51 = vpop.xlane.xlu0 %3527 }
 0x2fd   : > { %v3529_v52 = vsub.f32 %v3524_v40, %v3528_v51 }
 0x2ff   : > { %v3530_v53 = vmul.f32 1.442695, %v3529_v52 }
 0x301   : > { %3990 = vpow2.f32 %v3530_v53 }
 0x307   : > { %v3991_v54 = vpop.eup %3990 }
 0x308   : > { %v3532_v55 = vsel %vm3525_vm3, %v3991_v54, 0.0 }
 0x309   : > { %3533 = vadd.xlane.f32.xlu0 %v3532_v55 }
 0x314   : > { %v3514_v57 = vpop.f32.mrf.mxu2 }
 0x315   : > { %v3515_v58 = vadd.f32 %v3989_v56, %v3514_v57 }
 0x317   : > { %3992 = vtanh.f32 %v3515_v58 }
 0x31d   : > { %v3993_v61 = vpop.eup %3992 }
 0x31e   : > { %3519 = vst.msk [vmem:[%s426_s30] sm:$0xff] %vm3518_vm4, %v3993_v61 }
 0x37c   : > { %v3534_v62 = vpop.xlane.xlu0 %3533 }
 0x37d   : > { %3994 = vrcp.f32 %v3534_v62  ;;  %v3546_v2 = vand.u32 2147483648, %v3534_v62  ;;  %v3544_v4 = vand.u32 2147483647, %v3534_v62  ;;  %vm3540_vm6 = vweird.f32 %v3534_v62 }
 0x37f   : > { %v3547_v6 = vor.u32 1.1754944e-38, %v3546_v2  ;;  %vm3545_vm8 = vcmp.eq.f32.partialorder %v3544_v4, 8.507059e+37 }
 0x383   : > { %v3995_v63 = vpop.eup %3994 }
 0x384   : > { %v3536_v0 = vmul.f32 %v3995_v63, %v3534_v62  ;;  %vm3541_vm5 = vweird.f32 %v3995_v63 }
 0x385   : > { %vm3542_vm7 = vmor %vm3540_vm6, %vm3541_vm5 }
 0x386   : > { %v3537_v1 = vsub.f32 1.0, %v3536_v0 }
 0x388   : > { %v3538_v3 = vmul.f32 %v3995_v63, %v3537_v1 }
 0x38a   : > { %v3539_v5 = vadd.f32 %v3995_v63, %v3538_v3 }
 0x38c   : > { %v3543_v7 = vsel %vm3542_vm7, %v3995_v63, %v3539_v5 }
 0x38d   : > { %v3548_v8 = vsel %vm3545_vm8, %v3547_v6, %v3543_v7 }
 0x38e   : > { %v3549_v42 = vmul.f32 %v3991_v54, %v3548_v8 }
 0x390   : > { %3550 = vst.msk [vmem:[%s422_s14] sm:$0xff] %vm3525_vm3, %v3549_v42 }
 0x391 PF: > { %s25_s23 = sadd.s32 1, %s4006_s23  }
 0x392   : > { %p22_p5 = scmp.ge.s32.totalorder %s25_s23, 4  }
 0x394   :  { %24 = sbr.rel (!%p22_p5) target bundleno = 3 (0x3), region = 188 }

</bundles_post_ra>
